<compile_context>
chip_gen: v5e
topology: v5e:2x2
jax: 0.10.0
libtpu: 0.0.40
codegen_flags: <defaults>
</compile_context>

<pallas_src>
import jax
import jax.numpy as jnp
import numpy as np
from jax.experimental import pallas as pl
from jax.experimental.pallas import tpu as pltpu


# ----------------------------------------------------------------------------
# Fused kernel: all conv layers + score MLP, grid = (B / G,).
# Per grid step (one group of G batch elements), everything stays in VMEM:
#   x0 = boundary                                               (N, G*D)
#   per layer:
#     xs[r*N+u, g*D+d] = x[u, g*D+d] * rel[r, d]                (2R*N, G*D) bf16
#     agg  = A_flat @ xs   (+ boundary)                         (N, G*D)  f32 acc
#     x    = relu(cat([x, agg]) @ [W_in; W_agg] + b)            (N, G*H)
#   score:
#     z = relu(x @ W1_h + (q @ W1_q + b1));   s = z @ W2        (N, G)
# ----------------------------------------------------------------------------
def _fused_nbf_kernel(a_ref, rel_ref, wcomb_ref, bias_ref, w1h_ref, w2_ref,
                      bnd_ref, qb_ref, out_ref, x_scr):
    bnd = bnd_ref[0]                                    # (N, G*D) f32
    x_scr[...] = bnd.astype(x_scr.dtype)                # layer-0 input = boundary

    num_layers = rel_ref.shape[0]                       # static trip count
    for l in range(num_layers):
        x = x_scr[...]                                  # (N, G*D) bf16
        rel = rel_ref[l]                                # (2R, G*D) bf16
        # Relation-scaled messages, built directly in bf16; reshape merges
        # leading dims only (lane axis untouched).
        xs = (x[None, :, :] * rel[:, None, :]).reshape(-1, x.shape[-1])
        # Single big-K MXU contraction with f32 accumulation.
        agg = jnp.dot(a_ref[...], xs, preferred_element_type=jnp.float32)
        aggb = agg + bnd                                # boundary self-message
        # Fused combine: relu(cat([input, update]) @ [W_in; W_agg] + b).
        feat = jnp.concatenate([x, aggb.astype(x.dtype)], axis=-1)   # (N, 2G*D)
        h = jnp.dot(feat, wcomb_ref[l],
                    preferred_element_type=jnp.float32) + bias_ref[l]
        x_scr[...] = jnp.maximum(h, 0.0).astype(x_scr.dtype)

    # Score MLP (block-diagonal over the G batch elements of this group).
    hidden = x_scr[...]                                 # (N, G*H) bf16
    z = jnp.dot(hidden, w1h_ref[...],
                preferred_element_type=jnp.float32) + qb_ref[0]      # (N, G*F)
    z = jnp.maximum(z, 0.0)
    s = jnp.dot(z.astype(w2_ref.dtype), w2_ref[...],
                preferred_element_type=jnp.float32)                  # (N, G)
    out_ref[0] = s.astype(out_ref.dtype)


def _build_fused_call(N, R2N, L, R2, GD, GH, GF, G, NB, single_buffer_consts):
    def const_spec(shape):
        idx = (0,) * len(shape)
        if single_buffer_consts:
            # Constant index map -> fetched once; single-buffered to halve the
            # VMEM footprint of the resident operands (A_flat in particular).
            return pl.BlockSpec(shape, lambda gi, _idx=idx: _idx,
                                pipeline_mode=pl.Buffered(1))
        return pl.BlockSpec(shape, lambda gi, _idx=idx: _idx)

    return pl.pallas_call(
        _fused_nbf_kernel,
        out_shape=jax.ShapeDtypeStruct((NB, N, G), jnp.float32),
        grid_spec=pltpu.PrefetchScalarGridSpec(
            num_scalar_prefetch=0,
            grid=(NB,),
            in_specs=[
                const_spec((N, R2N)),            # A_flat (bf16), resident
                const_spec((L, R2, GD)),         # relation table (bf16)
                const_spec((L, 2 * GD, GH)),     # [W_in; W_agg] block-diag (bf16)
                const_spec((L, 1, GH)),          # layer bias (f32)
                const_spec((GH, GF)),            # W1_h block-diag (bf16)
                const_spec((GF, G)),             # W2 block-diag (bf16)
                pl.BlockSpec((1, N, GD), lambda gi: (gi, 0, 0)),   # boundary group
                pl.BlockSpec((1, 1, GF), lambda gi: (gi, 0, 0)),   # query-bias row
            ],
            out_specs=pl.BlockSpec((1, N, G), lambda gi: (gi, 0, 0)),
            scratch_shapes=[pltpu.VMEM((N, GD), jnp.bfloat16)],    # hidden state
        ),
        compiler_params=pltpu.CompilerParams(
            dimension_semantics=("parallel",),
            # <= 56 MiB keeps v7x (64 MiB physical) safe; raise toward ~100 MiB
            # on v5e / v6e when N grows.
            vmem_limit_bytes=56 * 1024 * 1024),
    )


# ----------------------------------------------------------------------------
# Forward (glue in plain JAX, hot path in the fused kernel).
# ----------------------------------------------------------------------------
def negative_sample_to_tail(h_index, t_index, r_index, num_relation):
    is_t_neg = jnp.all(h_index == h_index[:, :1], axis=-1, keepdims=True)
    new_h = jnp.where(is_t_neg, h_index, t_index)
    new_t = jnp.where(is_t_neg, t_index, h_index)
    new_r = jnp.where(is_t_neg, r_index, r_index + num_relation)
    return new_h, new_t, new_r


def nbfnet_forward(adj, params, h_index, t_index, r_index, num_relation,
                   group=4):
    B = h_index.shape[0]
    R2, N, _ = adj.shape
    h_index, t_index, r_index = negative_sample_to_tail(
        h_index, t_index, r_index, num_relation)

    query = params["query"][r_index[:, 0]]                 # (B, D)
    D = query.shape[-1]
    layers = params["layers"]
    L = len(layers)
    H = layers[0][1].shape[1]
    F = params["w1"].shape[1]
    # The W_in/W_agg split of the combine Linear and the shared VMEM state
    # buffer require matching dims (true for NBFNet's default configuration).
    assert D == H, "layer input_dim must equal output_dim"
    assert params["w1"].shape[0] == H + D, "MLP expects cat([hidden, query])"

    # indicator(): boundary[b, h_index[b], :] = query[b]
    boundary = jnp.zeros((B, N, D), jnp.float32)
    boundary = boundary.at[jnp.arange(B), h_index[:, 0]].set(query)
    # Per-batch query part of the first MLP layer folded into a bias row.
    qb = query @ params["w1"][H:] + params["b1"]           # (B, F)

    # Pad the batch to a multiple of the per-grid-step group size G.
    G = group
    Bp = ((B + G - 1) // G) * G
    if Bp != B:
        padn = Bp - B
        boundary = jnp.concatenate(
            [boundary, jnp.zeros((padn, N, D), boundary.dtype)], axis=0)
        qb = jnp.concatenate([qb, jnp.zeros((padn, F), qb.dtype)], axis=0)
    NB = Bp // G
    GD, GH, GF = G * D, G * H, G * F

    # Group G batch elements per grid step: nodes on sublanes, (g, feature)
    # flattened on the lane axis.
    bnd_grp = boundary.reshape(NB, G, N, D).transpose(0, 2, 1, 3).reshape(NB, N, GD)
    qb_grp = qb.reshape(NB, 1, GF)

    # Flattened relational adjacency, built once and shared by all layers:
    #   a_flat[v, r*N + u] = adj[r, v, u]        (bf16 MXU operand)
    a_flat = jnp.transpose(adj, (1, 0, 2)).reshape(N, R2 * N).astype(jnp.bfloat16)

    # Stack per-layer parameters (leading L axis) in the kernel's layouts.
    eye = jnp.eye(G, dtype=jnp.float32)
    rel_st = jnp.stack([jnp.tile(rel, (1, G)) for (rel, _, _, _) in layers]
                       ).astype(jnp.bfloat16)                        # (L, 2R, GD)
    wcomb_st = jnp.stack(
        [jnp.concatenate([jnp.kron(eye, w_in), jnp.kron(eye, w_agg)], axis=0)
         for (_, w_in, w_agg, _) in layers]).astype(jnp.bfloat16)    # (L, 2GD, GH)
    bias_st = jnp.stack([jnp.tile(b, (G,)) for (_, _, _, b) in layers]
                        )[:, None, :].astype(jnp.float32)            # (L, 1, GH)
    w1h_blk = jnp.kron(eye, params["w1"][:H]).astype(jnp.bfloat16)   # (GH, GF)
    w2_blk = jnp.kron(eye, params["w2"]).astype(jnp.bfloat16)        # (GF, G)

    operands = (a_flat, rel_st, wcomb_st, bias_st, w1h_blk, w2_blk,
                bnd_grp, qb_grp)
    try:
        out = _build_fused_call(N, R2 * N, L, R2, GD, GH, GF, G, NB,
                                single_buffer_consts=True)(*operands)
        out = jax.block_until_ready(out)
    except Exception:
        # pl.Buffered(1) unsupported on this jax version -> fall back to the
        # default double-buffered pipelining of the constant operands.
        out = _build_fused_call(N, R2 * N, L, R2, GD, GH, GF, G, NB,
                                single_buffer_consts=False)(*operands)
        out = jax.block_until_ready(out)

    # Un-group the lane-packed scores: score[b, v] = out[b // G, v, b % G].
    score = jnp.transpose(out, (0, 2, 1)).reshape(Bp, N)[:B] + params["b2"][0]
    # score.transpose(0, 1).gather(1, t_index)
    return jnp.take_along_axis(score, t_index, axis=1)               # (B, neg)


# ----------------------------------------------------------------------------
# Pure-JAX reference mirroring the kernel's precision (bf16 MXU operands and
# bf16 inter-layer state with f32 accumulation / element-wise math).
# ----------------------------------------------------------------------------
def nbfnet_reference(adj, params, h_index, t_index, r_index, num_relation):
    B = h_index.shape[0]
    R2, N, _ = adj.shape
    h_index, t_index, r_index = negative_sample_to_tail(
        h_index, t_index, r_index, num_relation)
    query = params["query"][r_index[:, 0]]
    D = query.shape[-1]
    boundary = jnp.zeros((B, N, D), jnp.float32)
    boundary = boundary.at[jnp.arange(B), h_index[:, 0]].set(query)
    a_flat = jnp.transpose(adj, (1, 0, 2)).reshape(N, R2 * N).astype(jnp.bfloat16)

    x = boundary.astype(jnp.bfloat16)
    for (rel, w_in, w_agg, b) in params["layers"]:
        rel16 = rel.astype(jnp.bfloat16)
        Dx = x.shape[-1]
        xs = (x[:, None, :, :] * rel16[None, :, None, :]).reshape(B, R2 * N, Dx)
        agg = jnp.einsum("vk,bkd->bvd", a_flat, xs,
                         preferred_element_type=jnp.float32) + boundary
        feat = jnp.concatenate([x, agg.astype(jnp.bfloat16)], axis=-1)
        w_comb = jnp.concatenate([w_in, w_agg], axis=0).astype(jnp.bfloat16)
        out = jnp.einsum("bnk,kh->bnh", feat, w_comb,
                         preferred_element_type=jnp.float32) + b
        x = jnp.maximum(out, 0.0).astype(jnp.bfloat16)

    H = x.shape[-1]
    w1, b1, w2, b2 = params["w1"], params["b1"], params["w2"], params["b2"]
    qb = query @ w1[H:] + b1
    z = jnp.einsum("bnh,hf->bnf", x, w1[:H].astype(jnp.bfloat16),
                   preferred_element_type=jnp.float32) + qb[:, None, :]
    z = jnp.maximum(z, 0.0)
    s = jnp.einsum("bnf,fo->bno", z.astype(jnp.bfloat16),
                   w2.astype(jnp.bfloat16),
                   preferred_element_type=jnp.float32)[..., 0] + b2[0]
    return jnp.take_along_axis(s, t_index, axis=1)


if __name__ == "__main__":
    # Small synthetic problem consistent with the module.
    N = 64            # num_node
    D = 32            # base_layer.input_dim
    H = 32            # base_layer.output_dim
    R = 4             # base_layer.num_relation
    NUM_LAYER = 2
    B = 8             # batch size (multiple of GROUP -> 2 grid steps)
    NEG = 4           # negatives + positive
    E = 96            # directed edges before adding inverses
    F = H + D         # MLP feature_dim (concat_hidden=False)
    GROUP = 4         # batch elements per grid step (G*D = 128 lanes)

    key = jax.random.PRNGKey(0)
    ks = jax.random.split(key, 16)

    # Graph: random edge list, undirected with inverse relations (r + R).
    src = jax.random.randint(ks[0], (E,), 0, N)
    dst = jax.random.randint(ks[1], (E,), 0, N)
    rel = jax.random.randint(ks[2], (E,), 0, R)
    adj = jnp.zeros((2 * R, N, N), jnp.float32)
    adj = adj.at[rel, dst, src].add(1.0)          # forward edges, weight 1
    adj = adj.at[rel + R, src, dst].add(1.0)      # inverse edges

    params = {
        "query": jax.random.normal(ks[3], (2 * R, D), jnp.float32) * 0.5,
        "layers": [],
        "w1": jax.random.normal(ks[4], (F, F), jnp.float32) / np.sqrt(F),
        "b1": jax.random.normal(ks[13], (F,), jnp.float32) * 0.1,
        "w2": jax.random.normal(ks[5], (F, 1), jnp.float32) / np.sqrt(F),
        "b2": jax.random.normal(ks[14], (1,), jnp.float32) * 0.1,
    }
    for i in range(NUM_LAYER):
        lk = jax.random.split(ks[6 + i], 4)
        params["layers"].append((
            jax.random.normal(lk[0], (2 * R, D), jnp.float32) * 0.5,         # rel emb
            jax.random.normal(lk[1], (D, H), jnp.float32) / np.sqrt(2 * D),  # W_in
            jax.random.normal(lk[2], (D, H), jnp.float32) / np.sqrt(2 * D),  # W_agg
            jax.random.normal(lk[3], (H,), jnp.float32) * 0.1,               # bias
        ))

    # Triples: h and r constant along the negative axis (as asserted in forward()).
    h0 = jax.random.randint(ks[10], (B,), 0, N)
    r0 = jax.random.randint(ks[11], (B,), 0, R)
    h_index = jnp.tile(h0[:, None], (1, NEG))
    r_index = jnp.tile(r0[:, None], (1, NEG))
    t_index = jax.random.randint(ks[12], (B, NEG), 0, N)

    out = nbfnet_forward(adj, params, h_index, t_index, r_index, R, group=GROUP)
    out = jax.block_until_ready(out)

    ref = nbfnet_reference(adj, params, h_index, t_index, r_index, R)
    ref = jax.block_until_ready(ref)

    assert out.shape == (B, NEG), out.shape
    np.testing.assert_allclose(np.asarray(out), np.asarray(ref),
                               rtol=5e-3, atol=5e-3)
    print("KERNEL_OK")
</pallas_src>

<mosaic_0001>
module attributes {stable_mosaic.version = 11 : i64} {
  func.func @_fused_nbf_kernel(%arg0: i32, %arg1: memref<64x512xbf16, #tpu.memory_space<vmem>>, %arg2: memref<2x8x128xbf16, #tpu.memory_space<vmem>>, %arg3: memref<2x256x128xbf16, #tpu.memory_space<vmem>>, %arg4: memref<2x1x128xf32, #tpu.memory_space<vmem>>, %arg5: memref<128x256xbf16, #tpu.memory_space<vmem>>, %arg6: memref<256x4xbf16, #tpu.memory_space<vmem>>, %arg7: memref<1x64x128xf32, #tpu.memory_space<vmem>>, %arg8: memref<1x1x256xf32, #tpu.memory_space<vmem>>, %arg9: memref<1x64x4xf32, #tpu.memory_space<vmem>>, %arg10: memref<64x128xbf16, #tpu.memory_space<vmem>>) attributes {dimension_semantics = [#tpu.dimension_semantics<parallel>], iteration_bounds = array<i64: 2>, scalar_prefetch = 0 : i64, scratch_operands = 1 : i64, tpu.core_type = #tpu.core_type<tc>, window_params = [{pipeline_mode = #tpu.pipeline_mode<synchronous>, transform_indices = @transform_0, window_bounds = array<i64: 64, 512>}, {pipeline_mode = #tpu.pipeline_mode<synchronous>, transform_indices = @transform_1, window_bounds = array<i64: 2, 8, 128>}, {pipeline_mode = #tpu.pipeline_mode<synchronous>, transform_indices = @transform_2, window_bounds = array<i64: 2, 256, 128>}, {pipeline_mode = #tpu.pipeline_mode<synchronous>, transform_indices = @transform_3, window_bounds = array<i64: 2, 1, 128>}, {pipeline_mode = #tpu.pipeline_mode<synchronous>, transform_indices = @transform_4, window_bounds = array<i64: 128, 256>}, {pipeline_mode = #tpu.pipeline_mode<synchronous>, transform_indices = @transform_5, window_bounds = array<i64: 256, 4>}, {transform_indices = @transform_6, window_bounds = array<i64: 1, 64, 128>}, {transform_indices = @transform_7, window_bounds = array<i64: 1, 1, 256>}, {transform_indices = @transform_8, window_bounds = array<i64: 1, 64, 4>}]} {
    %c0 = arith.constant 0 : index
    %c0_0 = arith.constant 0 : index
    %c0_1 = arith.constant 0 : index
    %0 = vector.load %arg7[%c0, %c0_0, %c0_1] : memref<1x64x128xf32, #tpu.memory_space<vmem>>, vector<1x64x128xf32>
    %1 = vector.shape_cast %0 : vector<1x64x128xf32> to vector<64x128xf32>
    %2 = arith.truncf %1 : vector<64x128xf32> to vector<64x128xbf16>
    %c0_2 = arith.constant 0 : index
    %c0_3 = arith.constant 0 : index
    %3 = vector.load %arg10[%c0_2, %c0_3] : memref<64x128xbf16, #tpu.memory_space<vmem>>, vector<64x128xbf16>
    tpu.vector_store %arg10[%c0_2, %c0_3], %2 {strides = array<i32>} : memref<64x128xbf16, #tpu.memory_space<vmem>>, vector<64x128xbf16>,
    %c0_4 = arith.constant 0 : index
    %c0_5 = arith.constant 0 : index
    %4 = vector.load %arg10[%c0_4, %c0_5] : memref<64x128xbf16, #tpu.memory_space<vmem>>, vector<64x128xbf16>
    %c0_6 = arith.constant 0 : index
    %c0_7 = arith.constant 0 : index
    %c0_8 = arith.constant 0 : index
    %5 = vector.load %arg2[%c0_6, %c0_7, %c0_8] : memref<2x8x128xbf16, #tpu.memory_space<vmem>>, vector<1x8x128xbf16>
    %6 = vector.shape_cast %5 : vector<1x8x128xbf16> to vector<8x128xbf16>
    %7 = vector.shape_cast %4 : vector<64x128xbf16> to vector<1x64x128xbf16>
    %8 = vector.shape_cast %6 : vector<8x128xbf16> to vector<8x1x128xbf16>
    %9 = vector.broadcast %7 : vector<1x64x128xbf16> to vector<8x64x128xbf16>
    %10 = vector.broadcast %8 : vector<8x1x128xbf16> to vector<8x64x128xbf16>
    %11 = arith.mulf %9, %10 : vector<8x64x128xbf16>
    %12 = vector.shape_cast %11 : vector<8x64x128xbf16> to vector<512x128xbf16>
    %c0_9 = arith.constant 0 : index
    %c0_10 = arith.constant 0 : index
    %13 = vector.load %arg1[%c0_9, %c0_10] : memref<64x512xbf16, #tpu.memory_space<vmem>>, vector<64x512xbf16>
    %cst = arith.constant dense<0.000000e+00> : vector<64x128xf32>
    %14 = tpu.matmul %13, %12, %cst {dimension_numbers = #tpu.dot_dimension_numbers<[1], [0], [0], [1], [0, 0, 1, 1], [], []>} : vector<64x512xbf16>, vector<512x128xbf16>, vector<64x128xf32> -> vector<64x128xf32>
    %15 = arith.addf %14, %1 : vector<64x128xf32>
    %16 = arith.truncf %15 : vector<64x128xf32> to vector<64x128xbf16>
    %17 = tpu.concatenate %4, %16 in 1 : vector<64x128xbf16>, vector<64x128xbf16> -> vector<64x256xbf16>
    %c0_11 = arith.constant 0 : index
    %c0_12 = arith.constant 0 : index
    %c0_13 = arith.constant 0 : index
    %18 = vector.load %arg3[%c0_11, %c0_12, %c0_13] : memref<2x256x128xbf16, #tpu.memory_space<vmem>>, vector<1x256x128xbf16>
    %19 = vector.shape_cast %18 : vector<1x256x128xbf16> to vector<256x128xbf16>
    %cst_14 = arith.constant dense<0.000000e+00> : vector<64x128xf32>
    %20 = tpu.matmul %17, %19, %cst_14 {dimension_numbers = #tpu.dot_dimension_numbers<[1], [0], [0], [1], [0, 0, 1, 1], [], []>} : vector<64x256xbf16>, vector<256x128xbf16>, vector<64x128xf32> -> vector<64x128xf32>
    %c0_15 = arith.constant 0 : index
    %c0_16 = arith.constant 0 : index
    %c0_17 = arith.constant 0 : index
    %21 = vector.load %arg4[%c0_15, %c0_16, %c0_17] : memref<2x1x128xf32, #tpu.memory_space<vmem>>, vector<1x1x128xf32>
    %22 = vector.shape_cast %21 : vector<1x1x128xf32> to vector<1x128xf32>
    %23 = vector.broadcast %22 : vector<1x128xf32> to vector<64x128xf32>
    %24 = arith.addf %20, %23 : vector<64x128xf32>
    %cst_18 = arith.constant 0.000000e+00 : f32
    %25 = vector.broadcast %cst_18 : f32 to vector<64x128xf32>
    %26 = arith.maximumf %24, %25 : vector<64x128xf32>
    %27 = arith.truncf %26 : vector<64x128xf32> to vector<64x128xbf16>
    %c0_19 = arith.constant 0 : index
    %c0_20 = arith.constant 0 : index
    %28 = vector.load %arg10[%c0_19, %c0_20] : memref<64x128xbf16, #tpu.memory_space<vmem>>, vector<64x128xbf16>
    tpu.vector_store %arg10[%c0_19, %c0_20], %27 {strides = array<i32>} : memref<64x128xbf16, #tpu.memory_space<vmem>>, vector<64x128xbf16>,
    %c0_21 = arith.constant 0 : index
    %c0_22 = arith.constant 0 : index
    %29 = vector.load %arg10[%c0_21, %c0_22] : memref<64x128xbf16, #tpu.memory_space<vmem>>, vector<64x128xbf16>
    %c1 = arith.constant 1 : index
    %c0_23 = arith.constant 0 : index
    %c0_24 = arith.constant 0 : index
    %30 = vector.load %arg2[%c1, %c0_23, %c0_24] : memref<2x8x128xbf16, #tpu.memory_space<vmem>>, vector<1x8x128xbf16>
    %31 = vector.shape_cast %30 : vector<1x8x128xbf16> to vector<8x128xbf16>
    %32 = vector.shape_cast %29 : vector<64x128xbf16> to vector<1x64x128xbf16>
    %33 = vector.shape_cast %31 : vector<8x128xbf16> to vector<8x1x128xbf16>
    %34 = vector.broadcast %32 : vector<1x64x128xbf16> to vector<8x64x128xbf16>
    %35 = vector.broadcast %33 : vector<8x1x128xbf16> to vector<8x64x128xbf16>
    %36 = arith.mulf %34, %35 : vector<8x64x128xbf16>
    %37 = vector.shape_cast %36 : vector<8x64x128xbf16> to vector<512x128xbf16>
    %c0_25 = arith.constant 0 : index
    %c0_26 = arith.constant 0 : index
    %38 = vector.load %arg1[%c0_25, %c0_26] : memref<64x512xbf16, #tpu.memory_space<vmem>>, vector<64x512xbf16>
    %cst_27 = arith.constant dense<0.000000e+00> : vector<64x128xf32>
    %39 = tpu.matmul %38, %37, %cst_27 {dimension_numbers = #tpu.dot_dimension_numbers<[1], [0], [0], [1], [0, 0, 1, 1], [], []>} : vector<64x512xbf16>, vector<512x128xbf16>, vector<64x128xf32> -> vector<64x128xf32>
    %40 = arith.addf %39, %1 : vector<64x128xf32>
    %41 = arith.truncf %40 : vector<64x128xf32> to vector<64x128xbf16>
    %42 = tpu.concatenate %29, %41 in 1 : vector<64x128xbf16>, vector<64x128xbf16> -> vector<64x256xbf16>
    %c1_28 = arith.constant 1 : index
    %c0_29 = arith.constant 0 : index
    %c0_30 = arith.constant 0 : index
    %43 = vector.load %arg3[%c1_28, %c0_29, %c0_30] : memref<2x256x128xbf16, #tpu.memory_space<vmem>>, vector<1x256x128xbf16>
    %44 = vector.shape_cast %43 : vector<1x256x128xbf16> to vector<256x128xbf16>
    %cst_31 = arith.constant dense<0.000000e+00> : vector<64x128xf32>
    %45 = tpu.matmul %42, %44, %cst_31 {dimension_numbers = #tpu.dot_dimension_numbers<[1], [0], [0], [1], [0, 0, 1, 1], [], []>} : vector<64x256xbf16>, vector<256x128xbf16>, vector<64x128xf32> -> vector<64x128xf32>
    %c1_32 = arith.constant 1 : index
    %c0_33 = arith.constant 0 : index
    %c0_34 = arith.constant 0 : index
    %46 = vector.load %arg4[%c1_32, %c0_33, %c0_34] : memref<2x1x128xf32, #tpu.memory_space<vmem>>, vector<1x1x128xf32>
    %47 = vector.shape_cast %46 : vector<1x1x128xf32> to vector<1x128xf32>
    %48 = vector.broadcast %47 : vector<1x128xf32> to vector<64x128xf32>
    %49 = arith.addf %45, %48 : vector<64x128xf32>
    %cst_35 = arith.constant 0.000000e+00 : f32
    %50 = vector.broadcast %cst_35 : f32 to vector<64x128xf32>
    %51 = arith.maximumf %49, %50 : vector<64x128xf32>
    %52 = arith.truncf %51 : vector<64x128xf32> to vector<64x128xbf16>
    %c0_36 = arith.constant 0 : index
    %c0_37 = arith.constant 0 : index
    %53 = vector.load %arg10[%c0_36, %c0_37] : memref<64x128xbf16, #tpu.memory_space<vmem>>, vector<64x128xbf16>
    tpu.vector_store %arg10[%c0_36, %c0_37], %52 {strides = array<i32>} : memref<64x128xbf16, #tpu.memory_space<vmem>>, vector<64x128xbf16>,
    %c0_38 = arith.constant 0 : index
    %c0_39 = arith.constant 0 : index
    %54 = vector.load %arg10[%c0_38, %c0_39] : memref<64x128xbf16, #tpu.memory_space<vmem>>, vector<64x128xbf16>
    %c0_40 = arith.constant 0 : index
    %c0_41 = arith.constant 0 : index
    %55 = vector.load %arg5[%c0_40, %c0_41] : memref<128x256xbf16, #tpu.memory_space<vmem>>, vector<128x256xbf16>
    %cst_42 = arith.constant dense<0.000000e+00> : vector<64x256xf32>
    %56 = tpu.matmul %54, %55, %cst_42 {dimension_numbers = #tpu.dot_dimension_numbers<[1], [0], [0], [1], [0, 0, 1, 1], [], []>} : vector<64x128xbf16>, vector<128x256xbf16>, vector<64x256xf32> -> vector<64x256xf32>
    %c0_43 = arith.constant 0 : index
    %c0_44 = arith.constant 0 : index
    %c0_45 = arith.constant 0 : index
    %57 = vector.load %arg8[%c0_43, %c0_44, %c0_45] : memref<1x1x256xf32, #tpu.memory_space<vmem>>, vector<1x1x256xf32>
    %58 = vector.shape_cast %57 : vector<1x1x256xf32> to vector<1x256xf32>
    %59 = vector.broadcast %58 : vector<1x256xf32> to vector<64x256xf32>
    %60 = arith.addf %56, %59 : vector<64x256xf32>
    %cst_46 = arith.constant 0.000000e+00 : f32
    %61 = vector.broadcast %cst_46 : f32 to vector<64x256xf32>
    %62 = arith.maximumf %60, %61 : vector<64x256xf32>
    %63 = arith.truncf %62 : vector<64x256xf32> to vector<64x256xbf16>
    %c0_47 = arith.constant 0 : index
    %c0_48 = arith.constant 0 : index
    %64 = vector.load %arg6[%c0_47, %c0_48] : memref<256x4xbf16, #tpu.memory_space<vmem>>, vector<256x4xbf16>
    %cst_49 = arith.constant dense<0.000000e+00> : vector<64x4xf32>
    %65 = tpu.matmul %63, %64, %cst_49 {dimension_numbers = #tpu.dot_dimension_numbers<[1], [0], [0], [1], [0, 0, 1, 1], [], []>} : vector<64x256xbf16>, vector<256x4xbf16>, vector<64x4xf32> -> vector<64x4xf32>
    %c0_50 = arith.constant 0 : index
    %c0_51 = arith.constant 0 : index
    %c0_52 = arith.constant 0 : index
    %66 = vector.load %arg9[%c0_50, %c0_51, %c0_52] : memref<1x64x4xf32, #tpu.memory_space<vmem>>, vector<1x64x4xf32>
    %67 = vector.shape_cast %66 : vector<1x64x4xf32> to vector<64x4xf32>
    %68 = vector.shape_cast %65 : vector<64x4xf32> to vector<1x64x4xf32>
    tpu.vector_store %arg9[%c0_50, %c0_51, %c0_52], %68 {strides = array<i32>} : memref<1x64x4xf32, #tpu.memory_space<vmem>>, vector<1x64x4xf32>,
    return
  }
  func.func @transform_0(%arg0: i32) -> (i32, i32) {
    %c0_i32 = arith.constant 0 : i32
    %c0_i32_0 = arith.constant 0 : i32
    %c0_i32_1 = arith.constant 0 : i32
    return %c0_i32, %c0_i32_0 : i32, i32
  }
  func.func @transform_1(%arg0: i32) -> (i32, i32, i32) {
    %c0_i32 = arith.constant 0 : i32
    %c0_i32_0 = arith.constant 0 : i32
    %c0_i32_1 = arith.constant 0 : i32
    %c0_i32_2 = arith.constant 0 : i32
    return %c0_i32, %c0_i32_0, %c0_i32_1 : i32, i32, i32
  }
  func.func @transform_2(%arg0: i32) -> (i32, i32, i32) {
    %c0_i32 = arith.constant 0 : i32
    %c0_i32_0 = arith.constant 0 : i32
    %c0_i32_1 = arith.constant 0 : i32
    %c0_i32_2 = arith.constant 0 : i32
    return %c0_i32, %c0_i32_0, %c0_i32_1 : i32, i32, i32
  }
  func.func @transform_3(%arg0: i32) -> (i32, i32, i32) {
    %c0_i32 = arith.constant 0 : i32
    %c0_i32_0 = arith.constant 0 : i32
    %c0_i32_1 = arith.constant 0 : i32
    %c0_i32_2 = arith.constant 0 : i32
    return %c0_i32, %c0_i32_0, %c0_i32_1 : i32, i32, i32
  }
  func.func @transform_4(%arg0: i32) -> (i32, i32) {
    %c0_i32 = arith.constant 0 : i32
    %c0_i32_0 = arith.constant 0 : i32
    %c0_i32_1 = arith.constant 0 : i32
    return %c0_i32, %c0_i32_0 : i32, i32
  }
  func.func @transform_5(%arg0: i32) -> (i32, i32) {
    %c0_i32 = arith.constant 0 : i32
    %c0_i32_0 = arith.constant 0 : i32
    %c0_i32_1 = arith.constant 0 : i32
    return %c0_i32, %c0_i32_0 : i32, i32
  }
  func.func @transform_6(%arg0: i32) -> (i32, i32, i32) {
    %c0_i32 = arith.constant 0 : i32
    %c0_i32_0 = arith.constant 0 : i32
    %c0_i32_1 = arith.constant 0 : i32
    return %arg0, %c0_i32, %c0_i32_0 : i32, i32, i32
  }
  func.func @transform_7(%arg0: i32) -> (i32, i32, i32) {
    %c0_i32 = arith.constant 0 : i32
    %c0_i32_0 = arith.constant 0 : i32
    %c0_i32_1 = arith.constant 0 : i32
    return %arg0, %c0_i32, %c0_i32_0 : i32, i32, i32
  }
  func.func @transform_8(%arg0: i32) -> (i32, i32, i32) {
    %c0_i32 = arith.constant 0 : i32
    %c0_i32_0 = arith.constant 0 : i32
    %c0_i32_1 = arith.constant 0 : i32
    return %arg0, %c0_i32, %c0_i32_0 : i32, i32, i32
  }
}

module attributes {stable_mosaic.version = 11 : i64} {
  func.func @_fused_nbf_kernel(%arg0: i32, %arg1: memref<64x512xbf16, #tpu.memory_space<vmem>>, %arg2: memref<2x8x128xbf16, #tpu.memory_space<vmem>>, %arg3: memref<2x256x128xbf16, #tpu.memory_space<vmem>>, %arg4: memref<2x1x128xf32, #tpu.memory_space<vmem>>, %arg5: memref<128x256xbf16, #tpu.memory_space<vmem>>, %arg6: memref<256x4xbf16, #tpu.memory_space<vmem>>, %arg7: memref<1x64x128xf32, #tpu.memory_space<vmem>>, %arg8: memref<1x1x256xf32, #tpu.memory_space<vmem>>, %arg9: memref<1x64x4xf32, #tpu.memory_space<vmem>>, %arg10: memref<64x128xbf16, #tpu.memory_space<vmem>>) attributes {dimension_semantics = [#tpu.dimension_semantics<parallel>], iteration_bounds = array<i64: 2>, scalar_prefetch = 0 : i64, scratch_operands = 1 : i64, tpu.core_type = #tpu.core_type<tc>, window_params = [{pipeline_mode = #tpu.pipeline_mode<synchronous>, transform_indices = @transform_0, window_bounds = array<i64: 64, 512>}, {pipeline_mode = #tpu.pipeline_mode<synchronous>, transform_indices = @transform_1, window_bounds = array<i64: 2, 8, 128>}, {pipeline_mode = #tpu.pipeline_mode<synchronous>, transform_indices = @transform_2, window_bounds = array<i64: 2, 256, 128>}, {pipeline_mode = #tpu.pipeline_mode<synchronous>, transform_indices = @transform_3, window_bounds = array<i64: 2, 1, 128>}, {pipeline_mode = #tpu.pipeline_mode<synchronous>, transform_indices = @transform_4, window_bounds = array<i64: 128, 256>}, {pipeline_mode = #tpu.pipeline_mode<synchronous>, transform_indices = @transform_5, window_bounds = array<i64: 256, 4>}, {transform_indices = @transform_6, window_bounds = array<i64: 1, 64, 128>}, {transform_indices = @transform_7, window_bounds = array<i64: 1, 1, 256>}, {transform_indices = @transform_8, window_bounds = array<i64: 1, 64, 4>}]} {
    %c0 = arith.constant 0 : index
    %c0_0 = arith.constant 0 : index
    %c0_1 = arith.constant 0 : index
    %0 = vector.load %arg7[%c0, %c0_0, %c0_1] : memref<1x64x128xf32, #tpu.memory_space<vmem>>, vector<1x64x128xf32>
    %1 = vector.shape_cast %0 : vector<1x64x128xf32> to vector<64x128xf32>
    %2 = arith.truncf %1 : vector<64x128xf32> to vector<64x128xbf16>
    %c0_2 = arith.constant 0 : index
    %c0_3 = arith.constant 0 : index
    %3 = vector.load %arg10[%c0_2, %c0_3] : memref<64x128xbf16, #tpu.memory_space<vmem>>, vector<64x128xbf16>
    tpu.vector_store %arg10[%c0_2, %c0_3], %2 {strides = array<i32>} : memref<64x128xbf16, #tpu.memory_space<vmem>>, vector<64x128xbf16>,
    %c0_4 = arith.constant 0 : index
    %c0_5 = arith.constant 0 : index
    %4 = vector.load %arg10[%c0_4, %c0_5] : memref<64x128xbf16, #tpu.memory_space<vmem>>, vector<64x128xbf16>
    %c0_6 = arith.constant 0 : index
    %c0_7 = arith.constant 0 : index
    %c0_8 = arith.constant 0 : index
    %5 = vector.load %arg2[%c0_6, %c0_7, %c0_8] : memref<2x8x128xbf16, #tpu.memory_space<vmem>>, vector<1x8x128xbf16>
    %6 = vector.shape_cast %5 : vector<1x8x128xbf16> to vector<8x128xbf16>
    %7 = vector.shape_cast %4 : vector<64x128xbf16> to vector<1x64x128xbf16>
    %8 = vector.shape_cast %6 : vector<8x128xbf16> to vector<8x1x128xbf16>
    %9 = vector.broadcast %7 : vector<1x64x128xbf16> to vector<8x64x128xbf16>
    %10 = vector.broadcast %8 : vector<8x1x128xbf16> to vector<8x64x128xbf16>
    %11 = arith.mulf %9, %10 : vector<8x64x128xbf16>
    %12 = vector.shape_cast %11 : vector<8x64x128xbf16> to vector<512x128xbf16>
    %c0_9 = arith.constant 0 : index
    %c0_10 = arith.constant 0 : index
    %13 = vector.load %arg1[%c0_9, %c0_10] : memref<64x512xbf16, #tpu.memory_space<vmem>>, vector<64x512xbf16>
    %cst = arith.constant dense<0.000000e+00> : vector<64x128xf32>
    %14 = tpu.matmul %13, %12, %cst {dimension_numbers = #tpu.dot_dimension_numbers<[1], [0], [0], [1], [0, 0, 1, 1], [], []>} : vector<64x512xbf16>, vector<512x128xbf16>, vector<64x128xf32> -> vector<64x128xf32>
    %15 = arith.addf %14, %1 : vector<64x128xf32>
    %16 = arith.truncf %15 : vector<64x128xf32> to vector<64x128xbf16>
    %17 = tpu.concatenate %4, %16 in 1 : vector<64x128xbf16>, vector<64x128xbf16> -> vector<64x256xbf16>
    %c0_11 = arith.constant 0 : index
    %c0_12 = arith.constant 0 : index
    %c0_13 = arith.constant 0 : index
    %18 = vector.load %arg3[%c0_11, %c0_12, %c0_13] : memref<2x256x128xbf16, #tpu.memory_space<vmem>>, vector<1x256x128xbf16>
    %19 = vector.shape_cast %18 : vector<1x256x128xbf16> to vector<256x128xbf16>
    %cst_14 = arith.constant dense<0.000000e+00> : vector<64x128xf32>
    %20 = tpu.matmul %17, %19, %cst_14 {dimension_numbers = #tpu.dot_dimension_numbers<[1], [0], [0], [1], [0, 0, 1, 1], [], []>} : vector<64x256xbf16>, vector<256x128xbf16>, vector<64x128xf32> -> vector<64x128xf32>
    %c0_15 = arith.constant 0 : index
    %c0_16 = arith.constant 0 : index
    %c0_17 = arith.constant 0 : index
    %21 = vector.load %arg4[%c0_15, %c0_16, %c0_17] : memref<2x1x128xf32, #tpu.memory_space<vmem>>, vector<1x1x128xf32>
    %22 = vector.shape_cast %21 : vector<1x1x128xf32> to vector<1x128xf32>
    %23 = vector.broadcast %22 : vector<1x128xf32> to vector<64x128xf32>
    %24 = arith.addf %20, %23 : vector<64x128xf32>
    %cst_18 = arith.constant 0.000000e+00 : f32
    %25 = vector.broadcast %cst_18 : f32 to vector<64x128xf32>
    %26 = arith.maximumf %24, %25 : vector<64x128xf32>
    %27 = arith.truncf %26 : vector<64x128xf32> to vector<64x128xbf16>
    %c0_19 = arith.constant 0 : index
    %c0_20 = arith.constant 0 : index
    %28 = vector.load %arg10[%c0_19, %c0_20] : memref<64x128xbf16, #tpu.memory_space<vmem>>, vector<64x128xbf16>
    tpu.vector_store %arg10[%c0_19, %c0_20], %27 {strides = array<i32>} : memref<64x128xbf16, #tpu.memory_space<vmem>>, vector<64x128xbf16>,
    %c0_21 = arith.constant 0 : index
    %c0_22 = arith.constant 0 : index
    %29 = vector.load %arg10[%c0_21, %c0_22] : memref<64x128xbf16, #tpu.memory_space<vmem>>, vector<64x128xbf16>
    %c1 = arith.constant 1 : index
    %c0_23 = arith.constant 0 : index
    %c0_24 = arith.constant 0 : index
    %30 = vector.load %arg2[%c1, %c0_23, %c0_24] : memref<2x8x128xbf16, #tpu.memory_space<vmem>>, vector<1x8x128xbf16>
    %31 = vector.shape_cast %30 : vector<1x8x128xbf16> to vector<8x128xbf16>
    %32 = vector.shape_cast %29 : vector<64x128xbf16> to vector<1x64x128xbf16>
    %33 = vector.shape_cast %31 : vector<8x128xbf16> to vector<8x1x128xbf16>
    %34 = vector.broadcast %32 : vector<1x64x128xbf16> to vector<8x64x128xbf16>
    %35 = vector.broadcast %33 : vector<8x1x128xbf16> to vector<8x64x128xbf16>
    %36 = arith.mulf %34, %35 : vector<8x64x128xbf16>
    %37 = vector.shape_cast %36 : vector<8x64x128xbf16> to vector<512x128xbf16>
    %c0_25 = arith.constant 0 : index
    %c0_26 = arith.constant 0 : index
    %38 = vector.load %arg1[%c0_25, %c0_26] : memref<64x512xbf16, #tpu.memory_space<vmem>>, vector<64x512xbf16>
    %cst_27 = arith.constant dense<0.000000e+00> : vector<64x128xf32>
    %39 = tpu.matmul %38, %37, %cst_27 {dimension_numbers = #tpu.dot_dimension_numbers<[1], [0], [0], [1], [0, 0, 1, 1], [], []>} : vector<64x512xbf16>, vector<512x128xbf16>, vector<64x128xf32> -> vector<64x128xf32>
    %40 = arith.addf %39, %1 : vector<64x128xf32>
    %41 = arith.truncf %40 : vector<64x128xf32> to vector<64x128xbf16>
    %42 = tpu.concatenate %29, %41 in 1 : vector<64x128xbf16>, vector<64x128xbf16> -> vector<64x256xbf16>
    %c1_28 = arith.constant 1 : index
    %c0_29 = arith.constant 0 : index
    %c0_30 = arith.constant 0 : index
    %43 = vector.load %arg3[%c1_28, %c0_29, %c0_30] : memref<2x256x128xbf16, #tpu.memory_space<vmem>>, vector<1x256x128xbf16>
    %44 = vector.shape_cast %43 : vector<1x256x128xbf16> to vector<256x128xbf16>
    %cst_31 = arith.constant dense<0.000000e+00> : vector<64x128xf32>
    %45 = tpu.matmul %42, %44, %cst_31 {dimension_numbers = #tpu.dot_dimension_numbers<[1], [0], [0], [1], [0, 0, 1, 1], [], []>} : vector<64x256xbf16>, vector<256x128xbf16>, vector<64x128xf32> -> vector<64x128xf32>
    %c1_32 = arith.constant 1 : index
    %c0_33 = arith.constant 0 : index
    %c0_34 = arith.constant 0 : index
    %46 = vector.load %arg4[%c1_32, %c0_33, %c0_34] : memref<2x1x128xf32, #tpu.memory_space<vmem>>, vector<1x1x128xf32>
    %47 = vector.shape_cast %46 : vector<1x1x128xf32> to vector<1x128xf32>
    %48 = vector.broadcast %47 : vector<1x128xf32> to vector<64x128xf32>
    %49 = arith.addf %45, %48 : vector<64x128xf32>
    %cst_35 = arith.constant 0.000000e+00 : f32
    %50 = vector.broadcast %cst_35 : f32 to vector<64x128xf32>
    %51 = arith.maximumf %49, %50 : vector<64x128xf32>
    %52 = arith.truncf %51 : vector<64x128xf32> to vector<64x128xbf16>
    %c0_36 = arith.constant 0 : index
    %c0_37 = arith.constant 0 : index
    %53 = vector.load %arg10[%c0_36, %c0_37] : memref<64x128xbf16, #tpu.memory_space<vmem>>, vector<64x128xbf16>
    tpu.vector_store %arg10[%c0_36, %c0_37], %52 {strides = array<i32>} : memref<64x128xbf16, #tpu.memory_space<vmem>>, vector<64x128xbf16>,
    %c0_38 = arith.constant 0 : index
    %c0_39 = arith.constant 0 : index
    %54 = vector.load %arg10[%c0_38, %c0_39] : memref<64x128xbf16, #tpu.memory_space<vmem>>, vector<64x128xbf16>
    %c0_40 = arith.constant 0 : index
    %c0_41 = arith.constant 0 : index
    %55 = vector.load %arg5[%c0_40, %c0_41] : memref<128x256xbf16, #tpu.memory_space<vmem>>, vector<128x256xbf16>
    %cst_42 = arith.constant dense<0.000000e+00> : vector<64x256xf32>
    %56 = tpu.matmul %54, %55, %cst_42 {dimension_numbers = #tpu.dot_dimension_numbers<[1], [0], [0], [1], [0, 0, 1, 1], [], []>} : vector<64x128xbf16>, vector<128x256xbf16>, vector<64x256xf32> -> vector<64x256xf32>
    %c0_43 = arith.constant 0 : index
    %c0_44 = arith.constant 0 : index
    %c0_45 = arith.constant 0 : index
    %57 = vector.load %arg8[%c0_43, %c0_44, %c0_45] : memref<1x1x256xf32, #tpu.memory_space<vmem>>, vector<1x1x256xf32>
    %58 = vector.shape_cast %57 : vector<1x1x256xf32> to vector<1x256xf32>
    %59 = vector.broadcast %58 : vector<1x256xf32> to vector<64x256xf32>
    %60 = arith.addf %56, %59 : vector<64x256xf32>
    %cst_46 = arith.constant 0.000000e+00 : f32
    %61 = vector.broadcast %cst_46 : f32 to vector<64x256xf32>
    %62 = arith.maximumf %60, %61 : vector<64x256xf32>
    %63 = arith.truncf %62 : vector<64x256xf32> to vector<64x256xbf16>
    %c0_47 = arith.constant 0 : index
    %c0_48 = arith.constant 0 : index
    %64 = vector.load %arg6[%c0_47, %c0_48] : memref<256x4xbf16, #tpu.memory_space<vmem>>, vector<256x4xbf16>
    %cst_49 = arith.constant dense<0.000000e+00> : vector<64x4xf32>
    %65 = tpu.matmul %63, %64, %cst_49 {dimension_numbers = #tpu.dot_dimension_numbers<[1], [0], [0], [1], [0, 0, 1, 1], [], []>} : vector<64x256xbf16>, vector<256x4xbf16>, vector<64x4xf32> -> vector<64x4xf32>
    %c0_50 = arith.constant 0 : index
    %c0_51 = arith.constant 0 : index
    %c0_52 = arith.constant 0 : index
    %66 = vector.load %arg9[%c0_50, %c0_51, %c0_52] : memref<1x64x4xf32, #tpu.memory_space<vmem>>, vector<1x64x4xf32>
    %67 = vector.shape_cast %66 : vector<1x64x4xf32> to vector<64x4xf32>
    %68 = vector.shape_cast %65 : vector<64x4xf32> to vector<1x64x4xf32>
    tpu.vector_store %arg9[%c0_50, %c0_51, %c0_52], %68 {strides = array<i32>} : memref<1x64x4xf32, #tpu.memory_space<vmem>>, vector<1x64x4xf32>,
    return
  }
  func.func @transform_0(%arg0: i32) -> (i32, i32) {
    %c0_i32 = arith.constant 0 : i32
    %c0_i32_0 = arith.constant 0 : i32
    %c0_i32_1 = arith.constant 0 : i32
    return %c0_i32, %c0_i32_0 : i32, i32
  }
  func.func @transform_1(%arg0: i32) -> (i32, i32, i32) {
    %c0_i32 = arith.constant 0 : i32
    %c0_i32_0 = arith.constant 0 : i32
    %c0_i32_1 = arith.constant 0 : i32
    %c0_i32_2 = arith.constant 0 : i32
    return %c0_i32, %c0_i32_0, %c0_i32_1 : i32, i32, i32
  }
  func.func @transform_2(%arg0: i32) -> (i32, i32, i32) {
    %c0_i32 = arith.constant 0 : i32
    %c0_i32_0 = arith.constant 0 : i32
    %c0_i32_1 = arith.constant 0 : i32
    %c0_i32_2 = arith.constant 0 : i32
    return %c0_i32, %c0_i32_0, %c0_i32_1 : i32, i32, i32
  }
  func.func @transform_3(%arg0: i32) -> (i32, i32, i32) {
    %c0_i32 = arith.constant 0 : i32
    %c0_i32_0 = arith.constant 0 : i32
    %c0_i32_1 = arith.constant 0 : i32
    %c0_i32_2 = arith.constant 0 : i32
    return %c0_i32, %c0_i32_0, %c0_i32_1 : i32, i32, i32
  }
  func.func @transform_4(%arg0: i32) -> (i32, i32) {
    %c0_i32 = arith.constant 0 : i32
    %c0_i32_0 = arith.constant 0 : i32
    %c0_i32_1 = arith.constant 0 : i32
    return %c0_i32, %c0_i32_0 : i32, i32
  }
  func.func @transform_5(%arg0: i32) -> (i32, i32) {
    %c0_i32 = arith.constant 0 : i32
    %c0_i32_0 = arith.constant 0 : i32
    %c0_i32_1 = arith.constant 0 : i32
    return %c0_i32, %c0_i32_0 : i32, i32
  }
  func.func @transform_6(%arg0: i32) -> (i32, i32, i32) {
    %c0_i32 = arith.constant 0 : i32
    %c0_i32_0 = arith.constant 0 : i32
    %c0_i32_1 = arith.constant 0 : i32
    return %arg0, %c0_i32, %c0_i32_0 : i32, i32, i32
  }
  func.func @transform_7(%arg0: i32) -> (i32, i32, i32) {
    %c0_i32 = arith.constant 0 : i32
    %c0_i32_0 = arith.constant 0 : i32
    %c0_i32_1 = arith.constant 0 : i32
    return %arg0, %c0_i32, %c0_i32_0 : i32, i32, i32
  }
  func.func @transform_8(%arg0: i32) -> (i32, i32, i32) {
    %c0_i32 = arith.constant 0 : i32
    %c0_i32_0 = arith.constant 0 : i32
    %c0_i32_1 = arith.constant 0 : i32
    return %arg0, %c0_i32, %c0_i32_0 : i32, i32, i32
  }
}

</mosaic_0001>

<bundles_post_ra>
// kernel: tpu_custom_call.1
= control target key start
LH: loop header
LB: loop body
LE: loop exit
PB: predicated region body
PF: predicated region fallthrough
CT: control target
= control target key end

     0   :  { %13 = vsyncpa [#allocation4], 0  ;;  %s4720_s0 = inlined_call_operand.vmem [shape: bf16[64,512], index: 0, kind: input, shape index: {}]   ;;  %s4721_s1 = inlined_call_operand.hbm [shape: bf16[2,8,128], index: 1, kind: input, shape index: {}]   ;;  %s4722_s2 = inlined_call_operand.hbm [shape: bf16[2,256,128], index: 2, kind: input, shape index: {}]   ;;  %s4723_s3 = inlined_call_operand.hbm [shape: f32[2,1,128], index: 3, kind: input, shape index: {}]   ;;  %s4724_s4 = inlined_call_operand.hbm [shape: bf16[128,256], index: 4, kind: input, shape index: {}]   ;;  %s4725_s5 = inlined_call_operand.vmem [shape: bf16[256,4], index: 5, kind: input, shape index: {}]   ;;  %s4726_s6 = inlined_call_operand.hbm [shape: f32[2,64,128], index: 6, kind: input, shape index: {}]   ;;  %s4727_s7 = inlined_call_operand.vmem [shape: f32[2,1,256], index: 7, kind: input, shape index: {}]   ;;  %s4728_s8 = inlined_call_operand.vmem [shape: f32[2,64,4], index: 8, kind: output, shape index: {}]  }
   0x1   :  { %14 = vsyncpa [#allocation6], 0 }
   0x2   :  { %15 = vsyncpa [#allocation9], 0  ;;  %s3754_s27 = smov 0   ;;  %s3756_s28 = smov 0  }
   0x3   :  { %s3758_s29 = smov 0   ;;  %s3760_s30 = smov 0  }
   0x4 LB: > { %s3773_s9 = sadd.s32 4294967295, %s3697_s30   ;;  %p167_p0 = scmp.ne.s32.totalorder %s3689_s28, %s3685_s27  ;;  %s3697_s30 = sphi %s3760_s30, %s4800_s30   ;;  %s3693_s29 = sphi %s3758_s29, %s4799_s29   ;;  %s3689_s28 = sphi %s3756_s28, %s4798_s28   ;;  %s3685_s27 = sphi %s3754_s27, %s4797_s27  }
   0x5   : > { %p168_p1 = scmp.eq.s32.totalorder %s3773_s9, 0  ;;  %p2765_p2 = scmp.ge.s32.totalorder %s3697_s30, 1 }
   0x6   : > { %p230_p3 = scmp.lt.s32.totalorder %s3697_s30, 3  ;;  %s244_s13 = sshll.u32 %s4721_s1, 4  ;;  %s245_s13 = int_to_ptr.hbm [resolvable:$true] %s244_s13 }
   0x7   : > { %p3781_p4 = por %p168_p1, %p167_p0  ;;  %s3699_s15 = smov [#allocation3]  }
   0x8   : > { %p3788_p5 = pnand %p2765_p2, %p230_p3  ;;  %s246_s16 = sshll.u32 %s3699_s15, 4  ;;  %s247_s16 = int_to_ptr.vmem [resolvable:$true] %s246_s16 }
   0x9   : > { %s258_s20 = sshll.u32 %s4722_s2, 4  ;;  %s3700_s21 = smov 64   ;;  %s259_s20 = int_to_ptr.hbm [resolvable:$true] %s258_s20 }
   0xa   : > { %p3422_p6 = pneg %p3788_p5  ;;  %s3701_s22 = smov 4  }
   0xb   : > { %s3702_s23 = smov [#allocation5]   ;;  %s272_s27 = sshll.u32 %s4723_s3, 4  ;;  %s273_s27 = int_to_ptr.hbm [resolvable:$true] %s272_s27 }
   0xc   : > { %p3796_p7 = pnand %p3422_p6, %p168_p1  ;;  %s260_s24 = sshll.u32 %s3702_s23, 4  ;;  %s261_s24 = int_to_ptr.vmem [resolvable:$true] %s260_s24 }
   0xd   : > { %s3703_s11 = smov [#allocation7]   ;;  %s3705_s19 = smov 1  }
   0xe   : > { %3425 = dma.hbm_to_vmem [thread:$0]  (!%p3796_p7), %s245_s13, 128, %s247_s16, [#allocation4], %s3700_s21, %s3700_s21, %s3701_s22  }
   0xf   : > { %3428 = dma.hbm_to_vmem [thread:$0]  (!%p3796_p7), %s259_s20, 4096, %s261_s24, [#allocation6], %s3700_s21, %s3700_s21, %s3701_s22  }
  0x10   : > { %s274_s12 = sshll.u32 %s3703_s11, 4  ;;  %s286_s13 = sshll.u32 %s4724_s4, 4  ;;  %s275_s12 = int_to_ptr.vmem [resolvable:$true] %s274_s12  ;;  %s287_s13 = int_to_ptr.hbm [resolvable:$true] %s286_s13 }
  0x11   : > { %s3704_s16 = smov 16   ;;  %s3706_s20 = smov [#allocation8]  }
  0x12   : > { %3431 = dma.hbm_to_vmem [thread:$0]  (!%p3796_p7), %s273_s27, 32, %s275_s12, [#allocation6], %s3704_s16, %s3704_s16, %s3705_s19  }
  0x13   : > { %s288_s21 = sshll.u32 %s3706_s20, 4  ;;  %s4729_s22 = smov 128   ;;  %s289_s21 = int_to_ptr.vmem [resolvable:$true] %s288_s21 }
  0x14   : > { %s4730_s23 = smov 8   ;;  %s3821_s24 = sadd.s32 1, %s3697_s30  }
  0x15   : > { %3434 = dma.hbm_to_vmem [thread:$0]  (!%p3796_p7), %s287_s13, 2048, %s289_s21, [#allocation9], %s4729_s22, %s4729_s22, %s4730_s23  }
  0x16   : > { %s151_s25 = ssub.s32 %s3697_s30, %s3821_s24  ;;  %s154_s26 = sadd.s32 1, %s3693_s29 }
  0x17   : > { %p152_p8 = scmp.eq.s32.totalorder %s151_s25, 0  ;;  %p161_p9 = scmp.ne.s32.totalorder %s3693_s29, %s3689_s28 }
  0x18   : > { %p162_p10 = scmp.eq.s32.totalorder %s3697_s30, 0  ;;  %p3443_p12 = scmp.lt.s32.totalorder %s3697_s30, 2 }
  0x19   : > { %s3830_s27 = scalar_select %p152_p8, %s3693_s29, %s154_s26  }
  0x1a   : > { %p163_p11 = por %p162_p10, %p161_p9  ;;  %s305_s11 = sand.u32 1, %s3697_s30  }
  0x1b   : > { %s307_s12 = sand.u32 1, %s3693_s29   ;;  %s3225_s17 = sshll.u32 %s3697_s30, 6 }
  0x1c   : > { %s2771_s15 = sshll.u32 %s307_s12, 6  ;;  %s314_s13 = scalar_lea.hbm %s4726_s6, %s3225_s17 }
  0x1d   : > { %s309_s19 = scalar_lea.vmem [#allocation10], %s2771_s15  ;;  %s315_s21 = sshll.u32 %s314_s13, 4  ;;  %s316_s21 = int_to_ptr.hbm [resolvable:$true] %s315_s21 }
  0x1e   : > { %s317_s20 = sshll.u32 %s309_s19, 4  ;;  %p3839_p13 = pnand %p3443_p12, %p163_p11  ;;  %s318_s20 = int_to_ptr.vmem [resolvable:$true] %s317_s20 }
  0x1f   : > { %s306_s26 = scalar_lea.sflag [#allocation4], %s305_s11  ;;  %s3621_s22 = sshra.s32 %s316_s21, 4  ;;  %s3622_s22 = int_to_ptr.hbm [resolvable:$true] %s3621_s22 }
  0x20   : > { %s3623_s23 = scalar_lea.hbm %s3622_s22, 64  ;;  %p3625_p2 = pneg %p3839_p13 }
  0x21   : > { %p3624_p0 = scmp.ne.s32.totalorder %s3622_s22, %s3623_s23  ;;  %s3628_s15 = scalar_lea.hbm %s4726_s6, 128 }
  0x22   : > { %p3629_p7 = scmp.lt.s32.totalorder %s3622_s22, %s4726_s6  ;;  %p3630_p8 = scmp.lt.s32.totalorder %s3628_s15, %s3623_s23 }
  0x23   : > { %p3626_p3 = pnand %p3625_p2, %p3624_p0 }
  0x24   : > { %p3631_p9 = por %p3630_p8, %p3629_p7 }
  0x25   : > { %p3627_p6 = pneg %p3626_p3 }
  0x27   : > { %p3632_p10 = pnand %p3631_p9, %p3627_p6 }
  0x29   : > { %3635 = shalt.err (!%p3632_p10)
}
  0x2a   : > { %s4753_s11 = smov 8   ;;  %s4754_s16 = smov 128  }
  0x2b   : > { %3438 = dma.hbm_to_vmem [thread:$0]  (!%p3839_p13), %s316_s21, 1024, %s318_s20, %s306_s26, %s4754_s16, %s4754_s16, %s4753_s11  }
  0x2c   : > { %336 = sbr.rel (%p3788_p5) target bundleno = 1168 (0x490), region = 52 }
  0x31   : > { %3668 = dma.done.wait (%p168_p1), [#allocation4], 128  }
  0x32   : > { %3670 = vsyncadd (%p168_p1), [#allocation4], 4294967168 }
  0x33   : > { %3672 = dma.done.wait (%p168_p1), [#allocation6], 4128  }
  0x34   : > { %3674 = vsyncadd (%p168_p1), [#allocation6], 4294963168 }
  0x35   : > { %3676 = dma.done.wait (%p168_p1), [#allocation9], 2048  }
  0x36   : > { %3678 = vsyncadd (%p168_p1), [#allocation9], 4294965248  ;;  %s358_s14 = sand.u32 1, %s3773_s9   ;;  %s360_s22 = sand.u32 1, %s3689_s28  }
  0x37   : > { %s2779_s23 = sshll.u32 %s360_s22, 6  ;;  %s359_s13 = scalar_lea.sflag [#allocation4], %s358_s14 }
  0x38   : > { %s3872_s19 = scalar_lea.vmem [#allocation10], %s2779_s23 }
  0x39   : > { %3680 = dma.done.wait (%p3781_p4), %s359_s13, 1024  }
  0x3a   : > { %3682 = vsyncadd (%p3781_p4), %s359_s13, 4294966272  ;;  %vm444_vm0 = vcmask 1040384   ;;  %vm449_vm1 = vcmask 1041409   ;;  %v3879_v0 = vld [vmem:[%s3872_s19 + $0x30] sm:$0xff]  ;;  %v416_v1 = vld [vmem:[%s3872_s19 + $0x38] sm:$0xff]  ;;  %vm453_vm2 = vcmask 1042434  }
  0x3b   : > { %v441_v2 = vld [vmem:[#allocation3] sm:$0xf]  ;;  %vm457_vm3 = vcmask 1043459   ;;  %v3353_v3 = vpack.c.bf16 %v416_v1, %v3879_v0  ;;  %v3884_v5 = vld [vmem:[%s3872_s19 + $0x20] sm:$0xff]  ;;  %v3887_v6 = vld [vmem:[%s3872_s19 + $0x28] sm:$0xff]  ;;  %p400_p1 = scmp.lt.s32.totalorder %s3773_s9, 1 }
  0x3c   : > { %v443_v4 = vrot.slane %v441_v2, 3  ;;  %v3348_v7 = vpack.c.bf16 %v3887_v6, %v3884_v5  ;;  %v3892_v8 = vld [vmem:[%s3872_s19 + $0x10] sm:$0xff]  ;;  %v3895_v9 = vld [vmem:[%s3872_s19 + $0x18] sm:$0xff]  ;;  %v3902_v17 = vld [vmem:[%s3872_s19] sm:$0xff]  ;;  %vm2638_vm4 = vcmask 31744  }
  0x3d   : > { %3397 = vst [vmem:[#allocation2 + $0x18] sm:$0xff] %v3353_v3   ;;  %v3905_v18 = vld [vmem:[%s3872_s19 + $0x8] sm:$0xff]  ;;  %v3343_v20 = vpack.c.bf16 %v3895_v9, %v3892_v8  ;;  %s4802_s9 = smov (!%p400_p1, %s3773_s9), 1 }
  0x3e   : > { %v447_v10 = vsel %vm444_vm0, %v441_v2, %v443_v4  ;;  %v450_v11 = vsel %vm449_vm1, %v441_v2, %v443_v4  ;;  %v454_v12 = vsel %vm453_vm2, %v441_v2, %v443_v4  ;;  %v458_v13 = vsel %vm457_vm3, %v441_v2, %v443_v4  ;;  %3396 = vst [vmem:[#allocation2 + $0x10] sm:$0xff] %v3348_v7   ;;  %s2780_s23 = sshll.u32 %s4802_s9, 1  ;;  %s3226_s20 = sshll.u32 %s4802_s9, 6 }
  0x3f   : > { %v462_v14 = vunpack.i.h.s16 %v447_v10  ;;  %v452_v15 = vrot.slane %v450_v11, 1  ;;  %v456_v16 = vrot.slane %v454_v12, 2  ;;  %v3907_v19 = vrot.slane %v458_v13, 3  ;;  %3395 = vst [vmem:[#allocation2 + $0x8] sm:$0xff] %v3343_v20   ;;  %s403_s10 = scalar_lea.vmem %s4727_s7, %s2780_s23  ;;  %s4689_s26 = scalar_lea.vmem %s4728_s8, %s3226_s20 }
  0x40   : > { %v3338_v25 = vpack.c.bf16 %v3905_v18, %v3902_v17  ;;  %v2783_v26 = vpack.i.b16 %v447_v10, %v447_v10 }
  0x41   : > { %v470_v21 = vpack.i.b16 %v462_v14, %v462_v14  ;;  %v464_v22 = vunpack.i.h.s16 %v452_v15  ;;  %v466_v23 = vunpack.i.h.s16 %v456_v16  ;;  %v468_v24 = vunpack.i.h.s16 %v3907_v19 }
  0x42   : > { %v2784_v27 = vpack.i.b16 %v452_v15, %v452_v15  ;;  %v2785_v31 = vpack.i.b16 %v456_v16, %v456_v16  ;;  %3339 = vst [vmem:[#allocation2] sm:$0xff] %v3338_v25   ;;  %v477_v33 = vperm.slane %v2783_v26, 0  ;;  %v2786_v35 = vpack.i.b16 %v3907_v19, %v3907_v19 }
  0x43   : > { %v478_v28 = vperm.slane %v470_v21, 0  ;;  %v472_v29 = vpack.i.b16 %v464_v22, %v464_v22  ;;  %v474_v30 = vpack.i.b16 %v466_v23, %v466_v23  ;;  %v476_v32 = vpack.i.b16 %v468_v24, %v468_v24 }
  0x44   : > { %v3914_v34 = vperm.slane %v2784_v27, 0  ;;  %v439_v36 = vld [vmem:[#allocation2 + $0x18] sm:$0xff]   ;;  %v3918_v40 = vperm.slane %v2785_v31, 0  ;;  %v486_v45 = vpack.i.b16 %v477_v33, %v477_v33 }
  0x45   : > { %v490_v37 = vpack.i.b16 %v478_v28, %v478_v28  ;;  %v480_v38 = vperm.slane %v472_v29, 0  ;;  %v482_v39 = vperm.slane %v474_v30, 0  ;;  %v3920_v41 = vunpack.c.l.bf16 %v439_v36  ;;  %v437_v44 = vld [vmem:[#allocation2 + $0x10] sm:$0xff]  }
  0x46   : > { %v3922_v42 = vunpack.c.h.bf16 %v439_v36  ;;  %v484_v43 = vperm.slane %v476_v32, 0  ;;  %v3924_v49 = vunpack.c.l.bf16 %v437_v44  ;;  %v3926_v51 = vunpack.c.h.bf16 %v437_v44  ;;  %v435_v57 = vld [vmem:[#allocation2 + $0x8] sm:$0xff]  }
  0x47   : > { %v492_v46 = vperm.slane %v490_v37, 0  ;;  %v498_v47 = vpack.i.b16 %v480_v38, %v480_v38  ;;  %v506_v48 = vpack.i.b16 %v482_v39, %v482_v39  ;;  %v488_v52 = vperm.slane %v486_v45, 0 }
  0x48   : > { %v514_v50 = vpack.i.b16 %v484_v43, %v484_v43  ;;  %v494_v53 = vpack.i.b16 %v3914_v34, %v3914_v34  ;;  %v502_v58 = vpack.i.b16 %v3918_v40, %v3918_v40  ;;  %v3934_v60 = vunpack.c.l.bf16 %v435_v57 }
  0x49   : > { %v3930_v54 = vunpack.c.l.bf16 %v492_v46  ;;  %v500_v55 = vperm.slane %v498_v47, 0  ;;  %v508_v56 = vperm.slane %v506_v48, 0  ;;  %v3936_v61 = vunpack.c.h.bf16 %v435_v57  ;;  %v433_v48 = vld [vmem:[#allocation2] sm:$0xff]  }
  0x4a   : > { %v516_v59 = vperm.slane %v514_v50, 0  ;;  %v3938_v62 = vunpack.c.l.bf16 %v488_v52 }
  0x4b   : > { %v547_v63 = vmul.f32 %v3930_v54, %v3920_v41  ;;  %v548_v1 = vmul.f32 %v3930_v54, %v3922_v42  ;;  %v3944_v2 = vunpack.c.l.bf16 %v500_v55  ;;  %v3946_v3 = vunpack.c.l.bf16 %v508_v56 }
  0x4c   : > { %v3948_v4 = vunpack.c.l.bf16 %v516_v59  ;;  %v545_v7 = vmul.f32 %v3930_v54, %v3924_v49  ;;  %v546_v10 = vmul.f32 %v3930_v54, %v3926_v51  ;;  %v3956_v11 = vmul.f32 %v3930_v54, %v3934_v60 }
  0x4d   : > { %v611_v12 = vpack.c.bf16 %v547_v63, %v547_v63  ;;  %v612_v13 = vpack.c.bf16 %v548_v1, %v548_v1  ;;  %v563_v14 = vmul.f32 %v3944_v2, %v3920_v41  ;;  %v564_v15 = vmul.f32 %v3944_v2, %v3922_v42 }
  0x4e   : > { %v579_v16 = vmul.f32 %v3946_v3, %v3920_v41  ;;  %v580_v20 = vmul.f32 %v3946_v3, %v3922_v42  ;;  %v595_v21 = vmul.f32 %v3948_v4, %v3920_v41  ;;  %v596_v22 = vmul.f32 %v3948_v4, %v3922_v42 }
  0x4f   : > { %v835_v23 = vunpack.c.l.b16 %v611_v12  ;;  %v836_v24 = vunpack.c.l.b16 %v612_v13  ;;  %v627_v25 = vpack.c.bf16 %v563_v14, %v563_v14  ;;  %v628_v26 = vpack.c.bf16 %v564_v15, %v564_v15 }
  0x50   : > { %v643_v27 = vpack.c.bf16 %v579_v16, %v579_v16  ;;  %v644_v28 = vpack.c.bf16 %v580_v20, %v580_v20  ;;  %v659_v29 = vpack.c.bf16 %v595_v21, %v595_v21  ;;  %v660_v30 = vpack.c.bf16 %v596_v22, %v596_v22 }
  0x51   : > { %v892_v31 = vpack.c.b16 %v836_v24, %v835_v23  ;;  %v851_v32 = vunpack.c.l.b16 %v627_v25  ;;  %v852_v33 = vunpack.c.l.b16 %v628_v26  ;;  %v609_v36 = vpack.c.bf16 %v545_v7, %v545_v7 }
  0x52   : > { %v867_v37 = vunpack.c.l.b16 %v643_v27  ;;  %v868_v38 = vunpack.c.l.b16 %v644_v28  ;;  %v883_v39 = vunpack.c.l.b16 %v659_v29  ;;  %v884_v43 = vunpack.c.l.b16 %v660_v30 }
  0x53   : > { %949 = vmatpush.bf16.msra.mxu0 %v892_v31  ;;  %v900_v44 = vpack.c.b16 %v852_v33, %v851_v32  ;;  %v610_v45 = vpack.c.bf16 %v546_v10, %v546_v10  ;;  %v833_v46 = vunpack.c.l.b16 %v609_v36  ;;  %v561_v47 = vmul.f32 %v3944_v2, %v3924_v49 }
  0x54   : > { %v908_v50 = vpack.c.b16 %v868_v38, %v867_v37  ;;  %v916_v52 = vpack.c.b16 %v884_v43, %v883_v39  ;;  %v562_v55 = vmul.f32 %v3944_v2, %v3926_v51  ;;  %v577_v56 = vmul.f32 %v3946_v3, %v3924_v49 }
  0x55   : > { %978 = vmatpush.bf16.msra.mxu1 %v900_v44  ;;  %v834_v57 = vunpack.c.l.b16 %v610_v45  ;;  %v625_v59 = vpack.c.bf16 %v561_v47, %v561_v47  ;;  %v578_v63 = vmul.f32 %v3946_v3, %v3926_v51  ;;  %v593_v1 = vmul.f32 %v3948_v4, %v3924_v49 }
  0x56   : > { %1007 = vmatpush.bf16.msra.mxu2 %v908_v50  ;;  %1036 = vmatpush.bf16.msra.mxu3 %v916_v52  ;;  %v626_v7 = vpack.c.bf16 %v562_v55, %v562_v55  ;;  %v641_v10 = vpack.c.bf16 %v577_v56, %v577_v56  ;;  %v594_v12 = vmul.f32 %v3948_v4, %v3926_v51  ;;  %v3982_v13 = vunpack.c.l.bf16 %v433_v48 }
  0x57   : > { %v891_v14 = vpack.c.b16 %v834_v57, %v833_v46  ;;  %v849_v15 = vunpack.c.l.b16 %v625_v59  ;;  %v642_v16 = vpack.c.bf16 %v578_v63, %v578_v63  ;;  %v657_v20 = vpack.c.bf16 %v593_v1, %v593_v1 }
  0x58   : > { %v850_v21 = vunpack.c.l.b16 %v626_v7  ;;  %v865_v22 = vunpack.c.l.b16 %v641_v10  ;;  %v658_v23 = vpack.c.bf16 %v594_v12, %v594_v12  ;;  %v544_v24 = vmul.f32 %v3930_v54, %v3936_v61 }
  0x59   : > { %950 = vmatpush.bf16.msra.mxu0 %v891_v14  ;;  %v866_v25 = vunpack.c.l.b16 %v642_v16  ;;  %v881_v26 = vunpack.c.l.b16 %v657_v20  ;;  %v607_v27 = vpack.c.bf16 %v3956_v11, %v3956_v11  ;;  %v559_v28 = vmul.f32 %v3944_v2, %v3934_v60 }
  0x5a   : > { %v899_v29 = vpack.c.b16 %v850_v21, %v849_v15  ;;  %v882_v30 = vunpack.c.l.b16 %v658_v23  ;;  %v608_v31 = vpack.c.bf16 %v544_v24, %v544_v24  ;;  %v560_v32 = vmul.f32 %v3944_v2, %v3936_v61 }
  0x5b   : > { %v907_v33 = vpack.c.b16 %v866_v25, %v865_v22  ;;  %v831_v36 = vunpack.c.l.b16 %v607_v27  ;;  %v623_v37 = vpack.c.bf16 %v559_v28, %v559_v28  ;;  %v575_v38 = vmul.f32 %v3946_v3, %v3934_v60 }
  0x5c   : > { %979 = vmatpush.bf16.msra.mxu1 %v899_v29  ;;  %v915_v39 = vpack.c.b16 %v882_v30, %v881_v26  ;;  %v832_v43 = vunpack.c.l.b16 %v608_v31  ;;  %v624_v44 = vpack.c.bf16 %v560_v32, %v560_v32  ;;  %v576_v11 = vmul.f32 %v3946_v3, %v3936_v61 }
  0x5d   : > { %1008 = vmatpush.bf16.msra.mxu2 %v907_v33  ;;  %v847_v45 = vunpack.c.l.b16 %v623_v37  ;;  %v639_v46 = vpack.c.bf16 %v575_v38, %v575_v38  ;;  %v591_v47 = vmul.f32 %v3948_v4, %v3934_v60  ;;  %v592_v50 = vmul.f32 %v3948_v4, %v3936_v61 }
  0x5e   : > { %1037 = vmatpush.bf16.msra.mxu3 %v915_v39  ;;  %v890_v52 = vpack.c.b16 %v832_v43, %v831_v36  ;;  %v848_v55 = vunpack.c.l.b16 %v624_v44  ;;  %v640_v56 = vpack.c.bf16 %v576_v11, %v576_v11  ;;  %v4000_v57 = vunpack.c.h.bf16 %v433_v48 }
  0x5f   : > { %v863_v59 = vunpack.c.l.b16 %v639_v46  ;;  %v655_v63 = vpack.c.bf16 %v591_v47, %v591_v47  ;;  %v656_v1 = vpack.c.bf16 %v592_v50, %v592_v50  ;;  %v541_v7 = vmul.f32 %v3930_v54, %v3982_v13 }
  0x60   : > { %951 = vmatpush.bf16.msra.mxu0 %v890_v52  ;;  %v898_v10 = vpack.c.b16 %v848_v55, %v847_v45  ;;  %v864_v12 = vunpack.c.l.b16 %v640_v56  ;;  %v542_v14 = vmul.f32 %v3930_v54, %v4000_v57  ;;  %v557_v15 = vmul.f32 %v3944_v2, %v3982_v13 }
  0x61   : > { %v879_v16 = vunpack.c.l.b16 %v655_v63  ;;  %v880_v20 = vunpack.c.l.b16 %v656_v1  ;;  %v605_v21 = vpack.c.bf16 %v541_v7, %v541_v7  ;;  %v558_v48 = vmul.f32 %v3944_v2, %v4000_v57 }
  0x62   : > { %980 = vmatpush.bf16.msra.mxu1 %v898_v10  ;;  %v906_v22 = vpack.c.b16 %v864_v12, %v863_v59  ;;  %v606_v23 = vpack.c.bf16 %v542_v14, %v542_v14  ;;  %v621_v24 = vpack.c.bf16 %v557_v15, %v557_v15  ;;  %v573_v25 = vmul.f32 %v3946_v3, %v3982_v13 }
  0x63   : > { %v914_v26 = vpack.c.b16 %v880_v20, %v879_v16  ;;  %v829_v27 = vunpack.c.l.b16 %v605_v21  ;;  %v622_v28 = vpack.c.bf16 %v558_v48, %v558_v48  ;;  %v574_v54 = vmul.f32 %v3946_v3, %v4000_v57 }
  0x64   : > { %1009 = vmatpush.bf16.msra.mxu2 %v906_v22  ;;  %v830_v29 = vunpack.c.l.b16 %v606_v23  ;;  %v845_v30 = vunpack.c.l.b16 %v621_v24  ;;  %v637_v31 = vpack.c.bf16 %v573_v25, %v573_v25  ;;  %v589_v2 = vmul.f32 %v3948_v4, %v3982_v13 }
  0x65   : > { %1038 = vmatpush.bf16.msra.mxu3 %v914_v26  ;;  %v846_v32 = vunpack.c.l.b16 %v622_v28  ;;  %v638_v33 = vpack.c.bf16 %v574_v54, %v574_v54  ;;  %v590_v36 = vmul.f32 %v3948_v4, %v4000_v57  ;;  %v539_v37 = vmul.f32 %v3938_v62, %v3920_v41 }
  0x66   : > { %v889_v38 = vpack.c.b16 %v830_v29, %v829_v27  ;;  %v861_v39 = vunpack.c.l.b16 %v637_v31  ;;  %v653_v43 = vpack.c.bf16 %v589_v2, %v589_v2  ;;  %v540_v3 = vmul.f32 %v3938_v62, %v3922_v42 }
  0x67   : > { %v897_v44 = vpack.c.b16 %v846_v32, %v845_v30  ;;  %v862_v11 = vunpack.c.l.b16 %v638_v33  ;;  %v654_v45 = vpack.c.bf16 %v590_v36, %v590_v36  ;;  %v603_v46 = vpack.c.bf16 %v539_v37, %v539_v37 }
  0x68   : > { %952 = vmatpush.bf16.msra.mxu0 %v889_v38  ;;  %v877_v47 = vunpack.c.l.b16 %v653_v43  ;;  %v604_v50 = vpack.c.bf16 %v540_v3, %v540_v3  ;;  %v496_v4 = vperm.slane %v494_v53, 0  ;;  %v504_v52 = vperm.slane %v502_v58, 0 }
  0x69   : > { %981 = vmatpush.bf16.msra.mxu1 %v897_v44  ;;  %v905_v55 = vpack.c.b16 %v862_v11, %v861_v39  ;;  %v878_v56 = vunpack.c.l.b16 %v654_v45  ;;  %v827_v59 = vunpack.c.l.b16 %v603_v46  ;;  %v483_v63 = vperm.slane %v2786_v35, 0 }
  0x6a   : > { %v828_v1 = vunpack.c.l.b16 %v604_v50  ;;  %v4031_v7 = vunpack.c.l.bf16 %v496_v4  ;;  %v4033_v10 = vunpack.c.l.bf16 %v504_v52  ;;  %v537_v34 = vmul.f32 %v3938_v62, %v3924_v49 }
  0x6b   : > { %1010 = vmatpush.bf16.msra.mxu2 %v905_v55  ;;  %v913_v53 = vpack.c.b16 %v878_v56, %v877_v47  ;;  %v510_v40 = vpack.i.b16 %v483_v63, %v483_v63  ;;  %v538_v58 = vmul.f32 %v3938_v62, %v3926_v51  ;;  %v535_v12 = vmul.f32 %v3938_v62, %v3934_v60 }
  0x6c   : > { %v888_v14 = vpack.c.b16 %v828_v1, %v827_v59  ;;  %v555_v19 = vmul.f32 %v4031_v7, %v3920_v41  ;;  %v556_v35 = vmul.f32 %v4031_v7, %v3922_v42  ;;  %v571_v15 = vmul.f32 %v4033_v10, %v3920_v41 }
  0x6d   : > { %1039 = vmatpush.bf16.msra.mxu3 %v913_v53  ;;  %v572_v16 = vmul.f32 %v4033_v10, %v3922_v42  ;;  %v512_v20 = vperm.slane %v510_v40, 0  ;;  %v601_v21 = vpack.c.bf16 %v537_v34, %v537_v34  ;;  %v602_v48 = vpack.c.bf16 %v538_v58, %v538_v58 }
  0x6e   : > { %953 = vmatpush.bf16.msra.mxu0 %v888_v14  ;;  %v619_v22 = vpack.c.bf16 %v555_v19, %v555_v19  ;;  %v620_v23 = vpack.c.bf16 %v556_v35, %v556_v35  ;;  %v635_v24 = vpack.c.bf16 %v571_v15, %v571_v15  ;;  %v553_v25 = vmul.f32 %v4031_v7, %v3924_v49 }
  0x6f   : > { %v636_v26 = vpack.c.bf16 %v572_v16, %v572_v16  ;;  %v4051_v27 = vunpack.c.l.bf16 %v512_v20  ;;  %v825_v28 = vunpack.c.l.b16 %v601_v21  ;;  %v826_v54 = vunpack.c.l.b16 %v602_v48 }
  0x70   : > { %v843_v29 = vunpack.c.l.b16 %v619_v22  ;;  %v844_v30 = vunpack.c.l.b16 %v620_v23  ;;  %v859_v31 = vunpack.c.l.b16 %v635_v24  ;;  %v554_v2 = vmul.f32 %v4031_v7, %v3926_v51 }
  0x71   : > { %v860_v32 = vunpack.c.l.b16 %v636_v26  ;;  %v587_v33 = vmul.f32 %v4051_v27, %v3920_v41  ;;  %v588_v36 = vmul.f32 %v4051_v27, %v3922_v42  ;;  %v887_v37 = vpack.c.b16 %v826_v54, %v825_v28 }
  0x72   : > { %v896_v38 = vpack.c.b16 %v844_v30, %v843_v29  ;;  %v617_v39 = vpack.c.bf16 %v553_v25, %v553_v25  ;;  %v618_v43 = vpack.c.bf16 %v554_v2, %v554_v2  ;;  %v569_v3 = vmul.f32 %v4033_v10, %v3924_v49 }
  0x73   : > { %v904_v44 = vpack.c.b16 %v860_v32, %v859_v31  ;;  %v651_v11 = vpack.c.bf16 %v587_v33, %v587_v33  ;;  %v652_v45 = vpack.c.bf16 %v588_v36, %v588_v36  ;;  %954 = vmatpush.bf16.msra.mxu0 %v887_v37  ;;  %v570_v46 = vmul.f32 %v4033_v10, %v3926_v51 }
  0x74   : > { %982 = vmatpush.bf16.msra.mxu1 %v896_v38  ;;  %v841_v47 = vunpack.c.l.b16 %v617_v39  ;;  %v842_v41 = vunpack.c.l.b16 %v618_v43  ;;  %v633_v50 = vpack.c.bf16 %v569_v3, %v569_v3  ;;  %v585_v42 = vmul.f32 %v4051_v27, %v3924_v49 }
  0x75   : > { %1011 = vmatpush.bf16.msra.mxu2 %v904_v44  ;;  %v875_v4 = vunpack.c.l.b16 %v651_v11  ;;  %v876_v52 = vunpack.c.l.b16 %v652_v45  ;;  %v634_v55 = vpack.c.bf16 %v570_v46, %v570_v46  ;;  %v586_v56 = vmul.f32 %v4051_v27, %v3926_v51 }
  0x76   : > { %v895_v59 = vpack.c.b16 %v842_v41, %v841_v47  ;;  %v857_v63 = vunpack.c.l.b16 %v633_v50  ;;  %v649_v1 = vpack.c.bf16 %v585_v42, %v585_v42  ;;  %v536_v34 = vmul.f32 %v3938_v62, %v3936_v61 }
  0x77   : > { %v912_v53 = vpack.c.b16 %v876_v52, %v875_v4  ;;  %v858_v40 = vunpack.c.l.b16 %v634_v55  ;;  %v650_v58 = vpack.c.bf16 %v586_v56, %v586_v56  ;;  %v599_v14 = vpack.c.bf16 %v535_v12, %v535_v12  ;;  %v2789_v56 = vld [vmem:[%s4720_s0] sm:$0xf] }
  0x78   : > { %983 = vmatpush.bf16.msra.mxu1 %v895_v59  ;;  %v873_v19 = vunpack.c.l.b16 %v649_v1  ;;  %v600_v49 = vpack.c.bf16 %v536_v34, %v536_v34  ;;  %v551_v35 = vmul.f32 %v4031_v7, %v3934_v60  ;;  %v552_v15 = vmul.f32 %v4031_v7, %v3936_v61  ;;  %v3233_v59 = vld [vmem:[%s4720_s0 + $0xc] sm:$0xf0]  ;;  %v3231_v34 = vld [vmem:[%s4720_s0 + $0x4] sm:$0xf] }
  0x79   : > { %1040 = vmatpush.bf16.msra.mxu3 %v912_v53  ;;  %v903_v51 = vpack.c.b16 %v858_v40, %v857_v63  ;;  %v874_v16 = vunpack.c.l.b16 %v650_v58  ;;  %v823_v20 = vunpack.c.l.b16 %v599_v14  ;;  %v567_v21 = vmul.f32 %v4033_v10, %v3934_v60 }
  0x7a   : > { %v824_v48 = vunpack.c.l.b16 %v600_v49  ;;  %v615_v22 = vpack.c.bf16 %v551_v35, %v551_v35  ;;  %v616_v23 = vpack.c.bf16 %v552_v15, %v552_v15  ;;  %v568_v12 = vmul.f32 %v4033_v10, %v3936_v61  ;;  %v2797_v15 = vld [vmem:[%s4720_s0 + $0x8] sm:$0xf] }
  0x7b   : > { %1012 = vmatpush.bf16.msra.mxu2 %v903_v51  ;;  %v911_v24 = vpack.c.b16 %v874_v16, %v873_v19  ;;  %v631_v25 = vpack.c.bf16 %v567_v21, %v567_v21  ;;  %v583_v26 = vmul.f32 %v4051_v27, %v3934_v60  ;;  %v584_v28 = vmul.f32 %v4051_v27, %v3936_v61  ;;  %v3232_v21 = vld [vmem:[%s4720_s0 + $0xc] sm:$0xf] }
  0x7c   : > { %v886_v54 = vpack.c.b16 %v824_v48, %v823_v20  ;;  %v839_v29 = vunpack.c.l.b16 %v615_v22  ;;  %v840_v30 = vunpack.c.l.b16 %v616_v23  ;;  %v632_v31 = vpack.c.bf16 %v568_v12, %v568_v12  ;;  %v2799_v48 = vld [vmem:[%s4720_s0 + $0x18] sm:$0xf0] }
  0x7d   : > { %1041 = vmatpush.bf16.msra.mxu3 %v911_v24  ;;  %v855_v2 = vunpack.c.l.b16 %v631_v25  ;;  %v647_v32 = vpack.c.bf16 %v583_v26, %v583_v26  ;;  %v648_v33 = vpack.c.bf16 %v584_v28, %v584_v28  ;;  %v533_v36 = vmul.f32 %v3938_v62, %v3982_v13  ;;  %v2805_v24 = vld [vmem:[%s4720_s0 + $0x20] sm:$0xf]  ;;  %v3237_v25 = vld [vmem:[%s4720_s0 + $0x2c] sm:$0xf0]  ;;  %v3235_v26 = vld [vmem:[%s4720_s0 + $0x24] sm:$0xf] }
  0x7e   : > { %955 = vmatpush.bf16.msra.mxu0 %v886_v54  ;;  %v894_v37 = vpack.c.b16 %v840_v30, %v839_v29  ;;  %v856_v38 = vunpack.c.l.b16 %v632_v31  ;;  %v534_v60 = vmul.f32 %v3938_v62, %v4000_v57  ;;  %v549_v61 = vmul.f32 %v4031_v7, %v3982_v13  ;;  %v2807_v28 = vld [vmem:[%s4720_s0 + $0x30] sm:$0xf0]  ;;  %v2813_v29 = vld [vmem:[%s4720_s0 + $0x28] sm:$0xf]  ;;  %v3238_v30 = vld [vmem:[%s4720_s0 + $0x34] sm:$0xf0] }
  0x7f   : > { %v871_v39 = vunpack.c.l.b16 %v647_v32  ;;  %v872_v43 = vunpack.c.l.b16 %v648_v33  ;;  %v597_v3 = vpack.c.bf16 %v533_v36, %v533_v36  ;;  %v550_v44 = vmul.f32 %v4031_v7, %v4000_v57  ;;  %v2815_v32 = vld [vmem:[%s4720_s0 + $0x38] sm:$0xf0] }
  0x80   : > { %984 = vmatpush.bf16.msra.mxu1 %v894_v37  ;;  %v902_v11 = vpack.c.b16 %v856_v38, %v855_v2  ;;  %v598_v45 = vpack.c.bf16 %v534_v60, %v534_v60  ;;  %v613_v46 = vpack.c.bf16 %v549_v61, %v549_v61  ;;  %v565_v47 = vmul.f32 %v4033_v10, %v3982_v13  ;;  %v3236_v2 = vld [vmem:[%s4720_s0 + $0x2c] sm:$0xf]  ;;  %v3254_v37 = vld [vmem:[#allocation5 + $0x38] sm:$0xff]  ;;  %v3253_v60 = vld [vmem:[#allocation5 + $0x30] sm:$0xff] }
  0x81   : > { %v910_v41 = vpack.c.b16 %v872_v43, %v871_v39  ;;  %v821_v50 = vunpack.c.l.b16 %v597_v3  ;;  %v614_v42 = vpack.c.bf16 %v550_v44, %v550_v44  ;;  %v566_v62 = vmul.f32 %v4033_v10, %v4000_v57  ;;  %v3262_v38 = vld [vmem:[#allocation5 + $0x78] sm:$0xff]  ;;  %v3241_v39 = vld [vmem:[%s4720_s0 + $0x4c] sm:$0xf0]  ;;  %v2823_v3 = vld [vmem:[%s4720_s0 + $0x50] sm:$0xf0] }
  0x82   : > { %1013 = vmatpush.bf16.msra.mxu2 %v902_v11  ;;  %v822_v4 = vunpack.c.l.b16 %v598_v45  ;;  %v837_v52 = vunpack.c.l.b16 %v613_v46  ;;  %v629_v55 = vpack.c.bf16 %v565_v47, %v565_v47  ;;  %v581_v7 = vmul.f32 %v4051_v27, %v3982_v13  ;;  %v2791_v13 = vld [vmem:[%s4720_s0 + $0x10] sm:$0xf0]  ;;  %v2821_v61 = vld [vmem:[%s4720_s0 + $0x40] sm:$0xf]  ;;  %v3239_v43 = vld [vmem:[%s4720_s0 + $0x44] sm:$0xf] }
  0x83   : > { %1042 = vmatpush.bf16.msra.mxu3 %v910_v41  ;;  %v838_v63 = vunpack.c.l.b16 %v614_v42  ;;  %v630_v1 = vpack.c.bf16 %v566_v62, %v566_v62  ;;  %v582_v10 = vmul.f32 %v4051_v27, %v4000_v57  ;;  %v2790_v35 = vor.u32 %v3233_v59, %v2789_v56  ;;  %v3234_v57 = vld [vmem:[%s4720_s0 + $0x14] sm:$0xf0]  ;;  %v3252_v44 = vld [vmem:[#allocation5 + $0x28] sm:$0xff]  ;;  %v2829_v45 = vld [vmem:[%s4720_s0 + $0x48] sm:$0xf] }
  0x84   : > { %v885_v53 = vpack.c.b16 %v822_v4, %v821_v50  ;;  %v853_v40 = vunpack.c.l.b16 %v629_v55  ;;  %v645_v58 = vpack.c.bf16 %v581_v7, %v581_v7  ;;  %v2794_v51 = vor.u32 %v3231_v34, %v2791_v13  ;;  %v3242_v46 = vld [vmem:[%s4720_s0 + $0x54] sm:$0xf0]  ;;  %v3240_v41 = vld [vmem:[%s4720_s0 + $0x4c] sm:$0xf]  ;;  %v2831_v50 = vld [vmem:[%s4720_s0 + $0x58] sm:$0xf0] }
  0x85   : > { %v893_v14 = vpack.c.b16 %v838_v63, %v837_v52  ;;  %v854_v19 = vunpack.c.l.b16 %v630_v1  ;;  %v646_v49 = vpack.c.bf16 %v582_v10, %v582_v10  ;;  %v2798_v22 = vor.u32 %v3234_v57, %v2797_v15  ;;  %v3251_v62 = vld [vmem:[#allocation5 + $0x20] sm:$0xff]  ;;  %v2837_v52 = vld [vmem:[%s4720_s0 + $0x60] sm:$0xf]  ;;  %v3245_v55 = vld [vmem:[%s4720_s0 + $0x6c] sm:$0xf0] }
  0x86   : > { %956 = vmatpush.bf16.msra.mxu0 %v885_v53  ;;  %v869_v27 = vunpack.c.l.b16 %v645_v58  ;;  %v2802_v12 = vor.u32 %v3232_v21, %v2799_v48  ;;  %v2806_v54 = vor.u32 %v3237_v25, %v2805_v24  ;;  %v2810_v31 = vor.u32 %v3235_v26, %v2807_v28  ;;  %v3243_v7 = vld [vmem:[%s4720_s0 + $0x64] sm:$0xf]  ;;  %v2839_v56 = vld [vmem:[%s4720_s0 + $0x70] sm:$0xf0]  ;;  %v2845_v63 = vld [vmem:[%s4720_s0 + $0x68] sm:$0xf] }
  0x87   : > { %985 = vmatpush.bf16.msra.mxu1 %v893_v14  ;;  %v901_v16 = vpack.c.b16 %v854_v19, %v853_v40  ;;  %v870_v20 = vunpack.c.l.b16 %v646_v49  ;;  %v2814_v33 = vor.u32 %v3238_v30, %v2813_v29  ;;  %v2818_v36 = vor.u32 %v3236_v2, %v2815_v32  ;;  %v3246_v1 = vld [vmem:[%s4720_s0 + $0x74] sm:$0xf0]  ;;  %v3244_v34 = vld [vmem:[%s4720_s0 + $0x6c] sm:$0xf]  ;;  %v2847_v13 = vld [vmem:[%s4720_s0 + $0x78] sm:$0xf0] }
  0x88   : > { %v2822_v11 = vor.u32 %v3241_v39, %v2821_v61  ;;  %v2826_v47 = vor.u32 %v3239_v43, %v2823_v3  ;;  %v2830_v42 = vor.u32 %v3242_v46, %v2829_v45  ;;  %v2834_v4 = vor.u32 %v3240_v41, %v2831_v50  ;;  %v3261_v58 = vld [vmem:[#allocation5 + $0x70] sm:$0xff]  ;;  %v3250_v14 = vld [vmem:[#allocation5 + $0x18] sm:$0xff]  ;;  %v3260_v19 = vld [vmem:[#allocation5 + $0x68] sm:$0xff] }
  0x89   : > { %1014 = vmatpush.bf16.msra.mxu2 %v901_v16  ;;  %v909_v23 = vpack.c.b16 %v870_v20, %v869_v27  ;;  %957 = vmatmul.bf16.vlgmr.msra.gmra.mxu0 %v2790_v35  ;;  %v2838_v59 = vor.u32 %v3245_v55, %v2837_v52  ;;  %v2842_v10 = vor.u32 %v3243_v7, %v2839_v56  ;;  %v3249_v49 = vld [vmem:[#allocation5 + $0x10] sm:$0xff]  ;;  %v3259_v35 = vld [vmem:[#allocation5 + $0x60] sm:$0xff]  ;;  %v3248_v15 = vld [vmem:[#allocation5 + $0x8] sm:$0xff] }
  0x8a   : > { %986 = vmatmul.bf16.vlgmr.msra.gmra.mxu1 %v2794_v51  ;;  %1253 = vmatpush.bf16.msrb.mxu0 %v3254_v37  ;;  %v2846_v53 = vor.u32 %v3246_v1, %v2845_v63  ;;  %v2850_v40 = vor.u32 %v3244_v34, %v2847_v13  ;;  %v3258_v57 = vld [vmem:[#allocation5 + $0x58] sm:$0xff]  ;;  %v3247_v27 = vld [vmem:[#allocation5] sm:$0xff]  ;;  %v3257_v51 = vld [vmem:[#allocation5 + $0x50] sm:$0xff] }
  0x8b   : > { %1043 = vmatpush.bf16.msra.mxu3 %v909_v23  ;;  %1282 = vmatpush.bf16.msrb.mxu1 %v3262_v38  ;;  %v3227_v16 = vld [vmem:[#allocation2] sm:$0xff]  ;;  %v3256_v20 = vld [vmem:[#allocation5 + $0x48] sm:$0xff]  ;;  %v3255_v21 = vld [vmem:[#allocation5 + $0x40] sm:$0xff] }
  0x8c   : > { %1015 = vmatmul.bf16.vlgmr.msra.gmra.mxu2 %v2798_v22  ;;  %v3228_v23 = vld [vmem:[#allocation2 + $0x8] sm:$0xff]  ;;  %v3229_v38 = vld [vmem:[#allocation2 + $0x10] sm:$0xff]  ;;  %v3230_v56 = vld [vmem:[#allocation2 + $0x18] sm:$0xff] }
  0x8e   : > { %1044 = vmatmul.bf16.vlgmr.msra.gmra.mxu3 %v2802_v12  ;;  %1254 = vmatpush.bf16.msrb.mxu0 %v3253_v60 }
  0x8f   : > { %1283 = vmatpush.bf16.msrb.mxu1 %v3261_v58 }
  0x92   : > { %1255 = vmatpush.bf16.msrb.mxu0 %v3252_v44 }
  0x93   : > { %1284 = vmatpush.bf16.msrb.mxu1 %v3260_v19 }
  0x96   : > { %1256 = vmatpush.bf16.msrb.mxu0 %v3251_v62 }
  0x97   : > { %1285 = vmatpush.bf16.msrb.mxu1 %v3259_v35 }
  0x99   : > { %962 = vmatmul.bf16.gmra.mxu0 %v2806_v54 }
  0x9a   : > { %991 = vmatmul.bf16.gmra.mxu1 %v2810_v31  ;;  %1257 = vmatpush.bf16.msrb.mxu0 %v3250_v14 }
  0x9b   : > { %1286 = vmatpush.bf16.msrb.mxu1 %v3258_v57 }
  0x9c   : > { %1020 = vmatmul.bf16.gmra.mxu2 %v2814_v33 }
  0x9e   : > { %1049 = vmatmul.bf16.gmra.mxu3 %v2818_v36  ;;  %1258 = vmatpush.bf16.msrb.mxu0 %v3249_v49 }
  0x9f   : > { %1287 = vmatpush.bf16.msrb.mxu1 %v3257_v51 }
  0xa2   : > { %1259 = vmatpush.bf16.msrb.mxu0 %v3248_v15 }
  0xa3   : > { %1288 = vmatpush.bf16.msrb.mxu1 %v3256_v20 }
  0xa6   : > { %1260 = vmatpush.bf16.msrb.mxu0 %v3247_v27 }
  0xa7   : > { %1289 = vmatpush.bf16.msrb.mxu1 %v3255_v21 }
  0xa9   : > { %967 = vmatmul.bf16.gmra.mxu0 %v2822_v11 }
  0xaa   : > { %996 = vmatmul.bf16.gmra.mxu1 %v2826_v47 }
  0xac   : > { %1025 = vmatmul.bf16.gmra.mxu2 %v2830_v42 }
  0xae   : > { %1054 = vmatmul.bf16.gmra.mxu3 %v2834_v4 }
  0xb9   : > { %972 = vmatmul.bf16.gmra.mxu0 %v2838_v59 }
  0xba   : > { %1001 = vmatmul.bf16.gmra.mxu1 %v2842_v10 }
  0xbc   : > { %1030 = vmatmul.bf16.gmra.mxu2 %v2846_v53 }
  0xbe   : > { %1059 = vmatmul.bf16.gmra.mxu3 %v2850_v40 }
  0xc9   : > { %1261 = vmatmul.bf16.vlgmr.msrb.gmra.mxu0 %v3227_v16 }
  0xd9   : > { %1266 = vmatmul.bf16.gmra.mxu0 %v3228_v23 }
  0xe9   : > { %1271 = vmatmul.bf16.gmra.mxu0 %v3229_v38 }
  0xf9   : > { %1276 = vmatmul.bf16.gmra.mxu0 %v3230_v56 }
 0x106   : > { %v958_v48 = vpop.f32.mrf.mxu0 }
 0x107   : > { %v987_v22 = vpop.f32.mrf.mxu1  ;;  %v959_v12 = vadd.f32 %v958_v48, %v3902_v17 }
 0x109   : > { %v988_v24 = vadd.f32 %v987_v22, %v959_v12 }
 0x10e   : > { %v960_v25 = vpop.f32.mrf.mxu0 }
 0x10f   : > { %v1016_v26 = vpop.f32.mrf.mxu2  ;;  %v989_v28 = vpop.f32.mrf.mxu1  ;;  %v961_v29 = vadd.f32 %v960_v25, %v3905_v18 }
 0x110   : > { %v1017_v30 = vadd.f32 %v1016_v26, %v988_v24 }
 0x111   : > { %v1045_v54 = vpop.f32.mrf.mxu3  ;;  %v990_v2 = vadd.f32 %v989_v28, %v961_v29 }
 0x112   : > { %v1046_v31 = vadd.f32 %v1045_v54, %v1017_v30  ;;  %v3492_v30 = vld [vmem:[%s3872_s19 + $0x38] sm:$0xff] }
 0x114   : > { %v1065_v61 = vpack.c.bf16 %v1046_v31, %v1046_v31 }
 0x116   : > { %v963_v32 = vpop.f32.mrf.mxu0  ;;  %v1105_v3 = vunpack.c.l.b16 %v1065_v61 }
 0x117   : > { %v1018_v33 = vpop.f32.mrf.mxu2  ;;  %v992_v36 = vpop.f32.mrf.mxu1  ;;  %v964_v17 = vadd.f32 %v963_v32, %v3892_v8 }
 0x118   : > { %v1019_v37 = vadd.f32 %v1018_v33, %v990_v2 }
 0x119   : > { %v1047_v60 = vpop.f32.mrf.mxu3  ;;  %v993_v11 = vadd.f32 %v992_v36, %v964_v17 }
 0x11a   : > { %v1048_v39 = vadd.f32 %v1047_v60, %v1019_v37 }
 0x11c   : > { %v1066_v43 = vpack.c.bf16 %v1048_v39, %v1048_v39 }
 0x11e   : > { %v1106_v44 = vunpack.c.l.b16 %v1066_v43  ;;  %v965_v45 = vpop.f32.mrf.mxu0 }
 0x11f   : > { %v1021_v18 = vpop.f32.mrf.mxu2  ;;  %v994_v46 = vpop.f32.mrf.mxu1  ;;  %v966_v50 = vadd.f32 %v965_v45, %v3895_v9 }
 0x120   : > { %v1113_v47 = vpack.c.b16 %v1106_v44, %v1105_v3  ;;  %v1022_v42 = vadd.f32 %v1021_v18, %v993_v11  ;;  %v4201_v18 = vld [vmem:[#allocation7] ss:$0 sm:$0xff] }
 0x121   : > { %v1050_v41 = vpop.f32.mrf.mxu3  ;;  %v995_v4 = vadd.f32 %v994_v46, %v966_v50 }
 0x122   : > { %1290 = vmatmul.bf16.vlgmr.msrb.gmra.mxu1 %v1113_v47  ;;  %v1051_v62 = vadd.f32 %v1050_v41, %v1022_v42  ;;  %v1344_v47 = vld [vmem:[#allocation3 + $0x4] sm:$0xf] }
 0x123   : > { %v1346_v50 = vrot.slane %v1344_v47, 3 }
 0x124   : > { %v1067_v63 = vpack.c.bf16 %v1051_v62, %v1051_v62 }
 0x126   : > { %v968_v52 = vpop.f32.mrf.mxu0  ;;  %v1107_v13 = vunpack.c.l.b16 %v1067_v63  ;;  %v1349_v63 = vsel %vm444_vm0, %v1344_v47, %v1346_v50 }
 0x127   : > { %v1023_v55 = vpop.f32.mrf.mxu2  ;;  %v997_v8 = vpop.f32.mrf.mxu1  ;;  %v969_v1 = vadd.f32 %v968_v52, %v3884_v5 }
 0x128   : > { %v1024_v7 = vadd.f32 %v1023_v55, %v995_v4 }
 0x129   : > { %v1052_v59 = vpop.f32.mrf.mxu3  ;;  %v998_v40 = vadd.f32 %v997_v8, %v969_v1  ;;  %v1351_v8 = vsel %vm449_vm1, %v1344_v47, %v1346_v50  ;;  %v1357_v1 = vsel %vm457_vm3, %v1344_v47, %v1346_v50 }
 0x12a   : > { %v1053_v10 = vadd.f32 %v1052_v59, %v1024_v7  ;;  %v1354_v7 = vsel %vm453_vm2, %v1344_v47, %v1346_v50 }
 0x12c   : > { %v1068_v34 = vpack.c.bf16 %v1053_v10, %v1053_v10  ;;  %v1353_v10 = vrot.slane %v1351_v8, 1 }
 0x12e   : > { %v1108_v53 = vunpack.c.l.b16 %v1068_v34  ;;  %v970_v9 = vpop.f32.mrf.mxu0  ;;  %v1356_v34 = vrot.slane %v1354_v7, 2 }
 0x12f   : > { %v1026_v58 = vpop.f32.mrf.mxu2  ;;  %v999_v14 = vpop.f32.mrf.mxu1  ;;  %v971_v35 = vadd.f32 %v970_v9, %v3887_v6 }
 0x130   : > { %v1114_v19 = vpack.c.b16 %v1108_v53, %v1107_v13  ;;  %v1027_v15 = vadd.f32 %v1026_v58, %v998_v40  ;;  %v1361_v53 = vunpack.i.h.s16 %v1349_v63  ;;  %v1359_v40 = vrot.slane %v1357_v1, 3 }
 0x131   : > { %v1055_v49 = vpop.f32.mrf.mxu3  ;;  %v1000_v27 = vadd.f32 %v999_v14, %v971_v35  ;;  %v1363_v58 = vunpack.i.h.s16 %v1353_v10 }
 0x132   : > { %1295 = vmatmul.bf16.gmra.mxu1 %v1114_v19  ;;  %v1056_v57 = vadd.f32 %v1055_v49, %v1027_v15  ;;  %v1365_v19 = vunpack.i.h.s16 %v1356_v34  ;;  %v1369_v49 = vpack.i.b16 %v1361_v53, %v1361_v53  ;;  %v1367_v15 = vunpack.i.h.s16 %v1359_v40 }
 0x134   : > { %v1069_v48 = vpack.c.bf16 %v1056_v57, %v1056_v57  ;;  %v1371_v57 = vpack.i.b16 %v1363_v58, %v1363_v58 }
 0x136   : > { %v973_v51 = vpop.f32.mrf.mxu0  ;;  %v1109_v24 = vunpack.c.l.b16 %v1069_v48  ;;  %v1379_v48 = vperm.slane %v1371_v57, 0 }
 0x137   : > { %v1028_v5 = vpop.f32.mrf.mxu2  ;;  %v1002_v21 = vpop.f32.mrf.mxu1  ;;  %v974_v22 = vadd.f32 %v973_v51, %v3879_v0  ;;  %v1377_v51 = vperm.slane %v1369_v49, 0 }
 0x138   : > { %v1029_v16 = vadd.f32 %v1028_v5, %v1000_v27  ;;  %v1373_v27 = vpack.i.b16 %v1365_v19, %v1365_v19 }
 0x139   : > { %v1057_v20 = vpop.f32.mrf.mxu3  ;;  %v1003_v26 = vadd.f32 %v1002_v21, %v974_v22 }
 0x13a   : > { %v1058_v23 = vadd.f32 %v1057_v20, %v1029_v16  ;;  %v1375_v20 = vpack.i.b16 %v1367_v15, %v1367_v15 }
 0x13c   : > { %v1070_v12 = vpack.c.bf16 %v1058_v23, %v1058_v23  ;;  %v1381_v23 = vperm.slane %v1373_v27, 0 }
 0x13e   : > { %v1110_v25 = vunpack.c.l.b16 %v1070_v12  ;;  %v975_v28 = vpop.f32.mrf.mxu0  ;;  %v1389_v12 = vpack.i.b16 %v1377_v51, %v1377_v51 }
 0x13f   : > { %v1031_v6 = vpop.f32.mrf.mxu2  ;;  %v976_v31 = vadd.f32 %v3492_v30, %v975_v28  ;;  %v1004_v32 = vpop.f32.mrf.mxu1  ;;  %v1405_v30 = vpack.i.b16 %v1381_v23, %v1381_v23 }
 0x140   : > { %v1115_v54 = vpack.c.b16 %v1110_v25, %v1109_v24  ;;  %v1032_v2 = vadd.f32 %v1031_v6, %v1003_v26  ;;  %v2931_v24 = vpack.i.b16 %v1349_v63, %v1349_v63  ;;  %v1383_v6 = vperm.slane %v1375_v20, 0 }
 0x141   : > { %v1060_v29 = vpop.f32.mrf.mxu3  ;;  %v1005_v36 = vadd.f32 %v1004_v32, %v976_v31  ;;  %v1391_v31 = vperm.slane %v1389_v12, 0  ;;  %v2932_v32 = vpack.i.b16 %v1353_v10, %v1353_v10 }
 0x142   : > { %1300 = vmatmul.bf16.gmra.mxu1 %v1115_v54  ;;  %v1061_v33 = vadd.f32 %v1060_v29, %v1032_v2  ;;  %v1397_v54 = vpack.i.b16 %v1379_v48, %v1379_v48  ;;  %v1376_v2 = vperm.slane %v2931_v24, 0 }
 0x144   : > { %v1071_v0 = vpack.c.bf16 %v1061_v33, %v1061_v33  ;;  %v1413_v33 = vpack.i.b16 %v1383_v6, %v1383_v6 }
 0x146   : > { %v1111_v39 = vunpack.c.l.b16 %v1071_v0  ;;  %v1262_v44 = vpop.f32.mrf.mxu0  ;;  %v2934_v0 = vpack.i.b16 %v1359_v40, %v1359_v40 }
 0x147   : > { %v1033_v37 = vpop.f32.mrf.mxu2  ;;  %v1263_v41 = vadd.f32 %v4201_v18, %v1262_v44 }
 0x148   : > { %v1034_v38 = vadd.f32 %v1033_v37, %v1005_v36 }
 0x149   : > { %v1062_v60 = vpop.f32.mrf.mxu3 }
 0x14a   : > { %v1063_v61 = vadd.f32 %v1062_v60, %v1034_v38  ;;  %v1399_v38 = vperm.slane %v1397_v54, 0  ;;  %v2933_v60 = vpack.i.b16 %v1356_v34, %v1356_v34 }
 0x14c   : > { %v1072_v17 = vpack.c.bf16 %v1063_v61, %v1063_v61  ;;  %v1407_v61 = vperm.slane %v1405_v30, 0  ;;  %v1380_v47 = vperm.slane %v2933_v60, 0 }
 0x14e   : > { %v1112_v43 = vunpack.c.l.b16 %v1072_v17  ;;  %v1264_v11 = vpop.f32.mrf.mxu0  ;;  %v4211_v17 = vunpack.c.l.bf16 %v1391_v31  ;;  %v1401_v1 = vpack.i.b16 %v1380_v47, %v1380_v47 }
 0x14f   : > { %v1265_v42 = vadd.f32 %v4201_v18, %v1264_v11  ;;  %v1415_v11 = vperm.slane %v1413_v33, 0 }
 0x150   : > { %v1116_v3 = vpack.c.b16 %v1112_v43, %v1111_v39  ;;  %v1385_v43 = vpack.i.b16 %v1376_v2, %v1376_v2 }
 0x151   : > { %v4225_v7 = vunpack.c.l.bf16 %v1415_v11 }
 0x152   : > { %1305 = vmatmul.bf16.gmra.mxu1 %v1116_v3  ;;  %v1378_v3 = vperm.slane %v2932_v32, 0 }
 0x156   : > { %v1267_v45 = vpop.f32.mrf.mxu0 }
 0x157   : > { %v1268_v35 = vadd.f32 %v4201_v18, %v1267_v45 }
 0x15e   : > { %v1269_v4 = vpop.f32.mrf.mxu0 }
 0x15f   : > { %v1270_v5 = vadd.f32 %v4201_v18, %v1269_v4  ;;  %v1387_v4 = vperm.slane %v1385_v43, 0 }
 0x161   : > { %v4237_v58 = vunpack.c.l.bf16 %v1387_v4 }
 0x166   : > { %v1272_v14 = vpop.f32.mrf.mxu0 }
 0x167   : > { %v1273_v44 = vadd.f32 %v4201_v18, %v1272_v14 }
 0x16e   : > { %v1274_v28 = vpop.f32.mrf.mxu0 }
 0x176   : > { %v1277_v50 = vpop.f32.mrf.mxu0 }
 0x17e   : > { %v1279_v24 = vpop.f32.mrf.mxu0 }
 0x17f   : > { %v1280_v60 = vadd.f32 %v4201_v18, %v1279_v24 }
 0x19f   : > { %v1291_v46 = vpop.f32.mrf.mxu1 }
 0x1a0   : > { %v1292_v62 = vadd.f32 %v1291_v46, %v1263_v41  ;;  %v4218_v46 = vunpack.c.l.bf16 %v1399_v38  ;;  %v1382_v41 = vperm.slane %v2934_v0, 0  ;;  %v1278_v38 = vadd.f32 %v4201_v18, %v1277_v50 }
 0x1a2   : > { %v1311_v56 = vmax.f32 %v1292_v62, 0.0  ;;  %v1409_v10 = vpack.i.b16 %v1382_v41, %v1382_v41 }
 0x1a7   : > { %v1293_v52 = vpop.f32.mrf.mxu1 }
 0x1a8   : > { %v1294_v55 = vadd.f32 %v1293_v52, %v1265_v42  ;;  %v4220_v42 = vunpack.c.l.bf16 %v1407_v61  ;;  %v1393_v52 = vpack.i.b16 %v1378_v3, %v1378_v3 }
 0x1aa   : > { %v1312_v59 = vmax.f32 %v1294_v55, 0.0  ;;  %v1275_v55 = vadd.f32 %v4201_v18, %v1274_v28  ;;  %v1395_v14 = vperm.slane %v1393_v52, 0 }
 0x1ac   : > { %v3358_v13 = vpack.c.bf16 %v1312_v59, %v1311_v56  ;;  %v4245_v12 = vunpack.c.l.bf16 %v1395_v14 }
 0x1ae   : > { %3359 = vst [vmem:[#allocation2] sm:$0xff] %v3358_v13  }
 0x1af   : > { %v1296_v9 = vpop.f32.mrf.mxu1 }
 0x1b0   : > { %v1297_v16 = vadd.f32 %v1296_v9, %v1268_v35 }
 0x1b2   : > { %v1313_v25 = vmax.f32 %v1297_v16, 0.0  ;;  %v1411_v16 = vperm.slane %v1409_v10, 0 }
 0x1b4   : > { %v4257_v2 = vunpack.c.l.bf16 %v1411_v16 }
 0x1b5   : > { %v1335_v36 = vld [vmem:[#allocation2] sm:$0xff]  }
 0x1b6   : > { %v4213_v39 = vunpack.c.l.bf16 %v1335_v36  ;;  %v4216_v45 = vunpack.c.h.bf16 %v1335_v36 }
 0x1b7   : > { %v1298_v21 = vpop.f32.mrf.mxu1 }
 0x1b8   : > { %v1299_v22 = vadd.f32 %v1298_v21, %v1270_v5  ;;  %v1440_v62 = vmul.f32 %v4211_v17, %v4213_v39  ;;  %v1441_v56 = vmul.f32 %v4211_v17, %v4216_v45  ;;  %v1456_v63 = vmul.f32 %v4218_v46, %v4213_v39 }
 0x1b9   : > { %v1457_v13 = vmul.f32 %v4218_v46, %v4216_v45  ;;  %v1472_v53 = vmul.f32 %v4220_v42, %v4213_v39  ;;  %v1473_v40 = vmul.f32 %v4220_v42, %v4216_v45  ;;  %v1488_v15 = vmul.f32 %v4225_v7, %v4213_v39 }
 0x1ba   : > { %v1314_v26 = vmax.f32 %v1299_v22, 0.0  ;;  %v1504_v9 = vpack.c.bf16 %v1440_v62, %v1440_v62  ;;  %v1505_v35 = vpack.c.bf16 %v1441_v56, %v1441_v56  ;;  %v1520_v27 = vpack.c.bf16 %v1456_v63, %v1456_v63 }
 0x1bb   : > { %v1489_v51 = vmul.f32 %v4225_v7, %v4216_v45  ;;  %v1403_v5 = vperm.slane %v1401_v1, 0  ;;  %v1521_v21 = vpack.c.bf16 %v1457_v13, %v1457_v13  ;;  %v1536_v48 = vpack.c.bf16 %v1472_v53, %v1472_v53 }
 0x1bc   : > { %v3363_v29 = vpack.c.bf16 %v1314_v26, %v1313_v25  ;;  %v1537_v22 = vpack.c.bf16 %v1473_v40, %v1473_v40  ;;  %v4243_v23 = vunpack.c.l.b16 %v1504_v9  ;;  %v4251_v28 = vunpack.c.l.b16 %v1505_v35 }
 0x1bd   : > { %v1552_v6 = vpack.c.bf16 %v1488_v15, %v1488_v15  ;;  %v1553_v30 = vpack.c.bf16 %v1489_v51, %v1489_v51  ;;  %v4255_v31 = vunpack.c.l.bf16 %v1403_v5  ;;  %v4259_v32 = vunpack.c.l.b16 %v1521_v21 }
 0x1be   : > { %3398 = vst [vmem:[#allocation2 + $0x8] sm:$0xff] %v3363_v29   ;;  %v4253_v29 = vunpack.c.l.b16 %v1520_v27  ;;  %v4261_v33 = vunpack.c.l.b16 %v1536_v48  ;;  %v4263_v36 = vunpack.c.l.b16 %v1537_v22  ;;  %v4273_v0 = vmul.f32 %v4237_v58, %v4216_v45 }
 0x1bf   : > { %v1301_v37 = vpop.f32.mrf.mxu1  ;;  %v4277_v61 = vmul.f32 %v4245_v12, %v4213_v39  ;;  %v4285_v11 = vunpack.c.l.b16 %v1552_v6  ;;  %v4291_v41 = vunpack.c.l.b16 %v1553_v30  ;;  %v4295_v50 = vmul.f32 %v4245_v12, %v4216_v45 }
 0x1c0   : > { %v1302_v8 = vadd.f32 %v1301_v37, %v1273_v44  ;;  %v4267_v37 = vmul.f32 %v4237_v58, %v4213_v39  ;;  %4756 = vst [vmem:[#allocation16_spill] sm:$0xff] %v4273_v0  ;;  %v4313_v63 = vmul.f32 %v4255_v31, %v4213_v39  ;;  %v4317_v53 = vmul.f32 %v4255_v31, %v4216_v45 }
 0x1c1   : > { %4757 = vst [vmem:[#allocation17_spill] sm:$0xff] %v4277_v61  ;;  %v4343_v30 = vmul.f32 %v4257_v2, %v4213_v39 }
 0x1c2   : > { %v1315_v19 = vmax.f32 %v1302_v8, 0.0  ;;  %4755 = vst [vmem:[#allocation15_spill] sm:$0xff] %v4267_v37 }
 0x1c3   : > { %4758 = vst [vmem:[#allocation18_spill] sm:$0xff] %v4295_v50 }
 0x1c4   : > { %4759 = vst [vmem:[#allocation19_spill] sm:$0xff] %v4313_v63 }
 0x1c5   : > { %v1337_v57 = vld [vmem:[#allocation2 + $0x8] sm:$0xff]   ;;  %4760 = vst [vmem:[#allocation20_spill] sm:$0xff] %v4317_v53 }
 0x1c6   : > { %v4247_v25 = vunpack.c.l.bf16 %v1337_v57  ;;  %v4249_v26 = vunpack.c.h.bf16 %v1337_v57  ;;  %4761 = vst [vmem:[#allocation21_spill] sm:$0xff] %v4343_v30 }
 0x1c7   : > { %v1303_v59 = vpop.f32.mrf.mxu1 }
 0x1c8   : > { %v1304_v34 = vadd.f32 %v1303_v59, %v1275_v55  ;;  %v1442_v43 = vmul.f32 %v4211_v17, %v4247_v25  ;;  %v1443_v3 = vmul.f32 %v4211_v17, %v4249_v26  ;;  %v1458_v18 = vmul.f32 %v4218_v46, %v4247_v25 }
 0x1c9   : > { %v1459_v47 = vmul.f32 %v4218_v46, %v4249_v26  ;;  %v1474_v62 = vmul.f32 %v4220_v42, %v4247_v25  ;;  %v1475_v8 = vmul.f32 %v4220_v42, %v4249_v26  ;;  %v1490_v57 = vmul.f32 %v4225_v7, %v4247_v25 }
 0x1ca   : > { %v1316_v49 = vmax.f32 %v1304_v34, 0.0  ;;  %v1506_v34 = vpack.c.bf16 %v1442_v43, %v1442_v43  ;;  %v1507_v13 = vpack.c.bf16 %v1443_v3, %v1443_v3  ;;  %v1522_v9 = vpack.c.bf16 %v1458_v18, %v1458_v18 }
 0x1cb   : > { %v1523_v14 = vpack.c.bf16 %v1459_v47, %v1459_v47  ;;  %v1538_v15 = vpack.c.bf16 %v1474_v62, %v1474_v62  ;;  %v1491_v27 = vmul.f32 %v4225_v7, %v4249_v26  ;;  %v1539_v16 = vpack.c.bf16 %v1475_v8, %v1475_v8 }
 0x1cc   : > { %v3368_v20 = vpack.c.bf16 %v1316_v49, %v1315_v19  ;;  %v4333_v22 = vunpack.c.l.b16 %v1506_v34  ;;  %v4335_v24 = vunpack.c.l.b16 %v1507_v13  ;;  %v4337_v6 = vunpack.c.l.b16 %v1522_v9 }
 0x1cd   : > { %v4349_v43 = vunpack.c.l.b16 %v1538_v15  ;;  %v1554_v3 = vpack.c.bf16 %v1490_v57, %v1490_v57  ;;  %v1555_v18 = vpack.c.bf16 %v1491_v27, %v1491_v27  ;;  %v4357_v39 = vunpack.c.l.b16 %v1539_v16 }
 0x1ce   : > { %3399 = vst [vmem:[#allocation2 + $0x10] sm:$0xff] %v3368_v20   ;;  %v4367_v34 = vmul.f32 %v4237_v58, %v4247_v25  ;;  %v4387_v27 = vmul.f32 %v4245_v12, %v4247_v25 }
 0x1cf   : > { %v1306_v54 = vpop.f32.mrf.mxu1  ;;  %v4381_v15 = vunpack.c.l.b16 %v1554_v3  ;;  %v4383_v57 = vunpack.c.l.b16 %v1555_v18 }
 0x1d0   : > { %v1307_v1 = vadd.f32 %v1306_v54, %v1278_v38  ;;  %v4339_v54 = vunpack.c.l.b16 %v1523_v14  ;;  %v4347_v38 = vmul.f32 %v4257_v2, %v4216_v45  ;;  %4763 = vst [vmem:[#allocation23_spill] sm:$0xff] %v4367_v34  ;;  %v4377_v14 = vmul.f32 %v4237_v58, %v4249_v26 }
 0x1d1   : > { %4765 = vst [vmem:[#allocation25_spill] sm:$0xff] %v4387_v27 }
 0x1d2   : > { %v1317_v21 = vmax.f32 %v1307_v1, 0.0  ;;  %4762 = vst [vmem:[#allocation22_spill] sm:$0xff] %v4347_v38 }
 0x1d3   : > { %4764 = vst [vmem:[#allocation24_spill] sm:$0xff] %v4377_v14 }
 0x1d5   : > { %v1339_v10 = vld [vmem:[#allocation2 + $0x10] sm:$0xff]  }
 0x1d6   : > { %v4327_v51 = vunpack.c.l.bf16 %v1339_v10  ;;  %v4329_v5 = vunpack.c.h.bf16 %v1339_v10 }
 0x1d7   : > { %v1308_v40 = vpop.f32.mrf.mxu1 }
 0x1d8   : > { %v1309_v35 = vadd.f32 %v1308_v40, %v1280_v60  ;;  %v1444_v47 = vmul.f32 %v4211_v17, %v4327_v51  ;;  %v1445_v62 = vmul.f32 %v4211_v17, %v4329_v5  ;;  %v1460_v8 = vmul.f32 %v4218_v46, %v4327_v51 }
 0x1d9   : > { %v1461_v45 = vmul.f32 %v4218_v46, %v4329_v5  ;;  %v1476_v1 = vmul.f32 %v4220_v42, %v4327_v51  ;;  %v1477_v13 = vmul.f32 %v4220_v42, %v4329_v5  ;;  %v1492_v40 = vmul.f32 %v4225_v7, %v4327_v51 }
 0x1da   : > { %v1318_v48 = vmax.f32 %v1309_v35, 0.0  ;;  %v1493_v9 = vmul.f32 %v4225_v7, %v4329_v5  ;;  %v1508_v16 = vpack.c.bf16 %v1444_v47, %v1444_v47  ;;  %v4415_v35 = vmul.f32 %v4237_v58, %v4327_v51 }
 0x1db   : > { %v1525_v20 = vpack.c.bf16 %v1461_v45, %v1461_v45  ;;  %v1540_v49 = vpack.c.bf16 %v1476_v1, %v1476_v1  ;;  %v1541_v18 = vpack.c.bf16 %v1477_v13, %v1477_v13  ;;  %v1556_v56 = vpack.c.bf16 %v1492_v40, %v1492_v40 }
 0x1dc   : > { %v3373_v60 = vpack.c.bf16 %v1318_v48, %v1317_v21  ;;  %v1509_v21 = vpack.c.bf16 %v1445_v62, %v1445_v62  ;;  %v1524_v48 = vpack.c.bf16 %v1460_v8, %v1460_v8  ;;  %v1557_v55 = vpack.c.bf16 %v1493_v9, %v1493_v9 }
 0x1dd   : > { %v4405_v45 = vmul.f32 %v4255_v31, %v4247_v25  ;;  %v4409_v1 = vmul.f32 %v4255_v31, %v4249_v26  ;;  %v1732_v40 = vunpack.c.l.b16 %v1508_v16  ;;  %v1749_v4 = vunpack.c.l.b16 %v1525_v20 }
 0x1de   : > { %3400 = vst [vmem:[#allocation2 + $0x18] sm:$0xff] %v3373_v60   ;;  %v4391_v60 = vmul.f32 %v4245_v12, %v4249_v26  ;;  %v1733_v9 = vunpack.c.l.b16 %v1509_v21  ;;  %v1748_v3 = vunpack.c.l.b16 %v1524_v48  ;;  %v1764_v44 = vunpack.c.l.b16 %v1540_v49 }
 0x1df   : > { %v1765_v8 = vunpack.c.l.b16 %v1541_v18  ;;  %v1780_v62 = vunpack.c.l.b16 %v1556_v56  ;;  %v1781_v59 = vunpack.c.l.b16 %v1557_v55 }
 0x1e0   : > { %4766 = vst [vmem:[#allocation26_spill] sm:$0xff] %v4391_v60 }
 0x1e5   : > { %v1341_v13 = vld [vmem:[#allocation2 + $0x18] sm:$0xff]  }
 0x1e6   : > { %v1422_v19 = vunpack.c.l.bf16 %v1341_v13  ;;  %v1423_v52 = vunpack.c.h.bf16 %v1341_v13 }
 0x1e8   : > { %v1446_v10 = vmul.f32 %v4211_v17, %v1422_v19  ;;  %v1447_v16 = vmul.f32 %v4211_v17, %v1423_v52  ;;  %v1462_v21 = vmul.f32 %v4218_v46, %v1422_v19  ;;  %v1463_v48 = vmul.f32 %v4218_v46, %v1423_v52 }
 0x1e9   : > { %v1478_v47 = vmul.f32 %v4220_v42, %v1422_v19  ;;  %v1479_v20 = vmul.f32 %v4220_v42, %v1423_v52  ;;  %v1494_v49 = vmul.f32 %v4225_v7, %v1422_v19  ;;  %v1495_v55 = vmul.f32 %v4225_v7, %v1423_v52 }
 0x1ea   : > { %v1510_v56 = vpack.c.bf16 %v1446_v10, %v1446_v10  ;;  %v1511_v18 = vpack.c.bf16 %v1447_v16, %v1447_v16  ;;  %v1526_v13 = vpack.c.bf16 %v1462_v21, %v1462_v21  ;;  %v1527_v63 = vpack.c.bf16 %v1463_v48, %v1463_v48 }
 0x1eb   : > { %v1542_v50 = vpack.c.bf16 %v1478_v47, %v1478_v47  ;;  %v1543_v61 = vpack.c.bf16 %v1479_v20, %v1479_v20  ;;  %v1558_v0 = vpack.c.bf16 %v1494_v49, %v1494_v49  ;;  %v1559_v17 = vpack.c.bf16 %v1495_v55, %v1495_v55 }
 0x1ec   : > { %v1734_v37 = vunpack.c.l.b16 %v1510_v56  ;;  %v1735_v60 = vunpack.c.l.b16 %v1511_v18  ;;  %v1750_v27 = vunpack.c.l.b16 %v1526_v13  ;;  %v1751_v46 = vunpack.c.l.b16 %v1527_v63 }
 0x1ed   : > { %v1766_v14 = vunpack.c.l.b16 %v1542_v50  ;;  %v1767_v34 = vunpack.c.l.b16 %v1543_v61  ;;  %v1782_v38 = vunpack.c.l.b16 %v1558_v0  ;;  %v1783_v42 = vunpack.c.l.b16 %v1559_v17 }
 0x1ee   : > { %v1791_v30 = vpack.c.b16 %v1735_v60, %v1734_v37  ;;  %v1799_v53 = vpack.c.b16 %v1751_v46, %v1750_v27  ;;  %v1530_v7 = vpack.c.bf16 %v4405_v45, %v4405_v45  ;;  %v4429_v10 = vmul.f32 %v4257_v2, %v4247_v25 }
 0x1ef   : > { %v1807_v47 = vpack.c.b16 %v1767_v34, %v1766_v14  ;;  %v1815_v16 = vpack.c.b16 %v1783_v42, %v1782_v38  ;;  %v1790_v21 = vpack.c.b16 %v1733_v9, %v1732_v40  ;;  %v4433_v48 = vmul.f32 %v4257_v2, %v4249_v26 }
 0x1f0   : > { %1848 = vmatpush.bf16.msrb.mxu2 %v1791_v30  ;;  %1877 = vmatpush.bf16.msrb.mxu3 %v1799_v53  ;;  %v1798_v0 = vpack.c.b16 %v1749_v4, %v1748_v3  ;;  %v1806_v61 = vpack.c.b16 %v1765_v8, %v1764_v44  ;;  %v1437_v37 = vmul.f32 %v4237_v58, %v4329_v5 }
 0x1f1   : > { %1906 = vmatpush.bf16.msra.mxu0 %v1807_v47  ;;  %1935 = vmatpush.bf16.msra.mxu1 %v1815_v16  ;;  %v1814_v50 = vpack.c.b16 %v1781_v59, %v1780_v62  ;;  %v1500_v25 = vpack.c.bf16 %v4415_v35, %v4415_v35  ;;  %v1452_v63 = vmul.f32 %v4245_v12, %v4327_v51 }
 0x1f2   : > { %v1438_v38 = vmul.f32 %v4237_v58, %v1422_v19  ;;  %v1439_v26 = vmul.f32 %v4237_v58, %v1423_v52  ;;  %v1454_v53 = vmul.f32 %v4245_v12, %v1422_v19  ;;  %v1455_v44 = vmul.f32 %v4245_v12, %v1423_v52 }
 0x1f3   : > { %v1470_v4 = vmul.f32 %v4255_v31, %v1422_v19  ;;  %v1471_v30 = vmul.f32 %v4255_v31, %v1423_v52  ;;  %v1486_v59 = vmul.f32 %v4257_v2, %v1422_v19  ;;  %v1487_v34 = vmul.f32 %v4257_v2, %v1423_v52 }
 0x1f4   : > { %1849 = vmatpush.bf16.msrb.mxu2 %v1790_v21  ;;  %1878 = vmatpush.bf16.msrb.mxu3 %v1798_v0  ;;  %v1501_v14 = vpack.c.bf16 %v1437_v37, %v1437_v37  ;;  %v1453_v35 = vmul.f32 %v4245_v12, %v4329_v5  ;;  %v1468_v58 = vmul.f32 %v4255_v31, %v4327_v51 }
 0x1f5   : > { %1907 = vmatpush.bf16.msra.mxu0 %v1806_v61  ;;  %1936 = vmatpush.bf16.msra.mxu1 %v1814_v50  ;;  %v1469_v27 = vmul.f32 %v4255_v31, %v4329_v5  ;;  %v1484_v60 = vmul.f32 %v4257_v2, %v4327_v51  ;;  %v1485_v52 = vmul.f32 %v4257_v2, %v4329_v5 }
 0x1f6   : > { %v1502_v19 = vpack.c.bf16 %v1438_v38, %v1438_v38  ;;  %v1503_v3 = vpack.c.bf16 %v1439_v26, %v1439_v26  ;;  %v1518_v62 = vpack.c.bf16 %v1454_v53, %v1454_v53  ;;  %v1519_v8 = vpack.c.bf16 %v1455_v44, %v1455_v44  ;;  %v4776_v53 = vld [vmem:[#allocation21_spill] sm:$0xff]  ;;  %v4778_v44 = vld [vmem:[#allocation23_spill] sm:$0xff] }
 0x1f7   : > { %v1534_v40 = vpack.c.bf16 %v1470_v4, %v1470_v4  ;;  %v1535_v12 = vpack.c.bf16 %v1471_v30, %v1471_v30  ;;  %v1550_v9 = vpack.c.bf16 %v1486_v59, %v1486_v59  ;;  %v1551_v20 = vpack.c.bf16 %v1487_v34, %v1487_v34  ;;  %v4780_v59 = vld [vmem:[#allocation24_spill] sm:$0xff] }
 0x1f8   : > { %v4767_v49 = vpack.c.b16 %v4335_v24, %v4333_v22  ;;  %v4768_v31 = vpack.c.b16 %v4339_v54, %v4337_v6  ;;  %v1516_v51 = vpack.c.bf16 %v1452_v63, %v1452_v63  ;;  %v1517_v55 = vpack.c.bf16 %v1453_v35, %v1453_v35  ;;  %v4782_v35 = vld [vmem:[#allocation25_spill] sm:$0xff] }
 0x1f9   : > { %v1532_v56 = vpack.c.bf16 %v1468_v58, %v1468_v58  ;;  %v4769_v2 = vpack.c.b16 %v4357_v39, %v4349_v43  ;;  %v4770_v5 = vpack.c.b16 %v4383_v57, %v4381_v15  ;;  %v1533_v18 = vpack.c.bf16 %v1469_v27, %v1469_v27 }
 0x1fa   : > { %1850 = vmatpush.bf16.msrb.mxu2 %v4767_v49  ;;  %1879 = vmatpush.bf16.msrb.mxu3 %v4768_v31  ;;  %v1548_v13 = vpack.c.bf16 %v1484_v60, %v1484_v60  ;;  %v1549_v17 = vpack.c.bf16 %v1485_v52, %v1485_v52  ;;  %v1726_v22 = vunpack.c.l.b16 %v1502_v19  ;;  %v1727_v24 = vunpack.c.l.b16 %v1503_v3  ;;  %v4784_v60 = vld [vmem:[#allocation26_spill] sm:$0xff]  ;;  %v4786_v31 = vld [vmem:[#allocation15_spill] sm:$0xff] }
 0x1fb   : > { %1908 = vmatpush.bf16.msra.mxu0 %v4769_v2  ;;  %1937 = vmatpush.bf16.msra.mxu1 %v4770_v5  ;;  %v1742_v46 = vunpack.c.l.b16 %v1518_v62  ;;  %v1743_v42 = vunpack.c.l.b16 %v1519_v8  ;;  %v1758_v6 = vunpack.c.l.b16 %v1534_v40  ;;  %v1759_v54 = vunpack.c.l.b16 %v1535_v12 }
 0x1fc   : > { %v1774_v47 = vunpack.c.l.b16 %v1550_v9  ;;  %v1775_v16 = vunpack.c.l.b16 %v1551_v20  ;;  %v4771_v21 = vpack.c.b16 %v4251_v28, %v4243_v23  ;;  %v4772_v43 = vpack.c.b16 %v4259_v32, %v4253_v29 }
 0x1fd   : > { %v1531_v39 = vpack.c.bf16 %v4409_v1, %v4409_v1  ;;  %v1546_v15 = vpack.c.bf16 %v4429_v10, %v4429_v10  ;;  %v1547_v57 = vpack.c.bf16 %v4433_v48, %v4433_v48  ;;  %v4773_v0 = vpack.c.b16 %v4263_v36, %v4261_v33  ;;  %v4775_v33 = vld [vmem:[#allocation20_spill] sm:$0xff] }
 0x1fe   : > { %1851 = vmatpush.bf16.msrb.mxu2 %v4771_v21  ;;  %1880 = vmatpush.bf16.msrb.mxu3 %v4772_v43  ;;  %v4774_v23 = vpack.c.b16 %v4291_v41, %v4285_v11  ;;  %v1724_v28 = vunpack.c.l.b16 %v1500_v25  ;;  %v1725_v29 = vunpack.c.l.b16 %v1501_v14  ;;  %v1740_v32 = vunpack.c.l.b16 %v1516_v51  ;;  %v4777_v41 = vld [vmem:[#allocation22_spill] sm:$0xff] }
 0x1ff   : > { %1909 = vmatpush.bf16.msra.mxu0 %v4773_v0  ;;  %v1741_v61 = vunpack.c.l.b16 %v1517_v55  ;;  %v1787_v37 = vpack.c.b16 %v1727_v24, %v1726_v22  ;;  %v1795_v1 = vpack.c.b16 %v1743_v42, %v1742_v46  ;;  %v1756_v50 = vunpack.c.l.b16 %v1532_v56  ;;  %v4788_v56 = vld [vmem:[#allocation16_spill] sm:$0xff]  ;;  %v4794_v42 = vld [vmem:[#allocation19_spill] sm:$0xff]  ;;  %v3267_v0 = vld [vmem:[%s4720_s0 + $0x4] sm:$0xf] }
 0x200   : > { %1938 = vmatpush.bf16.msra.mxu1 %v4774_v23  ;;  %v1757_v63 = vunpack.c.l.b16 %v1533_v18  ;;  %v1803_v10 = vpack.c.b16 %v1759_v54, %v1758_v6  ;;  %v1811_v38 = vpack.c.b16 %v1775_v16, %v1774_v47  ;;  %v1772_v26 = vunpack.c.l.b16 %v1548_v13  ;;  %v4790_v18 = vld [vmem:[#allocation17_spill] sm:$0xff]  ;;  %v4792_v13 = vld [vmem:[#allocation18_spill] sm:$0xff]  ;;  %v2939_v23 = vld [vmem:[%s4720_s0 + $0x10] sm:$0xf0] }
 0x201   : > { %v1773_v48 = vunpack.c.l.b16 %v1549_v17  ;;  %v1529_v36 = vpack.c.bf16 %v4775_v33, %v4775_v33  ;;  %v1544_v11 = vpack.c.bf16 %v4776_v53, %v4776_v53  ;;  %v1545_v25 = vpack.c.bf16 %v4777_v41, %v4777_v41  ;;  %v3290_v33 = vld [vmem:[#allocation5 + $0xb8] sm:$0xff]  ;;  %v3288_v53 = vld [vmem:[#allocation5 + $0xa8] sm:$0xff] }
 0x202   : > { %1852 = vmatpush.bf16.msrb.mxu2 %v1787_v37  ;;  %1881 = vmatpush.bf16.msrb.mxu3 %v1795_v1  ;;  %v4779_v4 = vpack.c.bf16 %v4778_v44, %v4778_v44  ;;  %v4781_v34 = vpack.c.bf16 %v4780_v59, %v4780_v59  ;;  %v4783_v58 = vpack.c.bf16 %v4782_v35, %v4782_v35  ;;  %v1754_v8 = vunpack.c.l.b16 %v1530_v7  ;;  %v3273_v41 = vld [vmem:[%s4720_s0 + $0x2c] sm:$0xf0]  ;;  %v2955_v44 = vld [vmem:[%s4720_s0 + $0x30] sm:$0xf0]  ;;  %v3272_v59 = vld [vmem:[%s4720_s0 + $0x2c] sm:$0xf] }
 0x203   : > { %1910 = vmatpush.bf16.msra.mxu0 %v1803_v10  ;;  %v4785_v52 = vpack.c.bf16 %v4784_v60, %v4784_v60  ;;  %v1786_v3 = vpack.c.b16 %v1725_v29, %v1724_v28  ;;  %v1794_v62 = vpack.c.b16 %v1741_v61, %v1740_v32  ;;  %v1755_v40 = vunpack.c.l.b16 %v1531_v39  ;;  %v2945_v28 = vld [vmem:[%s4720_s0 + $0x8] sm:$0xf]  ;;  %v3270_v29 = vld [vmem:[%s4720_s0 + $0x14] sm:$0xf0]  ;;  %v3268_v32 = vld [vmem:[%s4720_s0 + $0xc] sm:$0xf] }
 0x204   : > { %1939 = vmatpush.bf16.msra.mxu1 %v1811_v38  ;;  %v1722_v30 = vunpack.c.l.b16 %v4779_v4  ;;  %v1723_v14 = vunpack.c.l.b16 %v4781_v34  ;;  %v1738_v27 = vunpack.c.l.b16 %v4783_v58  ;;  %v1802_v12 = vpack.c.b16 %v1757_v63, %v1756_v50  ;;  %v2947_v61 = vld [vmem:[%s4720_s0 + $0x18] sm:$0xf0]  ;;  %v2961_v4 = vld [vmem:[%s4720_s0 + $0x28] sm:$0xf] }
 0x205   : > { %v1739_v19 = vunpack.c.l.b16 %v4785_v52  ;;  %v1810_v9 = vpack.c.b16 %v1773_v48, %v1772_v26  ;;  %v1770_v20 = vunpack.c.l.b16 %v1546_v15  ;;  %v1771_v49 = vunpack.c.l.b16 %v1547_v57  ;;  %v2937_v15 = vld [vmem:[%s4720_s0] sm:$0xf]  ;;  %v3269_v57 = vld [vmem:[%s4720_s0 + $0xc] sm:$0xf0]  ;;  %v2963_v34 = vld [vmem:[%s4720_s0 + $0x38] sm:$0xf0] }
 0x206   : > { %1853 = vmatpush.bf16.msrb.mxu2 %v1786_v3  ;;  %1882 = vmatpush.bf16.msrb.mxu3 %v1794_v62  ;;  %v4787_v51 = vpack.c.bf16 %v4786_v31, %v4786_v31  ;;  %v4789_v2 = vpack.c.bf16 %v4788_v56, %v4788_v56  ;;  %v4791_v45 = vpack.c.bf16 %v4790_v18, %v4790_v18  ;;  %v1753_v47 = vunpack.c.l.b16 %v1529_v36  ;;  %v3289_v36 = vld [vmem:[#allocation5 + $0xb0] sm:$0xff]  ;;  %v3286_v52 = vld [vmem:[#allocation5 + $0x98] sm:$0xff]  ;;  %v3284_v3 = vld [vmem:[#allocation5 + $0x88] sm:$0xff] }
 0x207   : > { %1911 = vmatpush.bf16.msra.mxu0 %v1802_v12  ;;  %v4793_v17 = vpack.c.bf16 %v4792_v13, %v4792_v13  ;;  %v1785_v24 = vpack.c.b16 %v1723_v14, %v1722_v30  ;;  %v1793_v46 = vpack.c.b16 %v1739_v19, %v1738_v27  ;;  %v4795_v6 = vpack.c.bf16 %v4794_v42, %v4794_v42  ;;  %v3274_v30 = vld [vmem:[%s4720_s0 + $0x34] sm:$0xf0]  ;;  %v3287_v14 = vld [vmem:[#allocation5 + $0xa0] sm:$0xff]  ;;  %v2969_v62 = vld [vmem:[%s4720_s0 + $0x40] sm:$0xf] }
 0x208   : > { %1940 = vmatpush.bf16.msra.mxu1 %v1810_v9  ;;  %v1720_v55 = vunpack.c.l.b16 %v4787_v51  ;;  %v1721_v5 = vunpack.c.l.b16 %v4789_v2  ;;  %v1736_v7 = vunpack.c.l.b16 %v4791_v45  ;;  %v1801_v16 = vpack.c.b16 %v1755_v40, %v1754_v8  ;;  %v3285_v19 = vld [vmem:[#allocation5 + $0x90] sm:$0xff]  ;;  %v3277_v8 = vld [vmem:[%s4720_s0 + $0x4c] sm:$0xf0]  ;;  %v3275_v40 = vld [vmem:[%s4720_s0 + $0x44] sm:$0xf] }
 0x209   : > { %v1737_v22 = vunpack.c.l.b16 %v4793_v17  ;;  %v1752_v54 = vunpack.c.l.b16 %v4795_v6  ;;  %v1809_v21 = vpack.c.b16 %v1771_v49, %v1770_v20  ;;  %v1768_v43 = vunpack.c.l.b16 %v1544_v11  ;;  %v2953_v11 = vld [vmem:[%s4720_s0 + $0x20] sm:$0xf]  ;;  %v2971_v12 = vld [vmem:[%s4720_s0 + $0x50] sm:$0xf0]  ;;  %v2977_v9 = vld [vmem:[%s4720_s0 + $0x48] sm:$0xf] }
 0x20a   : > { %v1769_v39 = vunpack.c.l.b16 %v1545_v25  ;;  %1854 = vmatpush.bf16.msrb.mxu2 %v1785_v24  ;;  %1883 = vmatpush.bf16.msrb.mxu3 %v1793_v46  ;;  %v1784_v37 = vpack.c.b16 %v1721_v5, %v1720_v55  ;;  %v2938_v10 = vor.u32 %v3269_v57, %v2937_v15  ;;  %v2942_v38 = vor.u32 %v3267_v0, %v2939_v23  ;;  %v3271_v25 = vld [vmem:[%s4720_s0 + $0x24] sm:$0xf]  ;;  %v3278_v20 = vld [vmem:[%s4720_s0 + $0x54] sm:$0xf0]  ;;  %v3276_v49 = vld [vmem:[%s4720_s0 + $0x4c] sm:$0xf] }
 0x20b   : > { %1912 = vmatpush.bf16.msra.mxu0 %v1801_v16  ;;  %v1792_v1 = vpack.c.b16 %v1737_v22, %v1736_v7  ;;  %v1800_v50 = vpack.c.b16 %v1753_v47, %v1752_v54  ;;  %v2946_v26 = vor.u32 %v3270_v29, %v2945_v28  ;;  %v2950_v48 = vor.u32 %v3268_v32, %v2947_v61  ;;  %v2979_v31 = vld [vmem:[%s4720_s0 + $0x58] sm:$0xf0]  ;;  %v3283_v51 = vld [vmem:[#allocation5 + $0x80] sm:$0xff]  ;;  %v2985_v18 = vld [vmem:[%s4720_s0 + $0x60] sm:$0xf] }
 0x20c   : > { %1941 = vmatpush.bf16.msra.mxu1 %v1809_v21  ;;  %v1808_v63 = vpack.c.b16 %v1769_v39, %v1768_v43  ;;  %v2954_v35 = vor.u32 %v3273_v41, %v2953_v11  ;;  %v2958_v58 = vor.u32 %v3271_v25, %v2955_v44  ;;  %v2962_v27 = vor.u32 %v3274_v30, %v2961_v4  ;;  %v3281_v45 = vld [vmem:[%s4720_s0 + $0x6c] sm:$0xf0]  ;;  %v3279_v7 = vld [vmem:[%s4720_s0 + $0x64] sm:$0xf]  ;;  %v2987_v13 = vld [vmem:[%s4720_s0 + $0x70] sm:$0xf0] }
 0x20d   : > { %v2966_v60 = vor.u32 %v3272_v59, %v2963_v34  ;;  %v2970_v55 = vor.u32 %v3277_v8, %v2969_v62  ;;  %v2974_v56 = vor.u32 %v3275_v40, %v2971_v12  ;;  %v2978_v2 = vor.u32 %v3278_v20, %v2977_v9  ;;  %v2993_v17 = vld [vmem:[%s4720_s0 + $0x68] sm:$0xf]  ;;  %v3282_v22 = vld [vmem:[%s4720_s0 + $0x74] sm:$0xf0]  ;;  %v3280_v24 = vld [vmem:[%s4720_s0 + $0x6c] sm:$0xf] }
 0x20e   : > { %1855 = vmatpush.bf16.msrb.mxu2 %v1784_v37  ;;  %1884 = vmatpush.bf16.msrb.mxu3 %v1792_v1  ;;  %v2982_v5 = vor.u32 %v3276_v49, %v2979_v31  ;;  %v2995_v46 = vld [vmem:[%s4720_s0 + $0x78] sm:$0xf0]  ;;  %v2986_v42 = vor.u32 %v3281_v45, %v2985_v18  ;;  %v2990_v6 = vor.u32 %v3279_v7, %v2987_v13  ;;  %v3263_v16 = vld [vmem:[#allocation2] sm:$0xff]  ;;  %v3264_v21 = vld [vmem:[#allocation2 + $0x8] sm:$0xff] }
 0x20f   : > { %1913 = vmatpush.bf16.msra.mxu0 %v1800_v50  ;;  %v2994_v54 = vor.u32 %v3282_v22, %v2993_v17  ;;  %v2998_v47 = vor.u32 %v3280_v24, %v2995_v46  ;;  %v3298_v43 = vld [vmem:[#allocation5 + $0xf8] sm:$0xff]  ;;  %v3297_v39 = vld [vmem:[#allocation5 + $0xf0] sm:$0xff]  ;;  %v3265_v15 = vld [vmem:[#allocation2 + $0x10] sm:$0xff] }
 0x210   : > { %1942 = vmatpush.bf16.msra.mxu1 %v1808_v63  ;;  %v3296_v57 = vld [vmem:[#allocation5 + $0xe8] sm:$0xff]  ;;  %v3295_v0 = vld [vmem:[#allocation5 + $0xe0] sm:$0xff]  ;;  %v3266_v23 = vld [vmem:[#allocation2 + $0x18] sm:$0xff] }
 0x211   : > { %1856 = vmatmul.bf16.vlgmr.msrb.gmra.mxu2 %v2938_v10  ;;  %1885 = vmatmul.bf16.vlgmr.msrb.gmra.mxu3 %v2942_v38  ;;  %v3294_v28 = vld [vmem:[#allocation5 + $0xd8] sm:$0xff]  ;;  %v3293_v29 = vld [vmem:[#allocation5 + $0xd0] sm:$0xff]  ;;  %v3292_v32 = vld [vmem:[#allocation5 + $0xc8] sm:$0xff] }
 0x212   : > { %1914 = vmatmul.bf16.vlgmr.msra.gmra.mxu0 %v2946_v26  ;;  %2154 = vmatpush.bf16.msra.mxu2 %v3290_v33  ;;  %v3291_v61 = vld [vmem:[#allocation5 + $0xc0] sm:$0xff]  ;;  %v3494_v41 = vld [vmem:[%s3872_s19 + $0x8] sm:$0xff] }
 0x213   : > { %1943 = vmatmul.bf16.vlgmr.msra.gmra.mxu1 %v2950_v48  ;;  %2183 = vmatpush.bf16.msra.mxu3 %v3298_v43  ;;  %v3493_v10 = vld [vmem:[%s3872_s19] sm:$0xff] }
 0x214   : > { %v3497_v46 = vld [vmem:[%s3872_s19 + $0x20] sm:$0xff] }
 0x216   : > { %2155 = vmatpush.bf16.msra.mxu2 %v3289_v36 }
 0x217   : > { %2184 = vmatpush.bf16.msra.mxu3 %v3297_v39 }
 0x21a   : > { %2156 = vmatpush.bf16.msra.mxu2 %v3288_v53 }
 0x21b   : > { %2185 = vmatpush.bf16.msra.mxu3 %v3296_v57  ;;  %v3498_v57 = vld [vmem:[%s3872_s19 + $0x28] sm:$0xff] }
 0x21e   : > { %2157 = vmatpush.bf16.msra.mxu2 %v3287_v14 }
 0x21f   : > { %2186 = vmatpush.bf16.msra.mxu3 %v3295_v0 }
 0x221   : > { %1861 = vmatmul.bf16.gmra.mxu2 %v2954_v35  ;;  %1890 = vmatmul.bf16.gmra.mxu3 %v2958_v58 }
 0x222   : > { %1919 = vmatmul.bf16.gmra.mxu0 %v2962_v27  ;;  %2158 = vmatpush.bf16.msra.mxu2 %v3286_v52  ;;  %v3495_v52 = vld [vmem:[%s3872_s19 + $0x10] sm:$0xff] }
 0x223   : > { %1948 = vmatmul.bf16.gmra.mxu1 %v2966_v60  ;;  %2187 = vmatpush.bf16.msra.mxu3 %v3294_v28 }
 0x226   : > { %2159 = vmatpush.bf16.msra.mxu2 %v3285_v19 }
 0x227   : > { %2188 = vmatpush.bf16.msra.mxu3 %v3293_v29 }
 0x22a   : > { %2160 = vmatpush.bf16.msra.mxu2 %v3284_v3 }
 0x22b   : > { %2189 = vmatpush.bf16.msra.mxu3 %v3292_v32 }
 0x22e   : > { %2161 = vmatpush.bf16.msra.mxu2 %v3283_v51  ;;  %v3496_v51 = vld [vmem:[%s3872_s19 + $0x18] sm:$0xff] }
 0x22f   : > { %2190 = vmatpush.bf16.msra.mxu3 %v3291_v61 }
 0x231   : > { %1866 = vmatmul.bf16.gmra.mxu2 %v2970_v55  ;;  %1895 = vmatmul.bf16.gmra.mxu3 %v2974_v56 }
 0x232   : > { %1924 = vmatmul.bf16.gmra.mxu0 %v2978_v2 }
 0x233   : > { %1953 = vmatmul.bf16.gmra.mxu1 %v2982_v5 }
 0x241   : > { %1871 = vmatmul.bf16.gmra.mxu2 %v2986_v42  ;;  %1900 = vmatmul.bf16.gmra.mxu3 %v2990_v6 }
 0x242   : > { %1929 = vmatmul.bf16.gmra.mxu0 %v2994_v54 }
 0x243   : > { %1958 = vmatmul.bf16.gmra.mxu1 %v2998_v47 }
 0x251   : > { %2162 = vmatmul.bf16.vlgmr.msra.gmra.mxu2 %v3263_v16 }
 0x261   : > { %2167 = vmatmul.bf16.gmra.mxu2 %v3264_v21 }
 0x271   : > { %2172 = vmatmul.bf16.gmra.mxu2 %v3265_v15 }
 0x281   : > { %2177 = vmatmul.bf16.gmra.mxu2 %v3266_v23 }
 0x28f   : > { %v1915_v37 = vpop.f32.mrf.mxu0 }
 0x290   : > { %v1944_v1 = vpop.f32.mrf.mxu1 }
 0x294   : > { %v1857_v50 = vpop.f32.mrf.mxu2  ;;  %v1886_v63 = vpop.f32.mrf.mxu3 }
 0x295   : > { %v1858_v38 = vadd.f32 %v3493_v10, %v1857_v50  ;;  %v3499_v10 = vld [vmem:[%s3872_s19 + $0x30] sm:$0xff] }
 0x297   : > { %v1887_v26 = vadd.f32 %v1886_v63, %v1858_v38  ;;  %v1917_v48 = vpop.f32.mrf.mxu0 }
 0x298   : > { %v1946_v33 = vpop.f32.mrf.mxu1 }
 0x299   : > { %v1916_v36 = vadd.f32 %v1915_v37, %v1887_v26 }
 0x29b   : > { %v1945_v44 = vadd.f32 %v1944_v1, %v1916_v36 }
 0x29c   : > { %v1859_v53 = vpop.f32.mrf.mxu2  ;;  %v1888_v11 = vpop.f32.mrf.mxu3 }
 0x29d   : > { %v1860_v25 = vadd.f32 %v3494_v41, %v1859_v53  ;;  %v1964_v14 = vpack.c.bf16 %v1945_v44, %v1945_v44  ;;  %v3500_v44 = vld [vmem:[%s3872_s19 + $0x38] sm:$0xff] }
 0x29f   : > { %v1889_v4 = vadd.f32 %v1888_v11, %v1860_v25  ;;  %v1920_v30 = vpop.f32.mrf.mxu0  ;;  %v2004_v3 = vunpack.c.l.b16 %v1964_v14 }
 0x2a0   : > { %v1949_v59 = vpop.f32.mrf.mxu1 }
 0x2a1   : > { %v1918_v34 = vadd.f32 %v1917_v48, %v1889_v4 }
 0x2a3   : > { %v1947_v35 = vadd.f32 %v1946_v33, %v1918_v34 }
 0x2a4   : > { %v1862_v58 = vpop.f32.mrf.mxu2  ;;  %v1891_v27 = vpop.f32.mrf.mxu3 }
 0x2a5   : > { %v1965_v60 = vpack.c.bf16 %v1947_v35, %v1947_v35  ;;  %v1863_v19 = vadd.f32 %v3495_v52, %v1862_v58 }
 0x2a7   : > { %v2005_v62 = vunpack.c.l.b16 %v1965_v60  ;;  %v1892_v8 = vadd.f32 %v1891_v27, %v1863_v19  ;;  %v1922_v40 = vpop.f32.mrf.mxu0 }
 0x2a8   : > { %v1951_v9 = vpop.f32.mrf.mxu1 }
 0x2a9   : > { %v2012_v12 = vpack.c.b16 %v2005_v62, %v2004_v3  ;;  %v1921_v20 = vadd.f32 %v1920_v30, %v1892_v8  ;;  %v3153_v8 = vld [vmem:[#allocation8 + $0x70] sm:$0xf] }
 0x2ab   : > { %2191 = vmatmul.bf16.vlgmr.msra.gmra.mxu3 %v2012_v12  ;;  %v1950_v56 = vadd.f32 %v1949_v59, %v1921_v20  ;;  %v3317_v12 = vld [vmem:[#allocation8 + $0x74] sm:$0xf]  ;;  %v3155_v20 = vld [vmem:[#allocation8 + $0x78] sm:$0xf0] }
 0x2ac   : > { %v1864_v49 = vpop.f32.mrf.mxu2  ;;  %v1893_v31 = vpop.f32.mrf.mxu3 }
 0x2ad   : > { %v1865_v55 = vadd.f32 %v3496_v51, %v1864_v49  ;;  %v1966_v45 = vpack.c.bf16 %v1950_v56, %v1950_v56  ;;  %v3145_v49 = vld [vmem:[#allocation8 + $0x60] sm:$0xf]  ;;  %v3158_v51 = vor.u32 %v3317_v12, %v3155_v20  ;;  %v3147_v56 = vld [vmem:[#allocation8 + $0x68] sm:$0xf0] }
 0x2af   : > { %v1894_v2 = vadd.f32 %v1893_v31, %v1865_v55  ;;  %v1925_v18 = vpop.f32.mrf.mxu0  ;;  %v2006_v6 = vunpack.c.l.b16 %v1966_v45  ;;  %v3316_v31 = vld [vmem:[#allocation8 + $0x64] sm:$0xf0]  ;;  %v3315_v55 = vld [vmem:[#allocation8 + $0x64] sm:$0xf]  ;;  %2399 = vmatpush.bf16.msrb.mxu1 %v3158_v51  ;;  %v3314_v45 = vld [vmem:[#allocation8 + $0x54] sm:$0xf0] }
 0x2b0   : > { %v1954_v13 = vpop.f32.mrf.mxu1 }
 0x2b1   : > { %v1923_v5 = vadd.f32 %v1922_v40, %v1894_v2  ;;  %v3318_v40 = vld [vmem:[#allocation8 + $0x74] sm:$0xf0]  ;;  %v3146_v2 = vor.u32 %v3316_v31, %v3145_v49 }
 0x2b3   : > { %v1952_v7 = vadd.f32 %v1951_v9, %v1923_v5  ;;  %v3154_v9 = vor.u32 %v3318_v40, %v3153_v8  ;;  %v3150_v5 = vor.u32 %v3315_v55, %v3147_v56 }
 0x2b4   : > { %v1867_v17 = vpop.f32.mrf.mxu2  ;;  %v1896_v22 = vpop.f32.mrf.mxu3 }
 0x2b5   : > { %v1967_v24 = vpack.c.bf16 %v1952_v7, %v1952_v7  ;;  %v1868_v42 = vadd.f32 %v3497_v46, %v1867_v17  ;;  %2370 = vmatpush.bf16.msrb.mxu0 %v3154_v9  ;;  %2400 = vmatpush.bf16.msrb.mxu1 %v3150_v5  ;;  %v3313_v7 = vld [vmem:[#allocation8 + $0x54] sm:$0xf]  ;;  %v3139_v17 = vld [vmem:[#allocation8 + $0x58] sm:$0xf0] }
 0x2b6   : > { %v3142_v46 = vor.u32 %v3313_v7, %v3139_v17  ;;  %v3326_v17 = vld [vmem:[%s4725_s5 + $0x38] sm:$0xff] }
 0x2b7   : > { %v2007_v54 = vunpack.c.l.b16 %v1967_v24  ;;  %v1897_v47 = vadd.f32 %v1896_v22, %v1868_v42  ;;  %v1927_v43 = vpop.f32.mrf.mxu0  ;;  %v3129_v22 = vld [vmem:[#allocation8 + $0x40] sm:$0xf]  ;;  %v3312_v24 = vld [vmem:[#allocation8 + $0x44] sm:$0xf0]  ;;  %v3311_v42 = vld [vmem:[#allocation8 + $0x44] sm:$0xf]  ;;  %2580 = vmatpush.bf16.msrb.mxu2 %v3326_v17 }
 0x2b8   : > { %v1956_v23 = vpop.f32.mrf.mxu1 }
 0x2b9   : > { %v2013_v16 = vpack.c.b16 %v2007_v54, %v2006_v6  ;;  %v1926_v21 = vadd.f32 %v1925_v18, %v1897_v47  ;;  %2371 = vmatpush.bf16.msrb.mxu0 %v3146_v2  ;;  %v3137_v18 = vld [vmem:[#allocation8 + $0x50] sm:$0xf]  ;;  %v3131_v6 = vld [vmem:[#allocation8 + $0x48] sm:$0xf0]  ;;  %v3130_v54 = vor.u32 %v3312_v24, %v3129_v22  ;;  %2401 = vmatpush.bf16.msrb.mxu1 %v3142_v46 }
 0x2ba   : > { %v3134_v47 = vor.u32 %v3311_v42, %v3131_v6  ;;  %v3334_v22 = vld [vmem:[%s4725_s5 + $0x78] sm:$0xff]  ;;  %v3325_v42 = vld [vmem:[%s4725_s5 + $0x30] sm:$0xff] }
 0x2bb   : > { %2196 = vmatmul.bf16.gmra.mxu3 %v2013_v16  ;;  %v1955_v28 = vadd.f32 %v1954_v13, %v1926_v21  ;;  %v3138_v13 = vor.u32 %v3314_v45, %v3137_v18  ;;  %v3121_v21 = vld [vmem:[#allocation8 + $0x30] sm:$0xf]  ;;  %v3333_v6 = vld [vmem:[%s4725_s5 + $0x70] sm:$0xff]  ;;  %2581 = vmatpush.bf16.msrb.mxu2 %v3325_v42 }
 0x2bc   : > { %v1869_v39 = vpop.f32.mrf.mxu2  ;;  %v1898_v15 = vpop.f32.mrf.mxu3  ;;  %2609 = vmatpush.bf16.msrb.mxu3 %v3334_v22 }
 0x2bd   : > { %v1870_v0 = vadd.f32 %v3498_v57, %v1869_v39  ;;  %v1968_v61 = vpack.c.bf16 %v1955_v28, %v1955_v28  ;;  %2372 = vmatpush.bf16.msrb.mxu0 %v3138_v13  ;;  %2402 = vmatpush.bf16.msrb.mxu1 %v3134_v47  ;;  %v3309_v39 = vld [vmem:[#allocation8 + $0x34] sm:$0xf]  ;;  %v3123_v57 = vld [vmem:[#allocation8 + $0x38] sm:$0xf0] }
 0x2be   : > { %v3126_v28 = vor.u32 %v3309_v39, %v3123_v57  ;;  %v3331_v57 = vld [vmem:[%s4725_s5 + $0x60] sm:$0xff] }
 0x2bf   : > { %v1899_v29 = vadd.f32 %v1898_v15, %v1870_v0  ;;  %v1930_v26 = vpop.f32.mrf.mxu0  ;;  %v2008_v48 = vunpack.c.l.b16 %v1968_v61  ;;  %v3113_v0 = vld [vmem:[#allocation8 + $0x20] sm:$0xf] }
 0x2c0   : > { %v1959_v53 = vpop.f32.mrf.mxu1  ;;  %2610 = vmatpush.bf16.msrb.mxu3 %v3333_v6 }
 0x2c1   : > { %v1928_v32 = vadd.f32 %v1927_v43, %v1899_v29  ;;  %2373 = vmatpush.bf16.msrb.mxu0 %v3130_v54  ;;  %v3310_v43 = vld [vmem:[#allocation8 + $0x34] sm:$0xf0]  ;;  %v3307_v29 = vld [vmem:[#allocation8 + $0x24] sm:$0xf]  ;;  %2403 = vmatpush.bf16.msrb.mxu1 %v3126_v28 }
 0x2c2   : > { %v3122_v15 = vor.u32 %v3310_v43, %v3121_v21  ;;  %v3324_v21 = vld [vmem:[%s4725_s5 + $0x28] sm:$0xff] }
 0x2c3   : > { %v1957_v37 = vadd.f32 %v1956_v23, %v1928_v32  ;;  %v3308_v23 = vld [vmem:[#allocation8 + $0x24] sm:$0xf0]  ;;  %v3115_v32 = vld [vmem:[#allocation8 + $0x28] sm:$0xf0]  ;;  %v3332_v43 = vld [vmem:[%s4725_s5 + $0x68] sm:$0xff]  ;;  %2582 = vmatpush.bf16.msrb.mxu2 %v3324_v21 }
 0x2c4   : > { %v1872_v1 = vpop.f32.mrf.mxu2  ;;  %v1901_v50 = vpop.f32.mrf.mxu3  ;;  %v3114_v61 = vor.u32 %v3308_v23, %v3113_v0  ;;  %2611 = vmatpush.bf16.msrb.mxu3 %v3332_v43 }
 0x2c5   : > { %v1969_v63 = vpack.c.bf16 %v1957_v37, %v1957_v37  ;;  %v1873_v38 = vadd.f32 %v3499_v10, %v1872_v1  ;;  %2374 = vmatpush.bf16.msrb.mxu0 %v3122_v15  ;;  %v3118_v37 = vor.u32 %v3307_v29, %v3115_v32  ;;  %v3105_v1 = vld [vmem:[#allocation8 + $0x10] sm:$0xf]  ;;  %v3107_v10 = vld [vmem:[#allocation8 + $0x18] sm:$0xf0] }
 0x2c6   : > { %v3323_v15 = vld [vmem:[%s4725_s5 + $0x20] sm:$0xff] }
 0x2c7   : > { %v2009_v33 = vunpack.c.l.b16 %v1969_v63  ;;  %v1902_v36 = vadd.f32 %v1901_v50, %v1873_v38  ;;  %v1932_v14 = vpop.f32.mrf.mxu0  ;;  %v3306_v50 = vld [vmem:[#allocation8 + $0x14] sm:$0xf0]  ;;  %v3305_v63 = vld [vmem:[#allocation8 + $0x14] sm:$0xf]  ;;  %2404 = vmatpush.bf16.msrb.mxu1 %v3118_v37  ;;  %2583 = vmatpush.bf16.msrb.mxu2 %v3323_v15 }
 0x2c8   : > { %v1961_v58 = vpop.f32.mrf.mxu1  ;;  %v3106_v38 = vor.u32 %v3306_v50, %v3105_v1  ;;  %2612 = vmatpush.bf16.msrb.mxu3 %v3331_v57 }
 0x2c9   : > { %v2014_v11 = vpack.c.b16 %v2009_v33, %v2008_v48  ;;  %v1931_v41 = vadd.f32 %v1930_v26, %v1902_v36  ;;  %2375 = vmatpush.bf16.msrb.mxu0 %v3114_v61  ;;  %v3110_v26 = vor.u32 %v3305_v63, %v3107_v10  ;;  %v3097_v48 = vld [vmem:[#allocation8] sm:$0xf]  ;;  %v3304_v33 = vld [vmem:[#allocation8 + $0x4] sm:$0xf0] }
 0x2cb   : > { %2201 = vmatmul.bf16.gmra.mxu3 %v2014_v11  ;;  %v1960_v59 = vadd.f32 %v1959_v53, %v1931_v41  ;;  %v3303_v53 = vld [vmem:[#allocation8 + $0x4] sm:$0xf]  ;;  %v3099_v11 = vld [vmem:[#allocation8 + $0x8] sm:$0xf0]  ;;  %v3098_v41 = vor.u32 %v3304_v33, %v3097_v48  ;;  %2405 = vmatpush.bf16.msrb.mxu1 %v3110_v26 }
 0x2cc   : > { %v1874_v25 = vpop.f32.mrf.mxu2  ;;  %v1903_v30 = vpop.f32.mrf.mxu3  ;;  %v3330_v26 = vld [vmem:[%s4725_s5 + $0x58] sm:$0xff]  ;;  %v3321_v48 = vld [vmem:[%s4725_s5 + $0x10] sm:$0xff] }
 0x2cd   : > { %v1875_v4 = vadd.f32 %v3500_v44, %v1874_v25  ;;  %v1970_v27 = vpack.c.bf16 %v1960_v59, %v1960_v59  ;;  %2376 = vmatpush.bf16.msrb.mxu0 %v3106_v38  ;;  %v3102_v25 = vor.u32 %v3303_v53, %v3099_v11  ;;  %v3322_v38 = vld [vmem:[%s4725_s5 + $0x18] sm:$0xff]  ;;  %2613 = vmatpush.bf16.msrb.mxu3 %v3330_v26  ;;  %v3329_v33 = vld [vmem:[%s4725_s5 + $0x50] sm:$0xff]  ;;  %v3328_v53 = vld [vmem:[%s4725_s5 + $0x48] sm:$0xff] }
 0x2ce   : > { %2584 = vmatpush.bf16.msrb.mxu2 %v3322_v38  ;;  %v3319_v11 = vld [vmem:[%s4725_s5] sm:$0xff] }
 0x2cf   : > { %v1904_v34 = vadd.f32 %v1903_v30, %v1875_v4  ;;  %v2010_v19 = vunpack.c.l.b16 %v1970_v27  ;;  %2406 = vmatpush.bf16.msrb.mxu1 %v3102_v25  ;;  %v3491_v4 = vld [vmem:[#allocation7 + $0x1] ss:$0 sm:$0xff]  ;;  %v2260_v25 = vld [vmem:[%s403_s10] sm:$0x3] }
 0x2d1   : > { %v1933_v35 = vadd.f32 %v1932_v14, %v1904_v34  ;;  %2377 = vmatpush.bf16.msrb.mxu0 %v3098_v41  ;;  %2614 = vmatpush.bf16.msrb.mxu3 %v3329_v33  ;;  %v3327_v41 = vld [vmem:[%s4725_s5 + $0x40] sm:$0xff] }
 0x2d2   : > { %2585 = vmatpush.bf16.msrb.mxu2 %v3321_v48 }
 0x2d3   : > { %v1962_v60 = vadd.f32 %v1961_v58, %v1933_v35 }
 0x2d4   : > { %v2163_v16 = vpop.f32.mrf.mxu2 }
 0x2d5   : > { %v1971_v52 = vpack.c.bf16 %v1962_v60, %v1962_v60  ;;  %v2164_v59 = vadd.f32 %v3491_v4, %v2163_v16  ;;  %2615 = vmatpush.bf16.msrb.mxu3 %v3328_v53 }
 0x2d7   : > { %v2011_v3 = vunpack.c.l.b16 %v1971_v52 }
 0x2d9   : > { %v2015_v62 = vpack.c.b16 %v2011_v3, %v2010_v19  ;;  %2616 = vmatpush.bf16.msrb.mxu3 %v3327_v41 }
 0x2db   : > { %2206 = vmatmul.bf16.gmra.mxu3 %v2015_v62 }
 0x2dc   : > { %v2165_v36 = vpop.f32.mrf.mxu2 }
 0x2dd   : > { %v2166_v34 = vadd.f32 %v3491_v4, %v2165_v36  ;;  %v3320_v36 = vld [vmem:[%s4725_s5 + $0x8] sm:$0xff] }
 0x2de   : > { %2586 = vmatpush.bf16.msrb.mxu2 %v3320_v36 }
 0x2e2   : > { %2587 = vmatpush.bf16.msrb.mxu2 %v3319_v11 }
 0x2e4   : > { %v2168_v30 = vpop.f32.mrf.mxu2 }
 0x2e5   : > { %v2169_v62 = vadd.f32 %v3491_v4, %v2168_v30  ;;  %v2262_v30 = vperm.slane %v2260_v25, 0 }
 0x2ec   : > { %v2170_v52 = vpop.f32.mrf.mxu2 }
 0x2ed   : > { %v2171_v12 = vadd.f32 %v3491_v4, %v2170_v52 }
 0x2f4   : > { %v2173_v8 = vpop.f32.mrf.mxu2 }
 0x2f5   : > { %v2174_v5 = vadd.f32 %v3491_v4, %v2173_v8 }
 0x2fc   : > { %v2175_v56 = vpop.f32.mrf.mxu2 }
 0x2fd   : > { %v2176_v45 = vadd.f32 %v3491_v4, %v2175_v56 }
 0x304   : > { %v2178_v46 = vpop.f32.mrf.mxu2 }
 0x305   : > { %v2179_v23 = vadd.f32 %v3491_v4, %v2178_v46 }
 0x30c   : > { %v2180_v0 = vpop.f32.mrf.mxu2 }
 0x30d   : > { %v2181_v29 = vadd.f32 %v3491_v4, %v2180_v0 }
 0x32e   : > { %v2192_v44 = vpop.f32.mrf.mxu3 }
 0x32f   : > { %v2193_v14 = vadd.f32 %v2192_v44, %v2164_v59  ;;  %v2263_v59 = vperm.slane %v2260_v25, 1 }
 0x331   : > { %v2212_v27 = vmax.f32 %v2193_v14, 0.0 }
 0x336   : > { %v2194_v35 = vpop.f32.mrf.mxu3 }
 0x337   : > { %v2195_v58 = vadd.f32 %v2194_v35, %v2166_v34 }
 0x339   : > { %v2213_v60 = vmax.f32 %v2195_v58, 0.0 }
 0x33b   : > { %v3378_v19 = vpack.c.bf16 %v2213_v60, %v2212_v27 }
 0x33d   : > { %3379 = vst [vmem:[#allocation2] sm:$0xff] %v3378_v19  }
 0x33e   : > { %v2197_v3 = vpop.f32.mrf.mxu3 }
 0x33f   : > { %v2198_v9 = vadd.f32 %v2197_v3, %v2169_v62 }
 0x341   : > { %v2214_v31 = vmax.f32 %v2198_v9, 0.0 }
 0x344   : > { %v3299_v40 = vld [vmem:[#allocation2] sm:$0xff] }
 0x345   : > { %2378 = vmatmul.bf16.vlgmr.msrb.gmra.mxu0 %v3299_v40  ;;  %2407 = vmatmul.bf16.vlgmr.msrb.gmra.mxu1 %v3299_v40 }
 0x346   : > { %v2199_v20 = vpop.f32.mrf.mxu3 }
 0x347   : > { %v2200_v49 = vadd.f32 %v2199_v20, %v2171_v12 }
 0x349   : > { %v2215_v51 = vmax.f32 %v2200_v49, 0.0 }
 0x34b   : > { %v3383_v55 = vpack.c.bf16 %v2215_v51, %v2214_v31 }
 0x34d   : > { %3401 = vst [vmem:[#allocation2 + $0x8] sm:$0xff] %v3383_v55  }
 0x34e   : > { %v2202_v2 = vpop.f32.mrf.mxu3 }
 0x34f   : > { %v2203_v7 = vadd.f32 %v2202_v2, %v2174_v5 }
 0x351   : > { %v2216_v54 = vmax.f32 %v2203_v7, 0.0 }
 0x354   : > { %v3300_v18 = vld [vmem:[#allocation2 + $0x8] sm:$0xff] }
 0x355   : > { %2383 = vmatmul.bf16.gmra.mxu0 %v3300_v18  ;;  %2412 = vmatmul.bf16.gmra.mxu1 %v3300_v18 }
 0x356   : > { %v2204_v13 = vpop.f32.mrf.mxu3 }
 0x357   : > { %v2205_v24 = vadd.f32 %v2204_v13, %v2176_v45 }
 0x359   : > { %v2217_v47 = vmax.f32 %v2205_v24, 0.0 }
 0x35b   : > { %v3388_v16 = vpack.c.bf16 %v2217_v47, %v2216_v54 }
 0x35d   : > { %3402 = vst [vmem:[#allocation2 + $0x10] sm:$0xff] %v3388_v16  }
 0x35e   : > { %v2207_v39 = vpop.f32.mrf.mxu3 }
 0x35f   : > { %v2208_v32 = vadd.f32 %v2207_v39, %v2179_v23 }
 0x361   : > { %v2218_v1 = vmax.f32 %v2208_v32, 0.0 }
 0x364   : > { %v3301_v28 = vld [vmem:[#allocation2 + $0x10] sm:$0xff] }
 0x365   : > { %2388 = vmatmul.bf16.gmra.mxu0 %v3301_v28  ;;  %2417 = vmatmul.bf16.gmra.mxu1 %v3301_v28 }
 0x366   : > { %v2209_v61 = vpop.f32.mrf.mxu3 }
 0x367   : > { %v2210_v37 = vadd.f32 %v2209_v61, %v2181_v29 }
 0x369   : > { %v2219_v50 = vmax.f32 %v2210_v37, 0.0 }
 0x36b   : > { %v3393_v63 = vpack.c.bf16 %v2219_v50, %v2218_v1 }
 0x36d   : > { %3403 = vst [vmem:[#allocation2 + $0x18] sm:$0xff] %v3393_v63  }
 0x374   : > { %v3302_v10 = vld [vmem:[#allocation2 + $0x18] sm:$0xff] }
 0x375   : > { %2393 = vmatmul.bf16.gmra.mxu0 %v3302_v10  ;;  %2422 = vmatmul.bf16.gmra.mxu1 %v3302_v10 }
 0x3c2   : > { %v2379_v44 = vpop.f32.mrf.mxu0  ;;  %v2408_v4 = vpop.f32.mrf.mxu1 }
 0x3c3   : > { %v2380_v34 = vadd.f32 %v2379_v44, %v2262_v30  ;;  %v2409_v14 = vadd.f32 %v2408_v4, %v2263_v59 }
 0x3c5   : > { %v2428_v52 = vmax.f32 %v2380_v34, 0.0  ;;  %v2429_v19 = vmax.f32 %v2409_v14, 0.0 }
 0x3ca   : > { %v2381_v35 = vpop.f32.mrf.mxu0  ;;  %v2410_v58 = vpop.f32.mrf.mxu1 }
 0x3cb   : > { %v2382_v27 = vadd.f32 %v2381_v35, %v2262_v30  ;;  %v2411_v60 = vadd.f32 %v2410_v58, %v2263_v59 }
 0x3cd   : > { %v2430_v3 = vmax.f32 %v2382_v27, 0.0  ;;  %v2431_v62 = vmax.f32 %v2411_v60, 0.0 }
 0x3cf   : > { %v2444_v8 = vpack.c.bf16 %v2430_v3, %v2428_v52  ;;  %v2445_v40 = vpack.c.bf16 %v2431_v62, %v2429_v19 }
 0x3d1   : > { %2588 = vmatmul.bf16.vlgmr.msrb.gmra.mxu2 %v2444_v8  ;;  %2617 = vmatmul.bf16.vlgmr.msrb.gmra.mxu3 %v2445_v40 }
 0x3d2   : > { %v2384_v12 = vpop.f32.mrf.mxu0  ;;  %v2413_v9 = vpop.f32.mrf.mxu1 }
 0x3d3   : > { %v2385_v20 = vadd.f32 %v2384_v12, %v2262_v30  ;;  %v2414_v49 = vadd.f32 %v2413_v9, %v2263_v59 }
 0x3d5   : > { %v2432_v2 = vmax.f32 %v2385_v20, 0.0  ;;  %v2433_v5 = vmax.f32 %v2414_v49, 0.0 }
 0x3da   : > { %v2386_v31 = vpop.f32.mrf.mxu0  ;;  %v2415_v51 = vpop.f32.mrf.mxu1 }
 0x3db   : > { %v2387_v55 = vadd.f32 %v2386_v31, %v2262_v30  ;;  %v2416_v56 = vadd.f32 %v2415_v51, %v2263_v59 }
 0x3dd   : > { %v2434_v18 = vmax.f32 %v2387_v55, 0.0  ;;  %v2435_v45 = vmax.f32 %v2416_v56, 0.0 }
 0x3df   : > { %v2446_v7 = vpack.c.bf16 %v2434_v18, %v2432_v2  ;;  %v2447_v13 = vpack.c.bf16 %v2435_v45, %v2433_v5 }
 0x3e1   : > { %2593 = vmatmul.bf16.gmra.mxu2 %v2446_v7  ;;  %2622 = vmatmul.bf16.gmra.mxu3 %v2447_v13 }
 0x3e2   : > { %v2389_v17 = vpop.f32.mrf.mxu0  ;;  %v2418_v22 = vpop.f32.mrf.mxu1 }
 0x3e3   : > { %v2390_v24 = vadd.f32 %v2389_v17, %v2262_v30  ;;  %v2419_v46 = vadd.f32 %v2418_v22, %v2263_v59 }
 0x3e5   : > { %v2436_v16 = vmax.f32 %v2390_v24, 0.0  ;;  %v2437_v21 = vmax.f32 %v2419_v46, 0.0 }
 0x3ea   : > { %v2391_v42 = vpop.f32.mrf.mxu0  ;;  %v2420_v6 = vpop.f32.mrf.mxu1 }
 0x3eb   : > { %v2392_v54 = vadd.f32 %v2391_v42, %v2262_v30  ;;  %v2421_v47 = vadd.f32 %v2420_v6, %v2263_v59 }
 0x3ed   : > { %v2438_v43 = vmax.f32 %v2392_v54, 0.0  ;;  %v2439_v39 = vmax.f32 %v2421_v47, 0.0 }
 0x3ef   : > { %v2448_v15 = vpack.c.bf16 %v2438_v43, %v2436_v16  ;;  %v2449_v57 = vpack.c.bf16 %v2439_v39, %v2437_v21 }
 0x3f1   : > { %2598 = vmatmul.bf16.gmra.mxu2 %v2448_v15  ;;  %2627 = vmatmul.bf16.gmra.mxu3 %v2449_v57 }
 0x3f2   : > { %v2394_v0 = vpop.f32.mrf.mxu0  ;;  %v2423_v23 = vpop.f32.mrf.mxu1 }
 0x3f3   : > { %v2395_v28 = vadd.f32 %v2394_v0, %v2262_v30  ;;  %v2424_v29 = vadd.f32 %v2423_v23, %v2263_v59 }
 0x3f5   : > { %v2440_v50 = vmax.f32 %v2395_v28, 0.0  ;;  %v2441_v63 = vmax.f32 %v2424_v29, 0.0 }
 0x3fa   : > { %v2396_v32 = vpop.f32.mrf.mxu0  ;;  %v2425_v61 = vpop.f32.mrf.mxu1 }
 0x3fb   : > { %v2397_v37 = vadd.f32 %v2396_v32, %v2262_v30  ;;  %v2426_v1 = vadd.f32 %v2425_v61, %v2263_v59 }
 0x3fd   : > { %v2442_v10 = vmax.f32 %v2397_v37, 0.0  ;;  %v2443_v38 = vmax.f32 %v2426_v1, 0.0 }
 0x3ff   : > { %v2450_v26 = vpack.c.bf16 %v2442_v10, %v2440_v50  ;;  %v2451_v48 = vpack.c.bf16 %v2443_v38, %v2441_v63 }
 0x401   : > { %2603 = vmatmul.bf16.gmra.mxu2 %v2450_v26  ;;  %2632 = vmatmul.bf16.gmra.mxu3 %v2451_v48 }
 0x454   : > { %v2589_v33 = vpop.f32.mrf.mxu2  ;;  %v2618_v36 = vpop.f32.mrf.mxu3 }
 0x455   : > { %v2619_v53 = vadd.f32 %v2618_v36, %v2589_v33 }
 0x457   : > { %2639 = vst.msk [vmem:[%s4689_s26] sm:$0xff] %vm2638_vm4, %v2619_v53 }
 0x45c   : > { %v2591_v11 = vpop.f32.mrf.mxu2  ;;  %v2620_v41 = vpop.f32.mrf.mxu3 }
 0x45d   : > { %v2621_v25 = vadd.f32 %v2620_v41, %v2591_v11 }
 0x45f   : > { %2640 = vst.msk [vmem:[%s4689_s26 + $0x8] sm:$0xff] %vm2638_vm4, %v2621_v25 }
 0x464   : > { %v2594_v44 = vpop.f32.mrf.mxu2  ;;  %v2623_v4 = vpop.f32.mrf.mxu3 }
 0x465   : > { %v2624_v30 = vadd.f32 %v2623_v4, %v2594_v44 }
 0x467   : > { %2641 = vst.msk [vmem:[%s4689_s26 + $0x10] sm:$0xff] %vm2638_vm4, %v2624_v30 }
 0x46c   : > { %v2596_v59 = vpop.f32.mrf.mxu2  ;;  %v2625_v34 = vpop.f32.mrf.mxu3 }
 0x46d   : > { %v2626_v14 = vadd.f32 %v2625_v34, %v2596_v59 }
 0x46f   : > { %2642 = vst.msk [vmem:[%s4689_s26 + $0x18] sm:$0xff] %vm2638_vm4, %v2626_v14 }
 0x474   : > { %v2599_v35 = vpop.f32.mrf.mxu2  ;;  %v2628_v58 = vpop.f32.mrf.mxu3 }
 0x475   : > { %v2629_v27 = vadd.f32 %v2628_v58, %v2599_v35 }
 0x477   : > { %2643 = vst.msk [vmem:[%s4689_s26 + $0x20] sm:$0xff] %vm2638_vm4, %v2629_v27 }
 0x47c   : > { %v2601_v60 = vpop.f32.mrf.mxu2  ;;  %v2630_v52 = vpop.f32.mrf.mxu3 }
 0x47d   : > { %v2631_v19 = vadd.f32 %v2630_v52, %v2601_v60 }
 0x47f   : > { %2644 = vst.msk [vmem:[%s4689_s26 + $0x28] sm:$0xff] %vm2638_vm4, %v2631_v19 }
 0x484   : > { %v2604_v3 = vpop.f32.mrf.mxu2  ;;  %v2633_v62 = vpop.f32.mrf.mxu3 }
 0x485   : > { %v2634_v8 = vadd.f32 %v2633_v62, %v2604_v3 }
 0x487   : > { %2645 = vst.msk [vmem:[%s4689_s26 + $0x30] sm:$0xff] %vm2638_vm4, %v2634_v8 }
 0x48c   : > { %v2606_v40 = vpop.f32.mrf.mxu2  ;;  %v2635_v12 = vpop.f32.mrf.mxu3 }
 0x48d   : > { %v2636_v9 = vadd.f32 %v2635_v12, %v2606_v40 }
 0x48f   : > { %2646 = vst.msk [vmem:[%s4689_s26 + $0x38] sm:$0xff] %vm2638_vm4, %v2636_v9 }
 0x490 PF: > { %s4796_s9 = smov %s3830_s27  ;;  %p18_p4 = scmp.ge.s32.totalorder %s3821_s24, 4  }
 0x491   : > { %s4797_s27 = smov %s3689_s28  ;;  %s4798_s28 = smov %s3693_s29 }
 0x492   : > { %s4799_s29 = smov %s4796_s9  ;;  %s4800_s30 = smov %s3821_s24 }
 0x493   :  { %20 = sbr.rel (!%p18_p4) target bundleno = 4 (0x4), region = 113 }
 0x498   :  { %2668 = vsyncpa [#allocation4], 1 }
 0x499   :  { %2670 = vsyncpa [#allocation4 + $0x1], 1 }
 0x49a   :  { %2671 = vsyncpa [#allocation6], 1 }
 0x49b   :  { %2672 = vsyncpa [#allocation9], 1 }

// kernel: tpu_custom_call.1
= control target key start
LH: loop header
LB: loop body
LE: loop exit
PB: predicated region body
PF: predicated region fallthrough
CT: control target
= control target key end

     0   :  { %13 = vsyncpa [#allocation4], 0  ;;  %s4720_s0 = inlined_call_operand.vmem [shape: bf16[64,512], index: 0, kind: input, shape index: {}]   ;;  %s4721_s1 = inlined_call_operand.hbm [shape: bf16[2,8,128], index: 1, kind: input, shape index: {}]   ;;  %s4722_s2 = inlined_call_operand.hbm [shape: bf16[2,256,128], index: 2, kind: input, shape index: {}]   ;;  %s4723_s3 = inlined_call_operand.hbm [shape: f32[2,1,128], index: 3, kind: input, shape index: {}]   ;;  %s4724_s4 = inlined_call_operand.hbm [shape: bf16[128,256], index: 4, kind: input, shape index: {}]   ;;  %s4725_s5 = inlined_call_operand.vmem [shape: bf16[256,4], index: 5, kind: input, shape index: {}]   ;;  %s4726_s6 = inlined_call_operand.hbm [shape: f32[2,64,128], index: 6, kind: input, shape index: {}]   ;;  %s4727_s7 = inlined_call_operand.vmem [shape: f32[2,1,256], index: 7, kind: input, shape index: {}]   ;;  %s4728_s8 = inlined_call_operand.vmem [shape: f32[2,64,4], index: 8, kind: output, shape index: {}]  }
   0x1   :  { %14 = vsyncpa [#allocation6], 0 }
   0x2   :  { %15 = vsyncpa [#allocation9], 0  ;;  %s3754_s27 = smov 0   ;;  %s3756_s28 = smov 0  }
   0x3   :  { %s3758_s29 = smov 0   ;;  %s3760_s30 = smov 0  }
   0x4 LB: > { %s3773_s9 = sadd.s32 4294967295, %s3697_s30   ;;  %p167_p0 = scmp.ne.s32.totalorder %s3689_s28, %s3685_s27  ;;  %s3697_s30 = sphi %s3760_s30, %s4800_s30   ;;  %s3693_s29 = sphi %s3758_s29, %s4799_s29   ;;  %s3689_s28 = sphi %s3756_s28, %s4798_s28   ;;  %s3685_s27 = sphi %s3754_s27, %s4797_s27  }
   0x5   : > { %p168_p1 = scmp.eq.s32.totalorder %s3773_s9, 0  ;;  %p2765_p2 = scmp.ge.s32.totalorder %s3697_s30, 1 }
   0x6   : > { %p230_p3 = scmp.lt.s32.totalorder %s3697_s30, 3  ;;  %s244_s13 = sshll.u32 %s4721_s1, 4  ;;  %s245_s13 = int_to_ptr.hbm [resolvable:$true] %s244_s13 }
   0x7   : > { %p3781_p4 = por %p168_p1, %p167_p0  ;;  %s3699_s15 = smov [#allocation3]  }
   0x8   : > { %p3788_p5 = pnand %p2765_p2, %p230_p3  ;;  %s246_s16 = sshll.u32 %s3699_s15, 4  ;;  %s247_s16 = int_to_ptr.vmem [resolvable:$true] %s246_s16 }
   0x9   : > { %s258_s20 = sshll.u32 %s4722_s2, 4  ;;  %s3700_s21 = smov 64   ;;  %s259_s20 = int_to_ptr.hbm [resolvable:$true] %s258_s20 }
   0xa   : > { %p3422_p6 = pneg %p3788_p5  ;;  %s3701_s22 = smov 4  }
   0xb   : > { %s3702_s23 = smov [#allocation5]   ;;  %s272_s27 = sshll.u32 %s4723_s3, 4  ;;  %s273_s27 = int_to_ptr.hbm [resolvable:$true] %s272_s27 }
   0xc   : > { %p3796_p7 = pnand %p3422_p6, %p168_p1  ;;  %s260_s24 = sshll.u32 %s3702_s23, 4  ;;  %s261_s24 = int_to_ptr.vmem [resolvable:$true] %s260_s24 }
   0xd   : > { %s3703_s11 = smov [#allocation7]   ;;  %s3705_s19 = smov 1  }
   0xe   : > { %3425 = dma.hbm_to_vmem [thread:$0]  (!%p3796_p7), %s245_s13, 128, %s247_s16, [#allocation4], %s3700_s21, %s3700_s21, %s3701_s22  }
   0xf   : > { %3428 = dma.hbm_to_vmem [thread:$0]  (!%p3796_p7), %s259_s20, 4096, %s261_s24, [#allocation6], %s3700_s21, %s3700_s21, %s3701_s22  }
  0x10   : > { %s274_s12 = sshll.u32 %s3703_s11, 4  ;;  %s286_s13 = sshll.u32 %s4724_s4, 4  ;;  %s275_s12 = int_to_ptr.vmem [resolvable:$true] %s274_s12  ;;  %s287_s13 = int_to_ptr.hbm [resolvable:$true] %s286_s13 }
  0x11   : > { %s3704_s16 = smov 16   ;;  %s3706_s20 = smov [#allocation8]  }
  0x12   : > { %3431 = dma.hbm_to_vmem [thread:$0]  (!%p3796_p7), %s273_s27, 32, %s275_s12, [#allocation6], %s3704_s16, %s3704_s16, %s3705_s19  }
  0x13   : > { %s288_s21 = sshll.u32 %s3706_s20, 4  ;;  %s4729_s22 = smov 128   ;;  %s289_s21 = int_to_ptr.vmem [resolvable:$true] %s288_s21 }
  0x14   : > { %s4730_s23 = smov 8   ;;  %s3821_s24 = sadd.s32 1, %s3697_s30  }
  0x15   : > { %3434 = dma.hbm_to_vmem [thread:$0]  (!%p3796_p7), %s287_s13, 2048, %s289_s21, [#allocation9], %s4729_s22, %s4729_s22, %s4730_s23  }
  0x16   : > { %s151_s25 = ssub.s32 %s3697_s30, %s3821_s24  ;;  %s154_s26 = sadd.s32 1, %s3693_s29 }
  0x17   : > { %p152_p8 = scmp.eq.s32.totalorder %s151_s25, 0  ;;  %p161_p9 = scmp.ne.s32.totalorder %s3693_s29, %s3689_s28 }
  0x18   : > { %p162_p10 = scmp.eq.s32.totalorder %s3697_s30, 0  ;;  %p3443_p12 = scmp.lt.s32.totalorder %s3697_s30, 2 }
  0x19   : > { %s3830_s27 = scalar_select %p152_p8, %s3693_s29, %s154_s26  }
  0x1a   : > { %p163_p11 = por %p162_p10, %p161_p9  ;;  %s305_s11 = sand.u32 1, %s3697_s30  }
  0x1b   : > { %s307_s12 = sand.u32 1, %s3693_s29   ;;  %s3225_s17 = sshll.u32 %s3697_s30, 6 }
  0x1c   : > { %s2771_s15 = sshll.u32 %s307_s12, 6  ;;  %s314_s13 = scalar_lea.hbm %s4726_s6, %s3225_s17 }
  0x1d   : > { %s309_s19 = scalar_lea.vmem [#allocation10], %s2771_s15  ;;  %s315_s21 = sshll.u32 %s314_s13, 4  ;;  %s316_s21 = int_to_ptr.hbm [resolvable:$true] %s315_s21 }
  0x1e   : > { %s317_s20 = sshll.u32 %s309_s19, 4  ;;  %p3839_p13 = pnand %p3443_p12, %p163_p11  ;;  %s318_s20 = int_to_ptr.vmem [resolvable:$true] %s317_s20 }
  0x1f   : > { %s306_s26 = scalar_lea.sflag [#allocation4], %s305_s11  ;;  %s3621_s22 = sshra.s32 %s316_s21, 4  ;;  %s3622_s22 = int_to_ptr.hbm [resolvable:$true] %s3621_s22 }
  0x20   : > { %s3623_s23 = scalar_lea.hbm %s3622_s22, 64  ;;  %p3625_p2 = pneg %p3839_p13 }
  0x21   : > { %p3624_p0 = scmp.ne.s32.totalorder %s3622_s22, %s3623_s23  ;;  %s3628_s15 = scalar_lea.hbm %s4726_s6, 128 }
  0x22   : > { %p3629_p7 = scmp.lt.s32.totalorder %s3622_s22, %s4726_s6  ;;  %p3630_p8 = scmp.lt.s32.totalorder %s3628_s15, %s3623_s23 }
  0x23   : > { %p3626_p3 = pnand %p3625_p2, %p3624_p0 }
  0x24   : > { %p3631_p9 = por %p3630_p8, %p3629_p7 }
  0x25   : > { %p3627_p6 = pneg %p3626_p3 }
  0x27   : > { %p3632_p10 = pnand %p3631_p9, %p3627_p6 }
  0x29   : > { %3635 = shalt.err (!%p3632_p10)
}
  0x2a   : > { %s4753_s11 = smov 8   ;;  %s4754_s16 = smov 128  }
  0x2b   : > { %3438 = dma.hbm_to_vmem [thread:$0]  (!%p3839_p13), %s316_s21, 1024, %s318_s20, %s306_s26, %s4754_s16, %s4754_s16, %s4753_s11  }
  0x2c   : > { %336 = sbr.rel (%p3788_p5) target bundleno = 1168 (0x490), region = 52 }
  0x31   : > { %3668 = dma.done.wait (%p168_p1), [#allocation4], 128  }
  0x32   : > { %3670 = vsyncadd (%p168_p1), [#allocation4], 4294967168 }
  0x33   : > { %3672 = dma.done.wait (%p168_p1), [#allocation6], 4128  }
  0x34   : > { %3674 = vsyncadd (%p168_p1), [#allocation6], 4294963168 }
  0x35   : > { %3676 = dma.done.wait (%p168_p1), [#allocation9], 2048  }
  0x36   : > { %3678 = vsyncadd (%p168_p1), [#allocation9], 4294965248  ;;  %s358_s14 = sand.u32 1, %s3773_s9   ;;  %s360_s22 = sand.u32 1, %s3689_s28  }
  0x37   : > { %s2779_s23 = sshll.u32 %s360_s22, 6  ;;  %s359_s13 = scalar_lea.sflag [#allocation4], %s358_s14 }
  0x38   : > { %s3872_s19 = scalar_lea.vmem [#allocation10], %s2779_s23 }
  0x39   : > { %3680 = dma.done.wait (%p3781_p4), %s359_s13, 1024  }
  0x3a   : > { %3682 = vsyncadd (%p3781_p4), %s359_s13, 4294966272  ;;  %vm444_vm0 = vcmask 1040384   ;;  %vm449_vm1 = vcmask 1041409   ;;  %v3879_v0 = vld [vmem:[%s3872_s19 + $0x30] sm:$0xff]  ;;  %v416_v1 = vld [vmem:[%s3872_s19 + $0x38] sm:$0xff]  ;;  %vm453_vm2 = vcmask 1042434  }
  0x3b   : > { %v441_v2 = vld [vmem:[#allocation3] sm:$0xf]  ;;  %vm457_vm3 = vcmask 1043459   ;;  %v3353_v3 = vpack.c.bf16 %v416_v1, %v3879_v0  ;;  %v3884_v5 = vld [vmem:[%s3872_s19 + $0x20] sm:$0xff]  ;;  %v3887_v6 = vld [vmem:[%s3872_s19 + $0x28] sm:$0xff]  ;;  %p400_p1 = scmp.lt.s32.totalorder %s3773_s9, 1 }
  0x3c   : > { %v443_v4 = vrot.slane %v441_v2, 3  ;;  %v3348_v7 = vpack.c.bf16 %v3887_v6, %v3884_v5  ;;  %v3892_v8 = vld [vmem:[%s3872_s19 + $0x10] sm:$0xff]  ;;  %v3895_v9 = vld [vmem:[%s3872_s19 + $0x18] sm:$0xff]  ;;  %v3902_v17 = vld [vmem:[%s3872_s19] sm:$0xff]  ;;  %vm2638_vm4 = vcmask 31744  }
  0x3d   : > { %3397 = vst [vmem:[#allocation2 + $0x18] sm:$0xff] %v3353_v3   ;;  %v3905_v18 = vld [vmem:[%s3872_s19 + $0x8] sm:$0xff]  ;;  %v3343_v20 = vpack.c.bf16 %v3895_v9, %v3892_v8  ;;  %s4802_s9 = smov (!%p400_p1, %s3773_s9), 1 }
  0x3e   : > { %v447_v10 = vsel %vm444_vm0, %v441_v2, %v443_v4  ;;  %v450_v11 = vsel %vm449_vm1, %v441_v2, %v443_v4  ;;  %v454_v12 = vsel %vm453_vm2, %v441_v2, %v443_v4  ;;  %v458_v13 = vsel %vm457_vm3, %v441_v2, %v443_v4  ;;  %3396 = vst [vmem:[#allocation2 + $0x10] sm:$0xff] %v3348_v7   ;;  %s2780_s23 = sshll.u32 %s4802_s9, 1  ;;  %s3226_s20 = sshll.u32 %s4802_s9, 6 }
  0x3f   : > { %v462_v14 = vunpack.i.h.s16 %v447_v10  ;;  %v452_v15 = vrot.slane %v450_v11, 1  ;;  %v456_v16 = vrot.slane %v454_v12, 2  ;;  %v3907_v19 = vrot.slane %v458_v13, 3  ;;  %3395 = vst [vmem:[#allocation2 + $0x8] sm:$0xff] %v3343_v20   ;;  %s403_s10 = scalar_lea.vmem %s4727_s7, %s2780_s23  ;;  %s4689_s26 = scalar_lea.vmem %s4728_s8, %s3226_s20 }
  0x40   : > { %v3338_v25 = vpack.c.bf16 %v3905_v18, %v3902_v17  ;;  %v2783_v26 = vpack.i.b16 %v447_v10, %v447_v10 }
  0x41   : > { %v470_v21 = vpack.i.b16 %v462_v14, %v462_v14  ;;  %v464_v22 = vunpack.i.h.s16 %v452_v15  ;;  %v466_v23 = vunpack.i.h.s16 %v456_v16  ;;  %v468_v24 = vunpack.i.h.s16 %v3907_v19 }
  0x42   : > { %v2784_v27 = vpack.i.b16 %v452_v15, %v452_v15  ;;  %v2785_v31 = vpack.i.b16 %v456_v16, %v456_v16  ;;  %3339 = vst [vmem:[#allocation2] sm:$0xff] %v3338_v25   ;;  %v477_v33 = vperm.slane %v2783_v26, 0  ;;  %v2786_v35 = vpack.i.b16 %v3907_v19, %v3907_v19 }
  0x43   : > { %v478_v28 = vperm.slane %v470_v21, 0  ;;  %v472_v29 = vpack.i.b16 %v464_v22, %v464_v22  ;;  %v474_v30 = vpack.i.b16 %v466_v23, %v466_v23  ;;  %v476_v32 = vpack.i.b16 %v468_v24, %v468_v24 }
  0x44   : > { %v3914_v34 = vperm.slane %v2784_v27, 0  ;;  %v439_v36 = vld [vmem:[#allocation2 + $0x18] sm:$0xff]   ;;  %v3918_v40 = vperm.slane %v2785_v31, 0  ;;  %v486_v45 = vpack.i.b16 %v477_v33, %v477_v33 }
  0x45   : > { %v490_v37 = vpack.i.b16 %v478_v28, %v478_v28  ;;  %v480_v38 = vperm.slane %v472_v29, 0  ;;  %v482_v39 = vperm.slane %v474_v30, 0  ;;  %v3920_v41 = vunpack.c.l.bf16 %v439_v36  ;;  %v437_v44 = vld [vmem:[#allocation2 + $0x10] sm:$0xff]  }
  0x46   : > { %v3922_v42 = vunpack.c.h.bf16 %v439_v36  ;;  %v484_v43 = vperm.slane %v476_v32, 0  ;;  %v3924_v49 = vunpack.c.l.bf16 %v437_v44  ;;  %v3926_v51 = vunpack.c.h.bf16 %v437_v44  ;;  %v435_v57 = vld [vmem:[#allocation2 + $0x8] sm:$0xff]  }
  0x47   : > { %v492_v46 = vperm.slane %v490_v37, 0  ;;  %v498_v47 = vpack.i.b16 %v480_v38, %v480_v38  ;;  %v506_v48 = vpack.i.b16 %v482_v39, %v482_v39  ;;  %v488_v52 = vperm.slane %v486_v45, 0 }
  0x48   : > { %v514_v50 = vpack.i.b16 %v484_v43, %v484_v43  ;;  %v494_v53 = vpack.i.b16 %v3914_v34, %v3914_v34  ;;  %v502_v58 = vpack.i.b16 %v3918_v40, %v3918_v40  ;;  %v3934_v60 = vunpack.c.l.bf16 %v435_v57 }
  0x49   : > { %v3930_v54 = vunpack.c.l.bf16 %v492_v46  ;;  %v500_v55 = vperm.slane %v498_v47, 0  ;;  %v508_v56 = vperm.slane %v506_v48, 0  ;;  %v3936_v61 = vunpack.c.h.bf16 %v435_v57  ;;  %v433_v48 = vld [vmem:[#allocation2] sm:$0xff]  }
  0x4a   : > { %v516_v59 = vperm.slane %v514_v50, 0  ;;  %v3938_v62 = vunpack.c.l.bf16 %v488_v52 }
  0x4b   : > { %v547_v63 = vmul.f32 %v3930_v54, %v3920_v41  ;;  %v548_v1 = vmul.f32 %v3930_v54, %v3922_v42  ;;  %v3944_v2 = vunpack.c.l.bf16 %v500_v55  ;;  %v3946_v3 = vunpack.c.l.bf16 %v508_v56 }
  0x4c   : > { %v3948_v4 = vunpack.c.l.bf16 %v516_v59  ;;  %v545_v7 = vmul.f32 %v3930_v54, %v3924_v49  ;;  %v546_v10 = vmul.f32 %v3930_v54, %v3926_v51  ;;  %v3956_v11 = vmul.f32 %v3930_v54, %v3934_v60 }
  0x4d   : > { %v611_v12 = vpack.c.bf16 %v547_v63, %v547_v63  ;;  %v612_v13 = vpack.c.bf16 %v548_v1, %v548_v1  ;;  %v563_v14 = vmul.f32 %v3944_v2, %v3920_v41  ;;  %v564_v15 = vmul.f32 %v3944_v2, %v3922_v42 }
  0x4e   : > { %v579_v16 = vmul.f32 %v3946_v3, %v3920_v41  ;;  %v580_v20 = vmul.f32 %v3946_v3, %v3922_v42  ;;  %v595_v21 = vmul.f32 %v3948_v4, %v3920_v41  ;;  %v596_v22 = vmul.f32 %v3948_v4, %v3922_v42 }
  0x4f   : > { %v835_v23 = vunpack.c.l.b16 %v611_v12  ;;  %v836_v24 = vunpack.c.l.b16 %v612_v13  ;;  %v627_v25 = vpack.c.bf16 %v563_v14, %v563_v14  ;;  %v628_v26 = vpack.c.bf16 %v564_v15, %v564_v15 }
  0x50   : > { %v643_v27 = vpack.c.bf16 %v579_v16, %v579_v16  ;;  %v644_v28 = vpack.c.bf16 %v580_v20, %v580_v20  ;;  %v659_v29 = vpack.c.bf16 %v595_v21, %v595_v21  ;;  %v660_v30 = vpack.c.bf16 %v596_v22, %v596_v22 }
  0x51   : > { %v892_v31 = vpack.c.b16 %v836_v24, %v835_v23  ;;  %v851_v32 = vunpack.c.l.b16 %v627_v25  ;;  %v852_v33 = vunpack.c.l.b16 %v628_v26  ;;  %v609_v36 = vpack.c.bf16 %v545_v7, %v545_v7 }
  0x52   : > { %v867_v37 = vunpack.c.l.b16 %v643_v27  ;;  %v868_v38 = vunpack.c.l.b16 %v644_v28  ;;  %v883_v39 = vunpack.c.l.b16 %v659_v29  ;;  %v884_v43 = vunpack.c.l.b16 %v660_v30 }
  0x53   : > { %949 = vmatpush.bf16.msra.mxu0 %v892_v31  ;;  %v900_v44 = vpack.c.b16 %v852_v33, %v851_v32  ;;  %v610_v45 = vpack.c.bf16 %v546_v10, %v546_v10  ;;  %v833_v46 = vunpack.c.l.b16 %v609_v36  ;;  %v561_v47 = vmul.f32 %v3944_v2, %v3924_v49 }
  0x54   : > { %v908_v50 = vpack.c.b16 %v868_v38, %v867_v37  ;;  %v916_v52 = vpack.c.b16 %v884_v43, %v883_v39  ;;  %v562_v55 = vmul.f32 %v3944_v2, %v3926_v51  ;;  %v577_v56 = vmul.f32 %v3946_v3, %v3924_v49 }
  0x55   : > { %978 = vmatpush.bf16.msra.mxu1 %v900_v44  ;;  %v834_v57 = vunpack.c.l.b16 %v610_v45  ;;  %v625_v59 = vpack.c.bf16 %v561_v47, %v561_v47  ;;  %v578_v63 = vmul.f32 %v3946_v3, %v3926_v51  ;;  %v593_v1 = vmul.f32 %v3948_v4, %v3924_v49 }
  0x56   : > { %1007 = vmatpush.bf16.msra.mxu2 %v908_v50  ;;  %1036 = vmatpush.bf16.msra.mxu3 %v916_v52  ;;  %v626_v7 = vpack.c.bf16 %v562_v55, %v562_v55  ;;  %v641_v10 = vpack.c.bf16 %v577_v56, %v577_v56  ;;  %v594_v12 = vmul.f32 %v3948_v4, %v3926_v51  ;;  %v3982_v13 = vunpack.c.l.bf16 %v433_v48 }
  0x57   : > { %v891_v14 = vpack.c.b16 %v834_v57, %v833_v46  ;;  %v849_v15 = vunpack.c.l.b16 %v625_v59  ;;  %v642_v16 = vpack.c.bf16 %v578_v63, %v578_v63  ;;  %v657_v20 = vpack.c.bf16 %v593_v1, %v593_v1 }
  0x58   : > { %v850_v21 = vunpack.c.l.b16 %v626_v7  ;;  %v865_v22 = vunpack.c.l.b16 %v641_v10  ;;  %v658_v23 = vpack.c.bf16 %v594_v12, %v594_v12  ;;  %v544_v24 = vmul.f32 %v3930_v54, %v3936_v61 }
  0x59   : > { %950 = vmatpush.bf16.msra.mxu0 %v891_v14  ;;  %v866_v25 = vunpack.c.l.b16 %v642_v16  ;;  %v881_v26 = vunpack.c.l.b16 %v657_v20  ;;  %v607_v27 = vpack.c.bf16 %v3956_v11, %v3956_v11  ;;  %v559_v28 = vmul.f32 %v3944_v2, %v3934_v60 }
  0x5a   : > { %v899_v29 = vpack.c.b16 %v850_v21, %v849_v15  ;;  %v882_v30 = vunpack.c.l.b16 %v658_v23  ;;  %v608_v31 = vpack.c.bf16 %v544_v24, %v544_v24  ;;  %v560_v32 = vmul.f32 %v3944_v2, %v3936_v61 }
  0x5b   : > { %v907_v33 = vpack.c.b16 %v866_v25, %v865_v22  ;;  %v831_v36 = vunpack.c.l.b16 %v607_v27  ;;  %v623_v37 = vpack.c.bf16 %v559_v28, %v559_v28  ;;  %v575_v38 = vmul.f32 %v3946_v3, %v3934_v60 }
  0x5c   : > { %979 = vmatpush.bf16.msra.mxu1 %v899_v29  ;;  %v915_v39 = vpack.c.b16 %v882_v30, %v881_v26  ;;  %v832_v43 = vunpack.c.l.b16 %v608_v31  ;;  %v624_v44 = vpack.c.bf16 %v560_v32, %v560_v32  ;;  %v576_v11 = vmul.f32 %v3946_v3, %v3936_v61 }
  0x5d   : > { %1008 = vmatpush.bf16.msra.mxu2 %v907_v33  ;;  %v847_v45 = vunpack.c.l.b16 %v623_v37  ;;  %v639_v46 = vpack.c.bf16 %v575_v38, %v575_v38  ;;  %v591_v47 = vmul.f32 %v3948_v4, %v3934_v60  ;;  %v592_v50 = vmul.f32 %v3948_v4, %v3936_v61 }
  0x5e   : > { %1037 = vmatpush.bf16.msra.mxu3 %v915_v39  ;;  %v890_v52 = vpack.c.b16 %v832_v43, %v831_v36  ;;  %v848_v55 = vunpack.c.l.b16 %v624_v44  ;;  %v640_v56 = vpack.c.bf16 %v576_v11, %v576_v11  ;;  %v4000_v57 = vunpack.c.h.bf16 %v433_v48 }
  0x5f   : > { %v863_v59 = vunpack.c.l.b16 %v639_v46  ;;  %v655_v63 = vpack.c.bf16 %v591_v47, %v591_v47  ;;  %v656_v1 = vpack.c.bf16 %v592_v50, %v592_v50  ;;  %v541_v7 = vmul.f32 %v3930_v54, %v3982_v13 }
  0x60   : > { %951 = vmatpush.bf16.msra.mxu0 %v890_v52  ;;  %v898_v10 = vpack.c.b16 %v848_v55, %v847_v45  ;;  %v864_v12 = vunpack.c.l.b16 %v640_v56  ;;  %v542_v14 = vmul.f32 %v3930_v54, %v4000_v57  ;;  %v557_v15 = vmul.f32 %v3944_v2, %v3982_v13 }
  0x61   : > { %v879_v16 = vunpack.c.l.b16 %v655_v63  ;;  %v880_v20 = vunpack.c.l.b16 %v656_v1  ;;  %v605_v21 = vpack.c.bf16 %v541_v7, %v541_v7  ;;  %v558_v48 = vmul.f32 %v3944_v2, %v4000_v57 }
  0x62   : > { %980 = vmatpush.bf16.msra.mxu1 %v898_v10  ;;  %v906_v22 = vpack.c.b16 %v864_v12, %v863_v59  ;;  %v606_v23 = vpack.c.bf16 %v542_v14, %v542_v14  ;;  %v621_v24 = vpack.c.bf16 %v557_v15, %v557_v15  ;;  %v573_v25 = vmul.f32 %v3946_v3, %v3982_v13 }
  0x63   : > { %v914_v26 = vpack.c.b16 %v880_v20, %v879_v16  ;;  %v829_v27 = vunpack.c.l.b16 %v605_v21  ;;  %v622_v28 = vpack.c.bf16 %v558_v48, %v558_v48  ;;  %v574_v54 = vmul.f32 %v3946_v3, %v4000_v57 }
  0x64   : > { %1009 = vmatpush.bf16.msra.mxu2 %v906_v22  ;;  %v830_v29 = vunpack.c.l.b16 %v606_v23  ;;  %v845_v30 = vunpack.c.l.b16 %v621_v24  ;;  %v637_v31 = vpack.c.bf16 %v573_v25, %v573_v25  ;;  %v589_v2 = vmul.f32 %v3948_v4, %v3982_v13 }
  0x65   : > { %1038 = vmatpush.bf16.msra.mxu3 %v914_v26  ;;  %v846_v32 = vunpack.c.l.b16 %v622_v28  ;;  %v638_v33 = vpack.c.bf16 %v574_v54, %v574_v54  ;;  %v590_v36 = vmul.f32 %v3948_v4, %v4000_v57  ;;  %v539_v37 = vmul.f32 %v3938_v62, %v3920_v41 }
  0x66   : > { %v889_v38 = vpack.c.b16 %v830_v29, %v829_v27  ;;  %v861_v39 = vunpack.c.l.b16 %v637_v31  ;;  %v653_v43 = vpack.c.bf16 %v589_v2, %v589_v2  ;;  %v540_v3 = vmul.f32 %v3938_v62, %v3922_v42 }
  0x67   : > { %v897_v44 = vpack.c.b16 %v846_v32, %v845_v30  ;;  %v862_v11 = vunpack.c.l.b16 %v638_v33  ;;  %v654_v45 = vpack.c.bf16 %v590_v36, %v590_v36  ;;  %v603_v46 = vpack.c.bf16 %v539_v37, %v539_v37 }
  0x68   : > { %952 = vmatpush.bf16.msra.mxu0 %v889_v38  ;;  %v877_v47 = vunpack.c.l.b16 %v653_v43  ;;  %v604_v50 = vpack.c.bf16 %v540_v3, %v540_v3  ;;  %v496_v4 = vperm.slane %v494_v53, 0  ;;  %v504_v52 = vperm.slane %v502_v58, 0 }
  0x69   : > { %981 = vmatpush.bf16.msra.mxu1 %v897_v44  ;;  %v905_v55 = vpack.c.b16 %v862_v11, %v861_v39  ;;  %v878_v56 = vunpack.c.l.b16 %v654_v45  ;;  %v827_v59 = vunpack.c.l.b16 %v603_v46  ;;  %v483_v63 = vperm.slane %v2786_v35, 0 }
  0x6a   : > { %v828_v1 = vunpack.c.l.b16 %v604_v50  ;;  %v4031_v7 = vunpack.c.l.bf16 %v496_v4  ;;  %v4033_v10 = vunpack.c.l.bf16 %v504_v52  ;;  %v537_v34 = vmul.f32 %v3938_v62, %v3924_v49 }
  0x6b   : > { %1010 = vmatpush.bf16.msra.mxu2 %v905_v55  ;;  %v913_v53 = vpack.c.b16 %v878_v56, %v877_v47  ;;  %v510_v40 = vpack.i.b16 %v483_v63, %v483_v63  ;;  %v538_v58 = vmul.f32 %v3938_v62, %v3926_v51  ;;  %v535_v12 = vmul.f32 %v3938_v62, %v3934_v60 }
  0x6c   : > { %v888_v14 = vpack.c.b16 %v828_v1, %v827_v59  ;;  %v555_v19 = vmul.f32 %v4031_v7, %v3920_v41  ;;  %v556_v35 = vmul.f32 %v4031_v7, %v3922_v42  ;;  %v571_v15 = vmul.f32 %v4033_v10, %v3920_v41 }
  0x6d   : > { %1039 = vmatpush.bf16.msra.mxu3 %v913_v53  ;;  %v572_v16 = vmul.f32 %v4033_v10, %v3922_v42  ;;  %v512_v20 = vperm.slane %v510_v40, 0  ;;  %v601_v21 = vpack.c.bf16 %v537_v34, %v537_v34  ;;  %v602_v48 = vpack.c.bf16 %v538_v58, %v538_v58 }
  0x6e   : > { %953 = vmatpush.bf16.msra.mxu0 %v888_v14  ;;  %v619_v22 = vpack.c.bf16 %v555_v19, %v555_v19  ;;  %v620_v23 = vpack.c.bf16 %v556_v35, %v556_v35  ;;  %v635_v24 = vpack.c.bf16 %v571_v15, %v571_v15  ;;  %v553_v25 = vmul.f32 %v4031_v7, %v3924_v49 }
  0x6f   : > { %v636_v26 = vpack.c.bf16 %v572_v16, %v572_v16  ;;  %v4051_v27 = vunpack.c.l.bf16 %v512_v20  ;;  %v825_v28 = vunpack.c.l.b16 %v601_v21  ;;  %v826_v54 = vunpack.c.l.b16 %v602_v48 }
  0x70   : > { %v843_v29 = vunpack.c.l.b16 %v619_v22  ;;  %v844_v30 = vunpack.c.l.b16 %v620_v23  ;;  %v859_v31 = vunpack.c.l.b16 %v635_v24  ;;  %v554_v2 = vmul.f32 %v4031_v7, %v3926_v51 }
  0x71   : > { %v860_v32 = vunpack.c.l.b16 %v636_v26  ;;  %v587_v33 = vmul.f32 %v4051_v27, %v3920_v41  ;;  %v588_v36 = vmul.f32 %v4051_v27, %v3922_v42  ;;  %v887_v37 = vpack.c.b16 %v826_v54, %v825_v28 }
  0x72   : > { %v896_v38 = vpack.c.b16 %v844_v30, %v843_v29  ;;  %v617_v39 = vpack.c.bf16 %v553_v25, %v553_v25  ;;  %v618_v43 = vpack.c.bf16 %v554_v2, %v554_v2  ;;  %v569_v3 = vmul.f32 %v4033_v10, %v3924_v49 }
  0x73   : > { %v904_v44 = vpack.c.b16 %v860_v32, %v859_v31  ;;  %v651_v11 = vpack.c.bf16 %v587_v33, %v587_v33  ;;  %v652_v45 = vpack.c.bf16 %v588_v36, %v588_v36  ;;  %954 = vmatpush.bf16.msra.mxu0 %v887_v37  ;;  %v570_v46 = vmul.f32 %v4033_v10, %v3926_v51 }
  0x74   : > { %982 = vmatpush.bf16.msra.mxu1 %v896_v38  ;;  %v841_v47 = vunpack.c.l.b16 %v617_v39  ;;  %v842_v41 = vunpack.c.l.b16 %v618_v43  ;;  %v633_v50 = vpack.c.bf16 %v569_v3, %v569_v3  ;;  %v585_v42 = vmul.f32 %v4051_v27, %v3924_v49 }
  0x75   : > { %1011 = vmatpush.bf16.msra.mxu2 %v904_v44  ;;  %v875_v4 = vunpack.c.l.b16 %v651_v11  ;;  %v876_v52 = vunpack.c.l.b16 %v652_v45  ;;  %v634_v55 = vpack.c.bf16 %v570_v46, %v570_v46  ;;  %v586_v56 = vmul.f32 %v4051_v27, %v3926_v51 }
  0x76   : > { %v895_v59 = vpack.c.b16 %v842_v41, %v841_v47  ;;  %v857_v63 = vunpack.c.l.b16 %v633_v50  ;;  %v649_v1 = vpack.c.bf16 %v585_v42, %v585_v42  ;;  %v536_v34 = vmul.f32 %v3938_v62, %v3936_v61 }
  0x77   : > { %v912_v53 = vpack.c.b16 %v876_v52, %v875_v4  ;;  %v858_v40 = vunpack.c.l.b16 %v634_v55  ;;  %v650_v58 = vpack.c.bf16 %v586_v56, %v586_v56  ;;  %v599_v14 = vpack.c.bf16 %v535_v12, %v535_v12  ;;  %v2789_v56 = vld [vmem:[%s4720_s0] sm:$0xf] }
  0x78   : > { %983 = vmatpush.bf16.msra.mxu1 %v895_v59  ;;  %v873_v19 = vunpack.c.l.b16 %v649_v1  ;;  %v600_v49 = vpack.c.bf16 %v536_v34, %v536_v34  ;;  %v551_v35 = vmul.f32 %v4031_v7, %v3934_v60  ;;  %v552_v15 = vmul.f32 %v4031_v7, %v3936_v61  ;;  %v3233_v59 = vld [vmem:[%s4720_s0 + $0xc] sm:$0xf0]  ;;  %v3231_v34 = vld [vmem:[%s4720_s0 + $0x4] sm:$0xf] }
  0x79   : > { %1040 = vmatpush.bf16.msra.mxu3 %v912_v53  ;;  %v903_v51 = vpack.c.b16 %v858_v40, %v857_v63  ;;  %v874_v16 = vunpack.c.l.b16 %v650_v58  ;;  %v823_v20 = vunpack.c.l.b16 %v599_v14  ;;  %v567_v21 = vmul.f32 %v4033_v10, %v3934_v60 }
  0x7a   : > { %v824_v48 = vunpack.c.l.b16 %v600_v49  ;;  %v615_v22 = vpack.c.bf16 %v551_v35, %v551_v35  ;;  %v616_v23 = vpack.c.bf16 %v552_v15, %v552_v15  ;;  %v568_v12 = vmul.f32 %v4033_v10, %v3936_v61  ;;  %v2797_v15 = vld [vmem:[%s4720_s0 + $0x8] sm:$0xf] }
  0x7b   : > { %1012 = vmatpush.bf16.msra.mxu2 %v903_v51  ;;  %v911_v24 = vpack.c.b16 %v874_v16, %v873_v19  ;;  %v631_v25 = vpack.c.bf16 %v567_v21, %v567_v21  ;;  %v583_v26 = vmul.f32 %v4051_v27, %v3934_v60  ;;  %v584_v28 = vmul.f32 %v4051_v27, %v3936_v61  ;;  %v3232_v21 = vld [vmem:[%s4720_s0 + $0xc] sm:$0xf] }
  0x7c   : > { %v886_v54 = vpack.c.b16 %v824_v48, %v823_v20  ;;  %v839_v29 = vunpack.c.l.b16 %v615_v22  ;;  %v840_v30 = vunpack.c.l.b16 %v616_v23  ;;  %v632_v31 = vpack.c.bf16 %v568_v12, %v568_v12  ;;  %v2799_v48 = vld [vmem:[%s4720_s0 + $0x18] sm:$0xf0] }
  0x7d   : > { %1041 = vmatpush.bf16.msra.mxu3 %v911_v24  ;;  %v855_v2 = vunpack.c.l.b16 %v631_v25  ;;  %v647_v32 = vpack.c.bf16 %v583_v26, %v583_v26  ;;  %v648_v33 = vpack.c.bf16 %v584_v28, %v584_v28  ;;  %v533_v36 = vmul.f32 %v3938_v62, %v3982_v13  ;;  %v2805_v24 = vld [vmem:[%s4720_s0 + $0x20] sm:$0xf]  ;;  %v3237_v25 = vld [vmem:[%s4720_s0 + $0x2c] sm:$0xf0]  ;;  %v3235_v26 = vld [vmem:[%s4720_s0 + $0x24] sm:$0xf] }
  0x7e   : > { %955 = vmatpush.bf16.msra.mxu0 %v886_v54  ;;  %v894_v37 = vpack.c.b16 %v840_v30, %v839_v29  ;;  %v856_v38 = vunpack.c.l.b16 %v632_v31  ;;  %v534_v60 = vmul.f32 %v3938_v62, %v4000_v57  ;;  %v549_v61 = vmul.f32 %v4031_v7, %v3982_v13  ;;  %v2807_v28 = vld [vmem:[%s4720_s0 + $0x30] sm:$0xf0]  ;;  %v2813_v29 = vld [vmem:[%s4720_s0 + $0x28] sm:$0xf]  ;;  %v3238_v30 = vld [vmem:[%s4720_s0 + $0x34] sm:$0xf0] }
  0x7f   : > { %v871_v39 = vunpack.c.l.b16 %v647_v32  ;;  %v872_v43 = vunpack.c.l.b16 %v648_v33  ;;  %v597_v3 = vpack.c.bf16 %v533_v36, %v533_v36  ;;  %v550_v44 = vmul.f32 %v4031_v7, %v4000_v57  ;;  %v2815_v32 = vld [vmem:[%s4720_s0 + $0x38] sm:$0xf0] }
  0x80   : > { %984 = vmatpush.bf16.msra.mxu1 %v894_v37  ;;  %v902_v11 = vpack.c.b16 %v856_v38, %v855_v2  ;;  %v598_v45 = vpack.c.bf16 %v534_v60, %v534_v60  ;;  %v613_v46 = vpack.c.bf16 %v549_v61, %v549_v61  ;;  %v565_v47 = vmul.f32 %v4033_v10, %v3982_v13  ;;  %v3236_v2 = vld [vmem:[%s4720_s0 + $0x2c] sm:$0xf]  ;;  %v3254_v37 = vld [vmem:[#allocation5 + $0x38] sm:$0xff]  ;;  %v3253_v60 = vld [vmem:[#allocation5 + $0x30] sm:$0xff] }
  0x81   : > { %v910_v41 = vpack.c.b16 %v872_v43, %v871_v39  ;;  %v821_v50 = vunpack.c.l.b16 %v597_v3  ;;  %v614_v42 = vpack.c.bf16 %v550_v44, %v550_v44  ;;  %v566_v62 = vmul.f32 %v4033_v10, %v4000_v57  ;;  %v3262_v38 = vld [vmem:[#allocation5 + $0x78] sm:$0xff]  ;;  %v3241_v39 = vld [vmem:[%s4720_s0 + $0x4c] sm:$0xf0]  ;;  %v2823_v3 = vld [vmem:[%s4720_s0 + $0x50] sm:$0xf0] }
  0x82   : > { %1013 = vmatpush.bf16.msra.mxu2 %v902_v11  ;;  %v822_v4 = vunpack.c.l.b16 %v598_v45  ;;  %v837_v52 = vunpack.c.l.b16 %v613_v46  ;;  %v629_v55 = vpack.c.bf16 %v565_v47, %v565_v47  ;;  %v581_v7 = vmul.f32 %v4051_v27, %v3982_v13  ;;  %v2791_v13 = vld [vmem:[%s4720_s0 + $0x10] sm:$0xf0]  ;;  %v2821_v61 = vld [vmem:[%s4720_s0 + $0x40] sm:$0xf]  ;;  %v3239_v43 = vld [vmem:[%s4720_s0 + $0x44] sm:$0xf] }
  0x83   : > { %1042 = vmatpush.bf16.msra.mxu3 %v910_v41  ;;  %v838_v63 = vunpack.c.l.b16 %v614_v42  ;;  %v630_v1 = vpack.c.bf16 %v566_v62, %v566_v62  ;;  %v582_v10 = vmul.f32 %v4051_v27, %v4000_v57  ;;  %v2790_v35 = vor.u32 %v3233_v59, %v2789_v56  ;;  %v3234_v57 = vld [vmem:[%s4720_s0 + $0x14] sm:$0xf0]  ;;  %v3252_v44 = vld [vmem:[#allocation5 + $0x28] sm:$0xff]  ;;  %v2829_v45 = vld [vmem:[%s4720_s0 + $0x48] sm:$0xf] }
  0x84   : > { %v885_v53 = vpack.c.b16 %v822_v4, %v821_v50  ;;  %v853_v40 = vunpack.c.l.b16 %v629_v55  ;;  %v645_v58 = vpack.c.bf16 %v581_v7, %v581_v7  ;;  %v2794_v51 = vor.u32 %v3231_v34, %v2791_v13  ;;  %v3242_v46 = vld [vmem:[%s4720_s0 + $0x54] sm:$0xf0]  ;;  %v3240_v41 = vld [vmem:[%s4720_s0 + $0x4c] sm:$0xf]  ;;  %v2831_v50 = vld [vmem:[%s4720_s0 + $0x58] sm:$0xf0] }
  0x85   : > { %v893_v14 = vpack.c.b16 %v838_v63, %v837_v52  ;;  %v854_v19 = vunpack.c.l.b16 %v630_v1  ;;  %v646_v49 = vpack.c.bf16 %v582_v10, %v582_v10  ;;  %v2798_v22 = vor.u32 %v3234_v57, %v2797_v15  ;;  %v3251_v62 = vld [vmem:[#allocation5 + $0x20] sm:$0xff]  ;;  %v2837_v52 = vld [vmem:[%s4720_s0 + $0x60] sm:$0xf]  ;;  %v3245_v55 = vld [vmem:[%s4720_s0 + $0x6c] sm:$0xf0] }
  0x86   : > { %956 = vmatpush.bf16.msra.mxu0 %v885_v53  ;;  %v869_v27 = vunpack.c.l.b16 %v645_v58  ;;  %v2802_v12 = vor.u32 %v3232_v21, %v2799_v48  ;;  %v2806_v54 = vor.u32 %v3237_v25, %v2805_v24  ;;  %v2810_v31 = vor.u32 %v3235_v26, %v2807_v28  ;;  %v3243_v7 = vld [vmem:[%s4720_s0 + $0x64] sm:$0xf]  ;;  %v2839_v56 = vld [vmem:[%s4720_s0 + $0x70] sm:$0xf0]  ;;  %v2845_v63 = vld [vmem:[%s4720_s0 + $0x68] sm:$0xf] }
  0x87   : > { %985 = vmatpush.bf16.msra.mxu1 %v893_v14  ;;  %v901_v16 = vpack.c.b16 %v854_v19, %v853_v40  ;;  %v870_v20 = vunpack.c.l.b16 %v646_v49  ;;  %v2814_v33 = vor.u32 %v3238_v30, %v2813_v29  ;;  %v2818_v36 = vor.u32 %v3236_v2, %v2815_v32  ;;  %v3246_v1 = vld [vmem:[%s4720_s0 + $0x74] sm:$0xf0]  ;;  %v3244_v34 = vld [vmem:[%s4720_s0 + $0x6c] sm:$0xf]  ;;  %v2847_v13 = vld [vmem:[%s4720_s0 + $0x78] sm:$0xf0] }
  0x88   : > { %v2822_v11 = vor.u32 %v3241_v39, %v2821_v61  ;;  %v2826_v47 = vor.u32 %v3239_v43, %v2823_v3  ;;  %v2830_v42 = vor.u32 %v3242_v46, %v2829_v45  ;;  %v2834_v4 = vor.u32 %v3240_v41, %v2831_v50  ;;  %v3261_v58 = vld [vmem:[#allocation5 + $0x70] sm:$0xff]  ;;  %v3250_v14 = vld [vmem:[#allocation5 + $0x18] sm:$0xff]  ;;  %v3260_v19 = vld [vmem:[#allocation5 + $0x68] sm:$0xff] }
  0x89   : > { %1014 = vmatpush.bf16.msra.mxu2 %v901_v16  ;;  %v909_v23 = vpack.c.b16 %v870_v20, %v869_v27  ;;  %957 = vmatmul.bf16.vlgmr.msra.gmra.mxu0 %v2790_v35  ;;  %v2838_v59 = vor.u32 %v3245_v55, %v2837_v52  ;;  %v2842_v10 = vor.u32 %v3243_v7, %v2839_v56  ;;  %v3249_v49 = vld [vmem:[#allocation5 + $0x10] sm:$0xff]  ;;  %v3259_v35 = vld [vmem:[#allocation5 + $0x60] sm:$0xff]  ;;  %v3248_v15 = vld [vmem:[#allocation5 + $0x8] sm:$0xff] }
  0x8a   : > { %986 = vmatmul.bf16.vlgmr.msra.gmra.mxu1 %v2794_v51  ;;  %1253 = vmatpush.bf16.msrb.mxu0 %v3254_v37  ;;  %v2846_v53 = vor.u32 %v3246_v1, %v2845_v63  ;;  %v2850_v40 = vor.u32 %v3244_v34, %v2847_v13  ;;  %v3258_v57 = vld [vmem:[#allocation5 + $0x58] sm:$0xff]  ;;  %v3247_v27 = vld [vmem:[#allocation5] sm:$0xff]  ;;  %v3257_v51 = vld [vmem:[#allocation5 + $0x50] sm:$0xff] }
  0x8b   : > { %1043 = vmatpush.bf16.msra.mxu3 %v909_v23  ;;  %1282 = vmatpush.bf16.msrb.mxu1 %v3262_v38  ;;  %v3227_v16 = vld [vmem:[#allocation2] sm:$0xff]  ;;  %v3256_v20 = vld [vmem:[#allocation5 + $0x48] sm:$0xff]  ;;  %v3255_v21 = vld [vmem:[#allocation5 + $0x40] sm:$0xff] }
  0x8c   : > { %1015 = vmatmul.bf16.vlgmr.msra.gmra.mxu2 %v2798_v22  ;;  %v3228_v23 = vld [vmem:[#allocation2 + $0x8] sm:$0xff]  ;;  %v3229_v38 = vld [vmem:[#allocation2 + $0x10] sm:$0xff]  ;;  %v3230_v56 = vld [vmem:[#allocation2 + $0x18] sm:$0xff] }
  0x8e   : > { %1044 = vmatmul.bf16.vlgmr.msra.gmra.mxu3 %v2802_v12  ;;  %1254 = vmatpush.bf16.msrb.mxu0 %v3253_v60 }
  0x8f   : > { %1283 = vmatpush.bf16.msrb.mxu1 %v3261_v58 }
  0x92   : > { %1255 = vmatpush.bf16.msrb.mxu0 %v3252_v44 }
  0x93   : > { %1284 = vmatpush.bf16.msrb.mxu1 %v3260_v19 }
  0x96   : > { %1256 = vmatpush.bf16.msrb.mxu0 %v3251_v62 }
  0x97   : > { %1285 = vmatpush.bf16.msrb.mxu1 %v3259_v35 }
  0x99   : > { %962 = vmatmul.bf16.gmra.mxu0 %v2806_v54 }
  0x9a   : > { %991 = vmatmul.bf16.gmra.mxu1 %v2810_v31  ;;  %1257 = vmatpush.bf16.msrb.mxu0 %v3250_v14 }
  0x9b   : > { %1286 = vmatpush.bf16.msrb.mxu1 %v3258_v57 }
  0x9c   : > { %1020 = vmatmul.bf16.gmra.mxu2 %v2814_v33 }
  0x9e   : > { %1049 = vmatmul.bf16.gmra.mxu3 %v2818_v36  ;;  %1258 = vmatpush.bf16.msrb.mxu0 %v3249_v49 }
  0x9f   : > { %1287 = vmatpush.bf16.msrb.mxu1 %v3257_v51 }
  0xa2   : > { %1259 = vmatpush.bf16.msrb.mxu0 %v3248_v15 }
  0xa3   : > { %1288 = vmatpush.bf16.msrb.mxu1 %v3256_v20 }
  0xa6   : > { %1260 = vmatpush.bf16.msrb.mxu0 %v3247_v27 }
  0xa7   : > { %1289 = vmatpush.bf16.msrb.mxu1 %v3255_v21 }
  0xa9   : > { %967 = vmatmul.bf16.gmra.mxu0 %v2822_v11 }
  0xaa   : > { %996 = vmatmul.bf16.gmra.mxu1 %v2826_v47 }
  0xac   : > { %1025 = vmatmul.bf16.gmra.mxu2 %v2830_v42 }
  0xae   : > { %1054 = vmatmul.bf16.gmra.mxu3 %v2834_v4 }
  0xb9   : > { %972 = vmatmul.bf16.gmra.mxu0 %v2838_v59 }
  0xba   : > { %1001 = vmatmul.bf16.gmra.mxu1 %v2842_v10 }
  0xbc   : > { %1030 = vmatmul.bf16.gmra.mxu2 %v2846_v53 }
  0xbe   : > { %1059 = vmatmul.bf16.gmra.mxu3 %v2850_v40 }
  0xc9   : > { %1261 = vmatmul.bf16.vlgmr.msrb.gmra.mxu0 %v3227_v16 }
  0xd9   : > { %1266 = vmatmul.bf16.gmra.mxu0 %v3228_v23 }
  0xe9   : > { %1271 = vmatmul.bf16.gmra.mxu0 %v3229_v38 }
  0xf9   : > { %1276 = vmatmul.bf16.gmra.mxu0 %v3230_v56 }
 0x106   : > { %v958_v48 = vpop.f32.mrf.mxu0 }
 0x107   : > { %v987_v22 = vpop.f32.mrf.mxu1  ;;  %v959_v12 = vadd.f32 %v958_v48, %v3902_v17 }
 0x109   : > { %v988_v24 = vadd.f32 %v987_v22, %v959_v12 }
 0x10e   : > { %v960_v25 = vpop.f32.mrf.mxu0 }
 0x10f   : > { %v1016_v26 = vpop.f32.mrf.mxu2  ;;  %v989_v28 = vpop.f32.mrf.mxu1  ;;  %v961_v29 = vadd.f32 %v960_v25, %v3905_v18 }
 0x110   : > { %v1017_v30 = vadd.f32 %v1016_v26, %v988_v24 }
 0x111   : > { %v1045_v54 = vpop.f32.mrf.mxu3  ;;  %v990_v2 = vadd.f32 %v989_v28, %v961_v29 }
 0x112   : > { %v1046_v31 = vadd.f32 %v1045_v54, %v1017_v30  ;;  %v3492_v30 = vld [vmem:[%s3872_s19 + $0x38] sm:$0xff] }
 0x114   : > { %v1065_v61 = vpack.c.bf16 %v1046_v31, %v1046_v31 }
 0x116   : > { %v963_v32 = vpop.f32.mrf.mxu0  ;;  %v1105_v3 = vunpack.c.l.b16 %v1065_v61 }
 0x117   : > { %v1018_v33 = vpop.f32.mrf.mxu2  ;;  %v992_v36 = vpop.f32.mrf.mxu1  ;;  %v964_v17 = vadd.f32 %v963_v32, %v3892_v8 }
 0x118   : > { %v1019_v37 = vadd.f32 %v1018_v33, %v990_v2 }
 0x119   : > { %v1047_v60 = vpop.f32.mrf.mxu3  ;;  %v993_v11 = vadd.f32 %v992_v36, %v964_v17 }
 0x11a   : > { %v1048_v39 = vadd.f32 %v1047_v60, %v1019_v37 }
 0x11c   : > { %v1066_v43 = vpack.c.bf16 %v1048_v39, %v1048_v39 }
 0x11e   : > { %v1106_v44 = vunpack.c.l.b16 %v1066_v43  ;;  %v965_v45 = vpop.f32.mrf.mxu0 }
 0x11f   : > { %v1021_v18 = vpop.f32.mrf.mxu2  ;;  %v994_v46 = vpop.f32.mrf.mxu1  ;;  %v966_v50 = vadd.f32 %v965_v45, %v3895_v9 }
 0x120   : > { %v1113_v47 = vpack.c.b16 %v1106_v44, %v1105_v3  ;;  %v1022_v42 = vadd.f32 %v1021_v18, %v993_v11  ;;  %v4201_v18 = vld [vmem:[#allocation7] ss:$0 sm:$0xff] }
 0x121   : > { %v1050_v41 = vpop.f32.mrf.mxu3  ;;  %v995_v4 = vadd.f32 %v994_v46, %v966_v50 }
 0x122   : > { %1290 = vmatmul.bf16.vlgmr.msrb.gmra.mxu1 %v1113_v47  ;;  %v1051_v62 = vadd.f32 %v1050_v41, %v1022_v42  ;;  %v1344_v47 = vld [vmem:[#allocation3 + $0x4] sm:$0xf] }
 0x123   : > { %v1346_v50 = vrot.slane %v1344_v47, 3 }
 0x124   : > { %v1067_v63 = vpack.c.bf16 %v1051_v62, %v1051_v62 }
 0x126   : > { %v968_v52 = vpop.f32.mrf.mxu0  ;;  %v1107_v13 = vunpack.c.l.b16 %v1067_v63  ;;  %v1349_v63 = vsel %vm444_vm0, %v1344_v47, %v1346_v50 }
 0x127   : > { %v1023_v55 = vpop.f32.mrf.mxu2  ;;  %v997_v8 = vpop.f32.mrf.mxu1  ;;  %v969_v1 = vadd.f32 %v968_v52, %v3884_v5 }
 0x128   : > { %v1024_v7 = vadd.f32 %v1023_v55, %v995_v4 }
 0x129   : > { %v1052_v59 = vpop.f32.mrf.mxu3  ;;  %v998_v40 = vadd.f32 %v997_v8, %v969_v1  ;;  %v1351_v8 = vsel %vm449_vm1, %v1344_v47, %v1346_v50  ;;  %v1357_v1 = vsel %vm457_vm3, %v1344_v47, %v1346_v50 }
 0x12a   : > { %v1053_v10 = vadd.f32 %v1052_v59, %v1024_v7  ;;  %v1354_v7 = vsel %vm453_vm2, %v1344_v47, %v1346_v50 }
 0x12c   : > { %v1068_v34 = vpack.c.bf16 %v1053_v10, %v1053_v10  ;;  %v1353_v10 = vrot.slane %v1351_v8, 1 }
 0x12e   : > { %v1108_v53 = vunpack.c.l.b16 %v1068_v34  ;;  %v970_v9 = vpop.f32.mrf.mxu0  ;;  %v1356_v34 = vrot.slane %v1354_v7, 2 }
 0x12f   : > { %v1026_v58 = vpop.f32.mrf.mxu2  ;;  %v999_v14 = vpop.f32.mrf.mxu1  ;;  %v971_v35 = vadd.f32 %v970_v9, %v3887_v6 }
 0x130   : > { %v1114_v19 = vpack.c.b16 %v1108_v53, %v1107_v13  ;;  %v1027_v15 = vadd.f32 %v1026_v58, %v998_v40  ;;  %v1361_v53 = vunpack.i.h.s16 %v1349_v63  ;;  %v1359_v40 = vrot.slane %v1357_v1, 3 }
 0x131   : > { %v1055_v49 = vpop.f32.mrf.mxu3  ;;  %v1000_v27 = vadd.f32 %v999_v14, %v971_v35  ;;  %v1363_v58 = vunpack.i.h.s16 %v1353_v10 }
 0x132   : > { %1295 = vmatmul.bf16.gmra.mxu1 %v1114_v19  ;;  %v1056_v57 = vadd.f32 %v1055_v49, %v1027_v15  ;;  %v1365_v19 = vunpack.i.h.s16 %v1356_v34  ;;  %v1369_v49 = vpack.i.b16 %v1361_v53, %v1361_v53  ;;  %v1367_v15 = vunpack.i.h.s16 %v1359_v40 }
 0x134   : > { %v1069_v48 = vpack.c.bf16 %v1056_v57, %v1056_v57  ;;  %v1371_v57 = vpack.i.b16 %v1363_v58, %v1363_v58 }
 0x136   : > { %v973_v51 = vpop.f32.mrf.mxu0  ;;  %v1109_v24 = vunpack.c.l.b16 %v1069_v48  ;;  %v1379_v48 = vperm.slane %v1371_v57, 0 }
 0x137   : > { %v1028_v5 = vpop.f32.mrf.mxu2  ;;  %v1002_v21 = vpop.f32.mrf.mxu1  ;;  %v974_v22 = vadd.f32 %v973_v51, %v3879_v0  ;;  %v1377_v51 = vperm.slane %v1369_v49, 0 }
 0x138   : > { %v1029_v16 = vadd.f32 %v1028_v5, %v1000_v27  ;;  %v1373_v27 = vpack.i.b16 %v1365_v19, %v1365_v19 }
 0x139   : > { %v1057_v20 = vpop.f32.mrf.mxu3  ;;  %v1003_v26 = vadd.f32 %v1002_v21, %v974_v22 }
 0x13a   : > { %v1058_v23 = vadd.f32 %v1057_v20, %v1029_v16  ;;  %v1375_v20 = vpack.i.b16 %v1367_v15, %v1367_v15 }
 0x13c   : > { %v1070_v12 = vpack.c.bf16 %v1058_v23, %v1058_v23  ;;  %v1381_v23 = vperm.slane %v1373_v27, 0 }
 0x13e   : > { %v1110_v25 = vunpack.c.l.b16 %v1070_v12  ;;  %v975_v28 = vpop.f32.mrf.mxu0  ;;  %v1389_v12 = vpack.i.b16 %v1377_v51, %v1377_v51 }
 0x13f   : > { %v1031_v6 = vpop.f32.mrf.mxu2  ;;  %v976_v31 = vadd.f32 %v3492_v30, %v975_v28  ;;  %v1004_v32 = vpop.f32.mrf.mxu1  ;;  %v1405_v30 = vpack.i.b16 %v1381_v23, %v1381_v23 }
 0x140   : > { %v1115_v54 = vpack.c.b16 %v1110_v25, %v1109_v24  ;;  %v1032_v2 = vadd.f32 %v1031_v6, %v1003_v26  ;;  %v2931_v24 = vpack.i.b16 %v1349_v63, %v1349_v63  ;;  %v1383_v6 = vperm.slane %v1375_v20, 0 }
 0x141   : > { %v1060_v29 = vpop.f32.mrf.mxu3  ;;  %v1005_v36 = vadd.f32 %v1004_v32, %v976_v31  ;;  %v1391_v31 = vperm.slane %v1389_v12, 0  ;;  %v2932_v32 = vpack.i.b16 %v1353_v10, %v1353_v10 }
 0x142   : > { %1300 = vmatmul.bf16.gmra.mxu1 %v1115_v54  ;;  %v1061_v33 = vadd.f32 %v1060_v29, %v1032_v2  ;;  %v1397_v54 = vpack.i.b16 %v1379_v48, %v1379_v48  ;;  %v1376_v2 = vperm.slane %v2931_v24, 0 }
 0x144   : > { %v1071_v0 = vpack.c.bf16 %v1061_v33, %v1061_v33  ;;  %v1413_v33 = vpack.i.b16 %v1383_v6, %v1383_v6 }
 0x146   : > { %v1111_v39 = vunpack.c.l.b16 %v1071_v0  ;;  %v1262_v44 = vpop.f32.mrf.mxu0  ;;  %v2934_v0 = vpack.i.b16 %v1359_v40, %v1359_v40 }
 0x147   : > { %v1033_v37 = vpop.f32.mrf.mxu2  ;;  %v1263_v41 = vadd.f32 %v4201_v18, %v1262_v44 }
 0x148   : > { %v1034_v38 = vadd.f32 %v1033_v37, %v1005_v36 }
 0x149   : > { %v1062_v60 = vpop.f32.mrf.mxu3 }
 0x14a   : > { %v1063_v61 = vadd.f32 %v1062_v60, %v1034_v38  ;;  %v1399_v38 = vperm.slane %v1397_v54, 0  ;;  %v2933_v60 = vpack.i.b16 %v1356_v34, %v1356_v34 }
 0x14c   : > { %v1072_v17 = vpack.c.bf16 %v1063_v61, %v1063_v61  ;;  %v1407_v61 = vperm.slane %v1405_v30, 0  ;;  %v1380_v47 = vperm.slane %v2933_v60, 0 }
 0x14e   : > { %v1112_v43 = vunpack.c.l.b16 %v1072_v17  ;;  %v1264_v11 = vpop.f32.mrf.mxu0  ;;  %v4211_v17 = vunpack.c.l.bf16 %v1391_v31  ;;  %v1401_v1 = vpack.i.b16 %v1380_v47, %v1380_v47 }
 0x14f   : > { %v1265_v42 = vadd.f32 %v4201_v18, %v1264_v11  ;;  %v1415_v11 = vperm.slane %v1413_v33, 0 }
 0x150   : > { %v1116_v3 = vpack.c.b16 %v1112_v43, %v1111_v39  ;;  %v1385_v43 = vpack.i.b16 %v1376_v2, %v1376_v2 }
 0x151   : > { %v4225_v7 = vunpack.c.l.bf16 %v1415_v11 }
 0x152   : > { %1305 = vmatmul.bf16.gmra.mxu1 %v1116_v3  ;;  %v1378_v3 = vperm.slane %v2932_v32, 0 }
 0x156   : > { %v1267_v45 = vpop.f32.mrf.mxu0 }
 0x157   : > { %v1268_v35 = vadd.f32 %v4201_v18, %v1267_v45 }
 0x15e   : > { %v1269_v4 = vpop.f32.mrf.mxu0 }
 0x15f   : > { %v1270_v5 = vadd.f32 %v4201_v18, %v1269_v4  ;;  %v1387_v4 = vperm.slane %v1385_v43, 0 }
 0x161   : > { %v4237_v58 = vunpack.c.l.bf16 %v1387_v4 }
 0x166   : > { %v1272_v14 = vpop.f32.mrf.mxu0 }
 0x167   : > { %v1273_v44 = vadd.f32 %v4201_v18, %v1272_v14 }
 0x16e   : > { %v1274_v28 = vpop.f32.mrf.mxu0 }
 0x176   : > { %v1277_v50 = vpop.f32.mrf.mxu0 }
 0x17e   : > { %v1279_v24 = vpop.f32.mrf.mxu0 }
 0x17f   : > { %v1280_v60 = vadd.f32 %v4201_v18, %v1279_v24 }
 0x19f   : > { %v1291_v46 = vpop.f32.mrf.mxu1 }
 0x1a0   : > { %v1292_v62 = vadd.f32 %v1291_v46, %v1263_v41  ;;  %v4218_v46 = vunpack.c.l.bf16 %v1399_v38  ;;  %v1382_v41 = vperm.slane %v2934_v0, 0  ;;  %v1278_v38 = vadd.f32 %v4201_v18, %v1277_v50 }
 0x1a2   : > { %v1311_v56 = vmax.f32 %v1292_v62, 0.0  ;;  %v1409_v10 = vpack.i.b16 %v1382_v41, %v1382_v41 }
 0x1a7   : > { %v1293_v52 = vpop.f32.mrf.mxu1 }
 0x1a8   : > { %v1294_v55 = vadd.f32 %v1293_v52, %v1265_v42  ;;  %v4220_v42 = vunpack.c.l.bf16 %v1407_v61  ;;  %v1393_v52 = vpack.i.b16 %v1378_v3, %v1378_v3 }
 0x1aa   : > { %v1312_v59 = vmax.f32 %v1294_v55, 0.0  ;;  %v1275_v55 = vadd.f32 %v4201_v18, %v1274_v28  ;;  %v1395_v14 = vperm.slane %v1393_v52, 0 }
 0x1ac   : > { %v3358_v13 = vpack.c.bf16 %v1312_v59, %v1311_v56  ;;  %v4245_v12 = vunpack.c.l.bf16 %v1395_v14 }
 0x1ae   : > { %3359 = vst [vmem:[#allocation2] sm:$0xff] %v3358_v13  }
 0x1af   : > { %v1296_v9 = vpop.f32.mrf.mxu1 }
 0x1b0   : > { %v1297_v16 = vadd.f32 %v1296_v9, %v1268_v35 }
 0x1b2   : > { %v1313_v25 = vmax.f32 %v1297_v16, 0.0  ;;  %v1411_v16 = vperm.slane %v1409_v10, 0 }
 0x1b4   : > { %v4257_v2 = vunpack.c.l.bf16 %v1411_v16 }
 0x1b5   : > { %v1335_v36 = vld [vmem:[#allocation2] sm:$0xff]  }
 0x1b6   : > { %v4213_v39 = vunpack.c.l.bf16 %v1335_v36  ;;  %v4216_v45 = vunpack.c.h.bf16 %v1335_v36 }
 0x1b7   : > { %v1298_v21 = vpop.f32.mrf.mxu1 }
 0x1b8   : > { %v1299_v22 = vadd.f32 %v1298_v21, %v1270_v5  ;;  %v1440_v62 = vmul.f32 %v4211_v17, %v4213_v39  ;;  %v1441_v56 = vmul.f32 %v4211_v17, %v4216_v45  ;;  %v1456_v63 = vmul.f32 %v4218_v46, %v4213_v39 }
 0x1b9   : > { %v1457_v13 = vmul.f32 %v4218_v46, %v4216_v45  ;;  %v1472_v53 = vmul.f32 %v4220_v42, %v4213_v39  ;;  %v1473_v40 = vmul.f32 %v4220_v42, %v4216_v45  ;;  %v1488_v15 = vmul.f32 %v4225_v7, %v4213_v39 }
 0x1ba   : > { %v1314_v26 = vmax.f32 %v1299_v22, 0.0  ;;  %v1504_v9 = vpack.c.bf16 %v1440_v62, %v1440_v62  ;;  %v1505_v35 = vpack.c.bf16 %v1441_v56, %v1441_v56  ;;  %v1520_v27 = vpack.c.bf16 %v1456_v63, %v1456_v63 }
 0x1bb   : > { %v1489_v51 = vmul.f32 %v4225_v7, %v4216_v45  ;;  %v1403_v5 = vperm.slane %v1401_v1, 0  ;;  %v1521_v21 = vpack.c.bf16 %v1457_v13, %v1457_v13  ;;  %v1536_v48 = vpack.c.bf16 %v1472_v53, %v1472_v53 }
 0x1bc   : > { %v3363_v29 = vpack.c.bf16 %v1314_v26, %v1313_v25  ;;  %v1537_v22 = vpack.c.bf16 %v1473_v40, %v1473_v40  ;;  %v4243_v23 = vunpack.c.l.b16 %v1504_v9  ;;  %v4251_v28 = vunpack.c.l.b16 %v1505_v35 }
 0x1bd   : > { %v1552_v6 = vpack.c.bf16 %v1488_v15, %v1488_v15  ;;  %v1553_v30 = vpack.c.bf16 %v1489_v51, %v1489_v51  ;;  %v4255_v31 = vunpack.c.l.bf16 %v1403_v5  ;;  %v4259_v32 = vunpack.c.l.b16 %v1521_v21 }
 0x1be   : > { %3398 = vst [vmem:[#allocation2 + $0x8] sm:$0xff] %v3363_v29   ;;  %v4253_v29 = vunpack.c.l.b16 %v1520_v27  ;;  %v4261_v33 = vunpack.c.l.b16 %v1536_v48  ;;  %v4263_v36 = vunpack.c.l.b16 %v1537_v22  ;;  %v4273_v0 = vmul.f32 %v4237_v58, %v4216_v45 }
 0x1bf   : > { %v1301_v37 = vpop.f32.mrf.mxu1  ;;  %v4277_v61 = vmul.f32 %v4245_v12, %v4213_v39  ;;  %v4285_v11 = vunpack.c.l.b16 %v1552_v6  ;;  %v4291_v41 = vunpack.c.l.b16 %v1553_v30  ;;  %v4295_v50 = vmul.f32 %v4245_v12, %v4216_v45 }
 0x1c0   : > { %v1302_v8 = vadd.f32 %v1301_v37, %v1273_v44  ;;  %v4267_v37 = vmul.f32 %v4237_v58, %v4213_v39  ;;  %4756 = vst [vmem:[#allocation16_spill] sm:$0xff] %v4273_v0  ;;  %v4313_v63 = vmul.f32 %v4255_v31, %v4213_v39  ;;  %v4317_v53 = vmul.f32 %v4255_v31, %v4216_v45 }
 0x1c1   : > { %4757 = vst [vmem:[#allocation17_spill] sm:$0xff] %v4277_v61  ;;  %v4343_v30 = vmul.f32 %v4257_v2, %v4213_v39 }
 0x1c2   : > { %v1315_v19 = vmax.f32 %v1302_v8, 0.0  ;;  %4755 = vst [vmem:[#allocation15_spill] sm:$0xff] %v4267_v37 }
 0x1c3   : > { %4758 = vst [vmem:[#allocation18_spill] sm:$0xff] %v4295_v50 }
 0x1c4   : > { %4759 = vst [vmem:[#allocation19_spill] sm:$0xff] %v4313_v63 }
 0x1c5   : > { %v1337_v57 = vld [vmem:[#allocation2 + $0x8] sm:$0xff]   ;;  %4760 = vst [vmem:[#allocation20_spill] sm:$0xff] %v4317_v53 }
 0x1c6   : > { %v4247_v25 = vunpack.c.l.bf16 %v1337_v57  ;;  %v4249_v26 = vunpack.c.h.bf16 %v1337_v57  ;;  %4761 = vst [vmem:[#allocation21_spill] sm:$0xff] %v4343_v30 }
 0x1c7   : > { %v1303_v59 = vpop.f32.mrf.mxu1 }
 0x1c8   : > { %v1304_v34 = vadd.f32 %v1303_v59, %v1275_v55  ;;  %v1442_v43 = vmul.f32 %v4211_v17, %v4247_v25  ;;  %v1443_v3 = vmul.f32 %v4211_v17, %v4249_v26  ;;  %v1458_v18 = vmul.f32 %v4218_v46, %v4247_v25 }
 0x1c9   : > { %v1459_v47 = vmul.f32 %v4218_v46, %v4249_v26  ;;  %v1474_v62 = vmul.f32 %v4220_v42, %v4247_v25  ;;  %v1475_v8 = vmul.f32 %v4220_v42, %v4249_v26  ;;  %v1490_v57 = vmul.f32 %v4225_v7, %v4247_v25 }
 0x1ca   : > { %v1316_v49 = vmax.f32 %v1304_v34, 0.0  ;;  %v1506_v34 = vpack.c.bf16 %v1442_v43, %v1442_v43  ;;  %v1507_v13 = vpack.c.bf16 %v1443_v3, %v1443_v3  ;;  %v1522_v9 = vpack.c.bf16 %v1458_v18, %v1458_v18 }
 0x1cb   : > { %v1523_v14 = vpack.c.bf16 %v1459_v47, %v1459_v47  ;;  %v1538_v15 = vpack.c.bf16 %v1474_v62, %v1474_v62  ;;  %v1491_v27 = vmul.f32 %v4225_v7, %v4249_v26  ;;  %v1539_v16 = vpack.c.bf16 %v1475_v8, %v1475_v8 }
 0x1cc   : > { %v3368_v20 = vpack.c.bf16 %v1316_v49, %v1315_v19  ;;  %v4333_v22 = vunpack.c.l.b16 %v1506_v34  ;;  %v4335_v24 = vunpack.c.l.b16 %v1507_v13  ;;  %v4337_v6 = vunpack.c.l.b16 %v1522_v9 }
 0x1cd   : > { %v4349_v43 = vunpack.c.l.b16 %v1538_v15  ;;  %v1554_v3 = vpack.c.bf16 %v1490_v57, %v1490_v57  ;;  %v1555_v18 = vpack.c.bf16 %v1491_v27, %v1491_v27  ;;  %v4357_v39 = vunpack.c.l.b16 %v1539_v16 }
 0x1ce   : > { %3399 = vst [vmem:[#allocation2 + $0x10] sm:$0xff] %v3368_v20   ;;  %v4367_v34 = vmul.f32 %v4237_v58, %v4247_v25  ;;  %v4387_v27 = vmul.f32 %v4245_v12, %v4247_v25 }
 0x1cf   : > { %v1306_v54 = vpop.f32.mrf.mxu1  ;;  %v4381_v15 = vunpack.c.l.b16 %v1554_v3  ;;  %v4383_v57 = vunpack.c.l.b16 %v1555_v18 }
 0x1d0   : > { %v1307_v1 = vadd.f32 %v1306_v54, %v1278_v38  ;;  %v4339_v54 = vunpack.c.l.b16 %v1523_v14  ;;  %v4347_v38 = vmul.f32 %v4257_v2, %v4216_v45  ;;  %4763 = vst [vmem:[#allocation23_spill] sm:$0xff] %v4367_v34  ;;  %v4377_v14 = vmul.f32 %v4237_v58, %v4249_v26 }
 0x1d1   : > { %4765 = vst [vmem:[#allocation25_spill] sm:$0xff] %v4387_v27 }
 0x1d2   : > { %v1317_v21 = vmax.f32 %v1307_v1, 0.0  ;;  %4762 = vst [vmem:[#allocation22_spill] sm:$0xff] %v4347_v38 }
 0x1d3   : > { %4764 = vst [vmem:[#allocation24_spill] sm:$0xff] %v4377_v14 }
 0x1d5   : > { %v1339_v10 = vld [vmem:[#allocation2 + $0x10] sm:$0xff]  }
 0x1d6   : > { %v4327_v51 = vunpack.c.l.bf16 %v1339_v10  ;;  %v4329_v5 = vunpack.c.h.bf16 %v1339_v10 }
 0x1d7   : > { %v1308_v40 = vpop.f32.mrf.mxu1 }
 0x1d8   : > { %v1309_v35 = vadd.f32 %v1308_v40, %v1280_v60  ;;  %v1444_v47 = vmul.f32 %v4211_v17, %v4327_v51  ;;  %v1445_v62 = vmul.f32 %v4211_v17, %v4329_v5  ;;  %v1460_v8 = vmul.f32 %v4218_v46, %v4327_v51 }
 0x1d9   : > { %v1461_v45 = vmul.f32 %v4218_v46, %v4329_v5  ;;  %v1476_v1 = vmul.f32 %v4220_v42, %v4327_v51  ;;  %v1477_v13 = vmul.f32 %v4220_v42, %v4329_v5  ;;  %v1492_v40 = vmul.f32 %v4225_v7, %v4327_v51 }
 0x1da   : > { %v1318_v48 = vmax.f32 %v1309_v35, 0.0  ;;  %v1493_v9 = vmul.f32 %v4225_v7, %v4329_v5  ;;  %v1508_v16 = vpack.c.bf16 %v1444_v47, %v1444_v47  ;;  %v4415_v35 = vmul.f32 %v4237_v58, %v4327_v51 }
 0x1db   : > { %v1525_v20 = vpack.c.bf16 %v1461_v45, %v1461_v45  ;;  %v1540_v49 = vpack.c.bf16 %v1476_v1, %v1476_v1  ;;  %v1541_v18 = vpack.c.bf16 %v1477_v13, %v1477_v13  ;;  %v1556_v56 = vpack.c.bf16 %v1492_v40, %v1492_v40 }
 0x1dc   : > { %v3373_v60 = vpack.c.bf16 %v1318_v48, %v1317_v21  ;;  %v1509_v21 = vpack.c.bf16 %v1445_v62, %v1445_v62  ;;  %v1524_v48 = vpack.c.bf16 %v1460_v8, %v1460_v8  ;;  %v1557_v55 = vpack.c.bf16 %v1493_v9, %v1493_v9 }
 0x1dd   : > { %v4405_v45 = vmul.f32 %v4255_v31, %v4247_v25  ;;  %v4409_v1 = vmul.f32 %v4255_v31, %v4249_v26  ;;  %v1732_v40 = vunpack.c.l.b16 %v1508_v16  ;;  %v1749_v4 = vunpack.c.l.b16 %v1525_v20 }
 0x1de   : > { %3400 = vst [vmem:[#allocation2 + $0x18] sm:$0xff] %v3373_v60   ;;  %v4391_v60 = vmul.f32 %v4245_v12, %v4249_v26  ;;  %v1733_v9 = vunpack.c.l.b16 %v1509_v21  ;;  %v1748_v3 = vunpack.c.l.b16 %v1524_v48  ;;  %v1764_v44 = vunpack.c.l.b16 %v1540_v49 }
 0x1df   : > { %v1765_v8 = vunpack.c.l.b16 %v1541_v18  ;;  %v1780_v62 = vunpack.c.l.b16 %v1556_v56  ;;  %v1781_v59 = vunpack.c.l.b16 %v1557_v55 }
 0x1e0   : > { %4766 = vst [vmem:[#allocation26_spill] sm:$0xff] %v4391_v60 }
 0x1e5   : > { %v1341_v13 = vld [vmem:[#allocation2 + $0x18] sm:$0xff]  }
 0x1e6   : > { %v1422_v19 = vunpack.c.l.bf16 %v1341_v13  ;;  %v1423_v52 = vunpack.c.h.bf16 %v1341_v13 }
 0x1e8   : > { %v1446_v10 = vmul.f32 %v4211_v17, %v1422_v19  ;;  %v1447_v16 = vmul.f32 %v4211_v17, %v1423_v52  ;;  %v1462_v21 = vmul.f32 %v4218_v46, %v1422_v19  ;;  %v1463_v48 = vmul.f32 %v4218_v46, %v1423_v52 }
 0x1e9   : > { %v1478_v47 = vmul.f32 %v4220_v42, %v1422_v19  ;;  %v1479_v20 = vmul.f32 %v4220_v42, %v1423_v52  ;;  %v1494_v49 = vmul.f32 %v4225_v7, %v1422_v19  ;;  %v1495_v55 = vmul.f32 %v4225_v7, %v1423_v52 }
 0x1ea   : > { %v1510_v56 = vpack.c.bf16 %v1446_v10, %v1446_v10  ;;  %v1511_v18 = vpack.c.bf16 %v1447_v16, %v1447_v16  ;;  %v1526_v13 = vpack.c.bf16 %v1462_v21, %v1462_v21  ;;  %v1527_v63 = vpack.c.bf16 %v1463_v48, %v1463_v48 }
 0x1eb   : > { %v1542_v50 = vpack.c.bf16 %v1478_v47, %v1478_v47  ;;  %v1543_v61 = vpack.c.bf16 %v1479_v20, %v1479_v20  ;;  %v1558_v0 = vpack.c.bf16 %v1494_v49, %v1494_v49  ;;  %v1559_v17 = vpack.c.bf16 %v1495_v55, %v1495_v55 }
 0x1ec   : > { %v1734_v37 = vunpack.c.l.b16 %v1510_v56  ;;  %v1735_v60 = vunpack.c.l.b16 %v1511_v18  ;;  %v1750_v27 = vunpack.c.l.b16 %v1526_v13  ;;  %v1751_v46 = vunpack.c.l.b16 %v1527_v63 }
 0x1ed   : > { %v1766_v14 = vunpack.c.l.b16 %v1542_v50  ;;  %v1767_v34 = vunpack.c.l.b16 %v1543_v61  ;;  %v1782_v38 = vunpack.c.l.b16 %v1558_v0  ;;  %v1783_v42 = vunpack.c.l.b16 %v1559_v17 }
 0x1ee   : > { %v1791_v30 = vpack.c.b16 %v1735_v60, %v1734_v37  ;;  %v1799_v53 = vpack.c.b16 %v1751_v46, %v1750_v27  ;;  %v1530_v7 = vpack.c.bf16 %v4405_v45, %v4405_v45  ;;  %v4429_v10 = vmul.f32 %v4257_v2, %v4247_v25 }
 0x1ef   : > { %v1807_v47 = vpack.c.b16 %v1767_v34, %v1766_v14  ;;  %v1815_v16 = vpack.c.b16 %v1783_v42, %v1782_v38  ;;  %v1790_v21 = vpack.c.b16 %v1733_v9, %v1732_v40  ;;  %v4433_v48 = vmul.f32 %v4257_v2, %v4249_v26 }
 0x1f0   : > { %1848 = vmatpush.bf16.msrb.mxu2 %v1791_v30  ;;  %1877 = vmatpush.bf16.msrb.mxu3 %v1799_v53  ;;  %v1798_v0 = vpack.c.b16 %v1749_v4, %v1748_v3  ;;  %v1806_v61 = vpack.c.b16 %v1765_v8, %v1764_v44  ;;  %v1437_v37 = vmul.f32 %v4237_v58, %v4329_v5 }
 0x1f1   : > { %1906 = vmatpush.bf16.msra.mxu0 %v1807_v47  ;;  %1935 = vmatpush.bf16.msra.mxu1 %v1815_v16  ;;  %v1814_v50 = vpack.c.b16 %v1781_v59, %v1780_v62  ;;  %v1500_v25 = vpack.c.bf16 %v4415_v35, %v4415_v35  ;;  %v1452_v63 = vmul.f32 %v4245_v12, %v4327_v51 }
 0x1f2   : > { %v1438_v38 = vmul.f32 %v4237_v58, %v1422_v19  ;;  %v1439_v26 = vmul.f32 %v4237_v58, %v1423_v52  ;;  %v1454_v53 = vmul.f32 %v4245_v12, %v1422_v19  ;;  %v1455_v44 = vmul.f32 %v4245_v12, %v1423_v52 }
 0x1f3   : > { %v1470_v4 = vmul.f32 %v4255_v31, %v1422_v19  ;;  %v1471_v30 = vmul.f32 %v4255_v31, %v1423_v52  ;;  %v1486_v59 = vmul.f32 %v4257_v2, %v1422_v19  ;;  %v1487_v34 = vmul.f32 %v4257_v2, %v1423_v52 }
 0x1f4   : > { %1849 = vmatpush.bf16.msrb.mxu2 %v1790_v21  ;;  %1878 = vmatpush.bf16.msrb.mxu3 %v1798_v0  ;;  %v1501_v14 = vpack.c.bf16 %v1437_v37, %v1437_v37  ;;  %v1453_v35 = vmul.f32 %v4245_v12, %v4329_v5  ;;  %v1468_v58 = vmul.f32 %v4255_v31, %v4327_v51 }
 0x1f5   : > { %1907 = vmatpush.bf16.msra.mxu0 %v1806_v61  ;;  %1936 = vmatpush.bf16.msra.mxu1 %v1814_v50  ;;  %v1469_v27 = vmul.f32 %v4255_v31, %v4329_v5  ;;  %v1484_v60 = vmul.f32 %v4257_v2, %v4327_v51  ;;  %v1485_v52 = vmul.f32 %v4257_v2, %v4329_v5 }
 0x1f6   : > { %v1502_v19 = vpack.c.bf16 %v1438_v38, %v1438_v38  ;;  %v1503_v3 = vpack.c.bf16 %v1439_v26, %v1439_v26  ;;  %v1518_v62 = vpack.c.bf16 %v1454_v53, %v1454_v53  ;;  %v1519_v8 = vpack.c.bf16 %v1455_v44, %v1455_v44  ;;  %v4776_v53 = vld [vmem:[#allocation21_spill] sm:$0xff]  ;;  %v4778_v44 = vld [vmem:[#allocation23_spill] sm:$0xff] }
 0x1f7   : > { %v1534_v40 = vpack.c.bf16 %v1470_v4, %v1470_v4  ;;  %v1535_v12 = vpack.c.bf16 %v1471_v30, %v1471_v30  ;;  %v1550_v9 = vpack.c.bf16 %v1486_v59, %v1486_v59  ;;  %v1551_v20 = vpack.c.bf16 %v1487_v34, %v1487_v34  ;;  %v4780_v59 = vld [vmem:[#allocation24_spill] sm:$0xff] }
 0x1f8   : > { %v4767_v49 = vpack.c.b16 %v4335_v24, %v4333_v22  ;;  %v4768_v31 = vpack.c.b16 %v4339_v54, %v4337_v6  ;;  %v1516_v51 = vpack.c.bf16 %v1452_v63, %v1452_v63  ;;  %v1517_v55 = vpack.c.bf16 %v1453_v35, %v1453_v35  ;;  %v4782_v35 = vld [vmem:[#allocation25_spill] sm:$0xff] }
 0x1f9   : > { %v1532_v56 = vpack.c.bf16 %v1468_v58, %v1468_v58  ;;  %v4769_v2 = vpack.c.b16 %v4357_v39, %v4349_v43  ;;  %v4770_v5 = vpack.c.b16 %v4383_v57, %v4381_v15  ;;  %v1533_v18 = vpack.c.bf16 %v1469_v27, %v1469_v27 }
 0x1fa   : > { %1850 = vmatpush.bf16.msrb.mxu2 %v4767_v49  ;;  %1879 = vmatpush.bf16.msrb.mxu3 %v4768_v31  ;;  %v1548_v13 = vpack.c.bf16 %v1484_v60, %v1484_v60  ;;  %v1549_v17 = vpack.c.bf16 %v1485_v52, %v1485_v52  ;;  %v1726_v22 = vunpack.c.l.b16 %v1502_v19  ;;  %v1727_v24 = vunpack.c.l.b16 %v1503_v3  ;;  %v4784_v60 = vld [vmem:[#allocation26_spill] sm:$0xff]  ;;  %v4786_v31 = vld [vmem:[#allocation15_spill] sm:$0xff] }
 0x1fb   : > { %1908 = vmatpush.bf16.msra.mxu0 %v4769_v2  ;;  %1937 = vmatpush.bf16.msra.mxu1 %v4770_v5  ;;  %v1742_v46 = vunpack.c.l.b16 %v1518_v62  ;;  %v1743_v42 = vunpack.c.l.b16 %v1519_v8  ;;  %v1758_v6 = vunpack.c.l.b16 %v1534_v40  ;;  %v1759_v54 = vunpack.c.l.b16 %v1535_v12 }
 0x1fc   : > { %v1774_v47 = vunpack.c.l.b16 %v1550_v9  ;;  %v1775_v16 = vunpack.c.l.b16 %v1551_v20  ;;  %v4771_v21 = vpack.c.b16 %v4251_v28, %v4243_v23  ;;  %v4772_v43 = vpack.c.b16 %v4259_v32, %v4253_v29 }
 0x1fd   : > { %v1531_v39 = vpack.c.bf16 %v4409_v1, %v4409_v1  ;;  %v1546_v15 = vpack.c.bf16 %v4429_v10, %v4429_v10  ;;  %v1547_v57 = vpack.c.bf16 %v4433_v48, %v4433_v48  ;;  %v4773_v0 = vpack.c.b16 %v4263_v36, %v4261_v33  ;;  %v4775_v33 = vld [vmem:[#allocation20_spill] sm:$0xff] }
 0x1fe   : > { %1851 = vmatpush.bf16.msrb.mxu2 %v4771_v21  ;;  %1880 = vmatpush.bf16.msrb.mxu3 %v4772_v43  ;;  %v4774_v23 = vpack.c.b16 %v4291_v41, %v4285_v11  ;;  %v1724_v28 = vunpack.c.l.b16 %v1500_v25  ;;  %v1725_v29 = vunpack.c.l.b16 %v1501_v14  ;;  %v1740_v32 = vunpack.c.l.b16 %v1516_v51  ;;  %v4777_v41 = vld [vmem:[#allocation22_spill] sm:$0xff] }
 0x1ff   : > { %1909 = vmatpush.bf16.msra.mxu0 %v4773_v0  ;;  %v1741_v61 = vunpack.c.l.b16 %v1517_v55  ;;  %v1787_v37 = vpack.c.b16 %v1727_v24, %v1726_v22  ;;  %v1795_v1 = vpack.c.b16 %v1743_v42, %v1742_v46  ;;  %v1756_v50 = vunpack.c.l.b16 %v1532_v56  ;;  %v4788_v56 = vld [vmem:[#allocation16_spill] sm:$0xff]  ;;  %v4794_v42 = vld [vmem:[#allocation19_spill] sm:$0xff]  ;;  %v3267_v0 = vld [vmem:[%s4720_s0 + $0x4] sm:$0xf] }
 0x200   : > { %1938 = vmatpush.bf16.msra.mxu1 %v4774_v23  ;;  %v1757_v63 = vunpack.c.l.b16 %v1533_v18  ;;  %v1803_v10 = vpack.c.b16 %v1759_v54, %v1758_v6  ;;  %v1811_v38 = vpack.c.b16 %v1775_v16, %v1774_v47  ;;  %v1772_v26 = vunpack.c.l.b16 %v1548_v13  ;;  %v4790_v18 = vld [vmem:[#allocation17_spill] sm:$0xff]  ;;  %v4792_v13 = vld [vmem:[#allocation18_spill] sm:$0xff]  ;;  %v2939_v23 = vld [vmem:[%s4720_s0 + $0x10] sm:$0xf0] }
 0x201   : > { %v1773_v48 = vunpack.c.l.b16 %v1549_v17  ;;  %v1529_v36 = vpack.c.bf16 %v4775_v33, %v4775_v33  ;;  %v1544_v11 = vpack.c.bf16 %v4776_v53, %v4776_v53  ;;  %v1545_v25 = vpack.c.bf16 %v4777_v41, %v4777_v41  ;;  %v3290_v33 = vld [vmem:[#allocation5 + $0xb8] sm:$0xff]  ;;  %v3288_v53 = vld [vmem:[#allocation5 + $0xa8] sm:$0xff] }
 0x202   : > { %1852 = vmatpush.bf16.msrb.mxu2 %v1787_v37  ;;  %1881 = vmatpush.bf16.msrb.mxu3 %v1795_v1  ;;  %v4779_v4 = vpack.c.bf16 %v4778_v44, %v4778_v44  ;;  %v4781_v34 = vpack.c.bf16 %v4780_v59, %v4780_v59  ;;  %v4783_v58 = vpack.c.bf16 %v4782_v35, %v4782_v35  ;;  %v1754_v8 = vunpack.c.l.b16 %v1530_v7  ;;  %v3273_v41 = vld [vmem:[%s4720_s0 + $0x2c] sm:$0xf0]  ;;  %v2955_v44 = vld [vmem:[%s4720_s0 + $0x30] sm:$0xf0]  ;;  %v3272_v59 = vld [vmem:[%s4720_s0 + $0x2c] sm:$0xf] }
 0x203   : > { %1910 = vmatpush.bf16.msra.mxu0 %v1803_v10  ;;  %v4785_v52 = vpack.c.bf16 %v4784_v60, %v4784_v60  ;;  %v1786_v3 = vpack.c.b16 %v1725_v29, %v1724_v28  ;;  %v1794_v62 = vpack.c.b16 %v1741_v61, %v1740_v32  ;;  %v1755_v40 = vunpack.c.l.b16 %v1531_v39  ;;  %v2945_v28 = vld [vmem:[%s4720_s0 + $0x8] sm:$0xf]  ;;  %v3270_v29 = vld [vmem:[%s4720_s0 + $0x14] sm:$0xf0]  ;;  %v3268_v32 = vld [vmem:[%s4720_s0 + $0xc] sm:$0xf] }
 0x204   : > { %1939 = vmatpush.bf16.msra.mxu1 %v1811_v38  ;;  %v1722_v30 = vunpack.c.l.b16 %v4779_v4  ;;  %v1723_v14 = vunpack.c.l.b16 %v4781_v34  ;;  %v1738_v27 = vunpack.c.l.b16 %v4783_v58  ;;  %v1802_v12 = vpack.c.b16 %v1757_v63, %v1756_v50  ;;  %v2947_v61 = vld [vmem:[%s4720_s0 + $0x18] sm:$0xf0]  ;;  %v2961_v4 = vld [vmem:[%s4720_s0 + $0x28] sm:$0xf] }
 0x205   : > { %v1739_v19 = vunpack.c.l.b16 %v4785_v52  ;;  %v1810_v9 = vpack.c.b16 %v1773_v48, %v1772_v26  ;;  %v1770_v20 = vunpack.c.l.b16 %v1546_v15  ;;  %v1771_v49 = vunpack.c.l.b16 %v1547_v57  ;;  %v2937_v15 = vld [vmem:[%s4720_s0] sm:$0xf]  ;;  %v3269_v57 = vld [vmem:[%s4720_s0 + $0xc] sm:$0xf0]  ;;  %v2963_v34 = vld [vmem:[%s4720_s0 + $0x38] sm:$0xf0] }
 0x206   : > { %1853 = vmatpush.bf16.msrb.mxu2 %v1786_v3  ;;  %1882 = vmatpush.bf16.msrb.mxu3 %v1794_v62  ;;  %v4787_v51 = vpack.c.bf16 %v4786_v31, %v4786_v31  ;;  %v4789_v2 = vpack.c.bf16 %v4788_v56, %v4788_v56  ;;  %v4791_v45 = vpack.c.bf16 %v4790_v18, %v4790_v18  ;;  %v1753_v47 = vunpack.c.l.b16 %v1529_v36  ;;  %v3289_v36 = vld [vmem:[#allocation5 + $0xb0] sm:$0xff]  ;;  %v3286_v52 = vld [vmem:[#allocation5 + $0x98] sm:$0xff]  ;;  %v3284_v3 = vld [vmem:[#allocation5 + $0x88] sm:$0xff] }
 0x207   : > { %1911 = vmatpush.bf16.msra.mxu0 %v1802_v12  ;;  %v4793_v17 = vpack.c.bf16 %v4792_v13, %v4792_v13  ;;  %v1785_v24 = vpack.c.b16 %v1723_v14, %v1722_v30  ;;  %v1793_v46 = vpack.c.b16 %v1739_v19, %v1738_v27  ;;  %v4795_v6 = vpack.c.bf16 %v4794_v42, %v4794_v42  ;;  %v3274_v30 = vld [vmem:[%s4720_s0 + $0x34] sm:$0xf0]  ;;  %v3287_v14 = vld [vmem:[#allocation5 + $0xa0] sm:$0xff]  ;;  %v2969_v62 = vld [vmem:[%s4720_s0 + $0x40] sm:$0xf] }
 0x208   : > { %1940 = vmatpush.bf16.msra.mxu1 %v1810_v9  ;;  %v1720_v55 = vunpack.c.l.b16 %v4787_v51  ;;  %v1721_v5 = vunpack.c.l.b16 %v4789_v2  ;;  %v1736_v7 = vunpack.c.l.b16 %v4791_v45  ;;  %v1801_v16 = vpack.c.b16 %v1755_v40, %v1754_v8  ;;  %v3285_v19 = vld [vmem:[#allocation5 + $0x90] sm:$0xff]  ;;  %v3277_v8 = vld [vmem:[%s4720_s0 + $0x4c] sm:$0xf0]  ;;  %v3275_v40 = vld [vmem:[%s4720_s0 + $0x44] sm:$0xf] }
 0x209   : > { %v1737_v22 = vunpack.c.l.b16 %v4793_v17  ;;  %v1752_v54 = vunpack.c.l.b16 %v4795_v6  ;;  %v1809_v21 = vpack.c.b16 %v1771_v49, %v1770_v20  ;;  %v1768_v43 = vunpack.c.l.b16 %v1544_v11  ;;  %v2953_v11 = vld [vmem:[%s4720_s0 + $0x20] sm:$0xf]  ;;  %v2971_v12 = vld [vmem:[%s4720_s0 + $0x50] sm:$0xf0]  ;;  %v2977_v9 = vld [vmem:[%s4720_s0 + $0x48] sm:$0xf] }
 0x20a   : > { %v1769_v39 = vunpack.c.l.b16 %v1545_v25  ;;  %1854 = vmatpush.bf16.msrb.mxu2 %v1785_v24  ;;  %1883 = vmatpush.bf16.msrb.mxu3 %v1793_v46  ;;  %v1784_v37 = vpack.c.b16 %v1721_v5, %v1720_v55  ;;  %v2938_v10 = vor.u32 %v3269_v57, %v2937_v15  ;;  %v2942_v38 = vor.u32 %v3267_v0, %v2939_v23  ;;  %v3271_v25 = vld [vmem:[%s4720_s0 + $0x24] sm:$0xf]  ;;  %v3278_v20 = vld [vmem:[%s4720_s0 + $0x54] sm:$0xf0]  ;;  %v3276_v49 = vld [vmem:[%s4720_s0 + $0x4c] sm:$0xf] }
 0x20b   : > { %1912 = vmatpush.bf16.msra.mxu0 %v1801_v16  ;;  %v1792_v1 = vpack.c.b16 %v1737_v22, %v1736_v7  ;;  %v1800_v50 = vpack.c.b16 %v1753_v47, %v1752_v54  ;;  %v2946_v26 = vor.u32 %v3270_v29, %v2945_v28  ;;  %v2950_v48 = vor.u32 %v3268_v32, %v2947_v61  ;;  %v2979_v31 = vld [vmem:[%s4720_s0 + $0x58] sm:$0xf0]  ;;  %v3283_v51 = vld [vmem:[#allocation5 + $0x80] sm:$0xff]  ;;  %v2985_v18 = vld [vmem:[%s4720_s0 + $0x60] sm:$0xf] }
 0x20c   : > { %1941 = vmatpush.bf16.msra.mxu1 %v1809_v21  ;;  %v1808_v63 = vpack.c.b16 %v1769_v39, %v1768_v43  ;;  %v2954_v35 = vor.u32 %v3273_v41, %v2953_v11  ;;  %v2958_v58 = vor.u32 %v3271_v25, %v2955_v44  ;;  %v2962_v27 = vor.u32 %v3274_v30, %v2961_v4  ;;  %v3281_v45 = vld [vmem:[%s4720_s0 + $0x6c] sm:$0xf0]  ;;  %v3279_v7 = vld [vmem:[%s4720_s0 + $0x64] sm:$0xf]  ;;  %v2987_v13 = vld [vmem:[%s4720_s0 + $0x70] sm:$0xf0] }
 0x20d   : > { %v2966_v60 = vor.u32 %v3272_v59, %v2963_v34  ;;  %v2970_v55 = vor.u32 %v3277_v8, %v2969_v62  ;;  %v2974_v56 = vor.u32 %v3275_v40, %v2971_v12  ;;  %v2978_v2 = vor.u32 %v3278_v20, %v2977_v9  ;;  %v2993_v17 = vld [vmem:[%s4720_s0 + $0x68] sm:$0xf]  ;;  %v3282_v22 = vld [vmem:[%s4720_s0 + $0x74] sm:$0xf0]  ;;  %v3280_v24 = vld [vmem:[%s4720_s0 + $0x6c] sm:$0xf] }
 0x20e   : > { %1855 = vmatpush.bf16.msrb.mxu2 %v1784_v37  ;;  %1884 = vmatpush.bf16.msrb.mxu3 %v1792_v1  ;;  %v2982_v5 = vor.u32 %v3276_v49, %v2979_v31  ;;  %v2995_v46 = vld [vmem:[%s4720_s0 + $0x78] sm:$0xf0]  ;;  %v2986_v42 = vor.u32 %v3281_v45, %v2985_v18  ;;  %v2990_v6 = vor.u32 %v3279_v7, %v2987_v13  ;;  %v3263_v16 = vld [vmem:[#allocation2] sm:$0xff]  ;;  %v3264_v21 = vld [vmem:[#allocation2 + $0x8] sm:$0xff] }
 0x20f   : > { %1913 = vmatpush.bf16.msra.mxu0 %v1800_v50  ;;  %v2994_v54 = vor.u32 %v3282_v22, %v2993_v17  ;;  %v2998_v47 = vor.u32 %v3280_v24, %v2995_v46  ;;  %v3298_v43 = vld [vmem:[#allocation5 + $0xf8] sm:$0xff]  ;;  %v3297_v39 = vld [vmem:[#allocation5 + $0xf0] sm:$0xff]  ;;  %v3265_v15 = vld [vmem:[#allocation2 + $0x10] sm:$0xff] }
 0x210   : > { %1942 = vmatpush.bf16.msra.mxu1 %v1808_v63  ;;  %v3296_v57 = vld [vmem:[#allocation5 + $0xe8] sm:$0xff]  ;;  %v3295_v0 = vld [vmem:[#allocation5 + $0xe0] sm:$0xff]  ;;  %v3266_v23 = vld [vmem:[#allocation2 + $0x18] sm:$0xff] }
 0x211   : > { %1856 = vmatmul.bf16.vlgmr.msrb.gmra.mxu2 %v2938_v10  ;;  %1885 = vmatmul.bf16.vlgmr.msrb.gmra.mxu3 %v2942_v38  ;;  %v3294_v28 = vld [vmem:[#allocation5 + $0xd8] sm:$0xff]  ;;  %v3293_v29 = vld [vmem:[#allocation5 + $0xd0] sm:$0xff]  ;;  %v3292_v32 = vld [vmem:[#allocation5 + $0xc8] sm:$0xff] }
 0x212   : > { %1914 = vmatmul.bf16.vlgmr.msra.gmra.mxu0 %v2946_v26  ;;  %2154 = vmatpush.bf16.msra.mxu2 %v3290_v33  ;;  %v3291_v61 = vld [vmem:[#allocation5 + $0xc0] sm:$0xff]  ;;  %v3494_v41 = vld [vmem:[%s3872_s19 + $0x8] sm:$0xff] }
 0x213   : > { %1943 = vmatmul.bf16.vlgmr.msra.gmra.mxu1 %v2950_v48  ;;  %2183 = vmatpush.bf16.msra.mxu3 %v3298_v43  ;;  %v3493_v10 = vld [vmem:[%s3872_s19] sm:$0xff] }
 0x214   : > { %v3497_v46 = vld [vmem:[%s3872_s19 + $0x20] sm:$0xff] }
 0x216   : > { %2155 = vmatpush.bf16.msra.mxu2 %v3289_v36 }
 0x217   : > { %2184 = vmatpush.bf16.msra.mxu3 %v3297_v39 }
 0x21a   : > { %2156 = vmatpush.bf16.msra.mxu2 %v3288_v53 }
 0x21b   : > { %2185 = vmatpush.bf16.msra.mxu3 %v3296_v57  ;;  %v3498_v57 = vld [vmem:[%s3872_s19 + $0x28] sm:$0xff] }
 0x21e   : > { %2157 = vmatpush.bf16.msra.mxu2 %v3287_v14 }
 0x21f   : > { %2186 = vmatpush.bf16.msra.mxu3 %v3295_v0 }
 0x221   : > { %1861 = vmatmul.bf16.gmra.mxu2 %v2954_v35  ;;  %1890 = vmatmul.bf16.gmra.mxu3 %v2958_v58 }
 0x222   : > { %1919 = vmatmul.bf16.gmra.mxu0 %v2962_v27  ;;  %2158 = vmatpush.bf16.msra.mxu2 %v3286_v52  ;;  %v3495_v52 = vld [vmem:[%s3872_s19 + $0x10] sm:$0xff] }
 0x223   : > { %1948 = vmatmul.bf16.gmra.mxu1 %v2966_v60  ;;  %2187 = vmatpush.bf16.msra.mxu3 %v3294_v28 }
 0x226   : > { %2159 = vmatpush.bf16.msra.mxu2 %v3285_v19 }
 0x227   : > { %2188 = vmatpush.bf16.msra.mxu3 %v3293_v29 }
 0x22a   : > { %2160 = vmatpush.bf16.msra.mxu2 %v3284_v3 }
 0x22b   : > { %2189 = vmatpush.bf16.msra.mxu3 %v3292_v32 }
 0x22e   : > { %2161 = vmatpush.bf16.msra.mxu2 %v3283_v51  ;;  %v3496_v51 = vld [vmem:[%s3872_s19 + $0x18] sm:$0xff] }
 0x22f   : > { %2190 = vmatpush.bf16.msra.mxu3 %v3291_v61 }
 0x231   : > { %1866 = vmatmul.bf16.gmra.mxu2 %v2970_v55  ;;  %1895 = vmatmul.bf16.gmra.mxu3 %v2974_v56 }
 0x232   : > { %1924 = vmatmul.bf16.gmra.mxu0 %v2978_v2 }
 0x233   : > { %1953 = vmatmul.bf16.gmra.mxu1 %v2982_v5 }
 0x241   : > { %1871 = vmatmul.bf16.gmra.mxu2 %v2986_v42  ;;  %1900 = vmatmul.bf16.gmra.mxu3 %v2990_v6 }
 0x242   : > { %1929 = vmatmul.bf16.gmra.mxu0 %v2994_v54 }
 0x243   : > { %1958 = vmatmul.bf16.gmra.mxu1 %v2998_v47 }
 0x251   : > { %2162 = vmatmul.bf16.vlgmr.msra.gmra.mxu2 %v3263_v16 }
 0x261   : > { %2167 = vmatmul.bf16.gmra.mxu2 %v3264_v21 }
 0x271   : > { %2172 = vmatmul.bf16.gmra.mxu2 %v3265_v15 }
 0x281   : > { %2177 = vmatmul.bf16.gmra.mxu2 %v3266_v23 }
 0x28f   : > { %v1915_v37 = vpop.f32.mrf.mxu0 }
 0x290   : > { %v1944_v1 = vpop.f32.mrf.mxu1 }
 0x294   : > { %v1857_v50 = vpop.f32.mrf.mxu2  ;;  %v1886_v63 = vpop.f32.mrf.mxu3 }
 0x295   : > { %v1858_v38 = vadd.f32 %v3493_v10, %v1857_v50  ;;  %v3499_v10 = vld [vmem:[%s3872_s19 + $0x30] sm:$0xff] }
 0x297   : > { %v1887_v26 = vadd.f32 %v1886_v63, %v1858_v38  ;;  %v1917_v48 = vpop.f32.mrf.mxu0 }
 0x298   : > { %v1946_v33 = vpop.f32.mrf.mxu1 }
 0x299   : > { %v1916_v36 = vadd.f32 %v1915_v37, %v1887_v26 }
 0x29b   : > { %v1945_v44 = vadd.f32 %v1944_v1, %v1916_v36 }
 0x29c   : > { %v1859_v53 = vpop.f32.mrf.mxu2  ;;  %v1888_v11 = vpop.f32.mrf.mxu3 }
 0x29d   : > { %v1860_v25 = vadd.f32 %v3494_v41, %v1859_v53  ;;  %v1964_v14 = vpack.c.bf16 %v1945_v44, %v1945_v44  ;;  %v3500_v44 = vld [vmem:[%s3872_s19 + $0x38] sm:$0xff] }
 0x29f   : > { %v1889_v4 = vadd.f32 %v1888_v11, %v1860_v25  ;;  %v1920_v30 = vpop.f32.mrf.mxu0  ;;  %v2004_v3 = vunpack.c.l.b16 %v1964_v14 }
 0x2a0   : > { %v1949_v59 = vpop.f32.mrf.mxu1 }
 0x2a1   : > { %v1918_v34 = vadd.f32 %v1917_v48, %v1889_v4 }
 0x2a3   : > { %v1947_v35 = vadd.f32 %v1946_v33, %v1918_v34 }
 0x2a4   : > { %v1862_v58 = vpop.f32.mrf.mxu2  ;;  %v1891_v27 = vpop.f32.mrf.mxu3 }
 0x2a5   : > { %v1965_v60 = vpack.c.bf16 %v1947_v35, %v1947_v35  ;;  %v1863_v19 = vadd.f32 %v3495_v52, %v1862_v58 }
 0x2a7   : > { %v2005_v62 = vunpack.c.l.b16 %v1965_v60  ;;  %v1892_v8 = vadd.f32 %v1891_v27, %v1863_v19  ;;  %v1922_v40 = vpop.f32.mrf.mxu0 }
 0x2a8   : > { %v1951_v9 = vpop.f32.mrf.mxu1 }
 0x2a9   : > { %v2012_v12 = vpack.c.b16 %v2005_v62, %v2004_v3  ;;  %v1921_v20 = vadd.f32 %v1920_v30, %v1892_v8  ;;  %v3153_v8 = vld [vmem:[#allocation8 + $0x70] sm:$0xf] }
 0x2ab   : > { %2191 = vmatmul.bf16.vlgmr.msra.gmra.mxu3 %v2012_v12  ;;  %v1950_v56 = vadd.f32 %v1949_v59, %v1921_v20  ;;  %v3317_v12 = vld [vmem:[#allocation8 + $0x74] sm:$0xf]  ;;  %v3155_v20 = vld [vmem:[#allocation8 + $0x78] sm:$0xf0] }
 0x2ac   : > { %v1864_v49 = vpop.f32.mrf.mxu2  ;;  %v1893_v31 = vpop.f32.mrf.mxu3 }
 0x2ad   : > { %v1865_v55 = vadd.f32 %v3496_v51, %v1864_v49  ;;  %v1966_v45 = vpack.c.bf16 %v1950_v56, %v1950_v56  ;;  %v3145_v49 = vld [vmem:[#allocation8 + $0x60] sm:$0xf]  ;;  %v3158_v51 = vor.u32 %v3317_v12, %v3155_v20  ;;  %v3147_v56 = vld [vmem:[#allocation8 + $0x68] sm:$0xf0] }
 0x2af   : > { %v1894_v2 = vadd.f32 %v1893_v31, %v1865_v55  ;;  %v1925_v18 = vpop.f32.mrf.mxu0  ;;  %v2006_v6 = vunpack.c.l.b16 %v1966_v45  ;;  %v3316_v31 = vld [vmem:[#allocation8 + $0x64] sm:$0xf0]  ;;  %v3315_v55 = vld [vmem:[#allocation8 + $0x64] sm:$0xf]  ;;  %2399 = vmatpush.bf16.msrb.mxu1 %v3158_v51  ;;  %v3314_v45 = vld [vmem:[#allocation8 + $0x54] sm:$0xf0] }
 0x2b0   : > { %v1954_v13 = vpop.f32.mrf.mxu1 }
 0x2b1   : > { %v1923_v5 = vadd.f32 %v1922_v40, %v1894_v2  ;;  %v3318_v40 = vld [vmem:[#allocation8 + $0x74] sm:$0xf0]  ;;  %v3146_v2 = vor.u32 %v3316_v31, %v3145_v49 }
 0x2b3   : > { %v1952_v7 = vadd.f32 %v1951_v9, %v1923_v5  ;;  %v3154_v9 = vor.u32 %v3318_v40, %v3153_v8  ;;  %v3150_v5 = vor.u32 %v3315_v55, %v3147_v56 }
 0x2b4   : > { %v1867_v17 = vpop.f32.mrf.mxu2  ;;  %v1896_v22 = vpop.f32.mrf.mxu3 }
 0x2b5   : > { %v1967_v24 = vpack.c.bf16 %v1952_v7, %v1952_v7  ;;  %v1868_v42 = vadd.f32 %v3497_v46, %v1867_v17  ;;  %2370 = vmatpush.bf16.msrb.mxu0 %v3154_v9  ;;  %2400 = vmatpush.bf16.msrb.mxu1 %v3150_v5  ;;  %v3313_v7 = vld [vmem:[#allocation8 + $0x54] sm:$0xf]  ;;  %v3139_v17 = vld [vmem:[#allocation8 + $0x58] sm:$0xf0] }
 0x2b6   : > { %v3142_v46 = vor.u32 %v3313_v7, %v3139_v17  ;;  %v3326_v17 = vld [vmem:[%s4725_s5 + $0x38] sm:$0xff] }
 0x2b7   : > { %v2007_v54 = vunpack.c.l.b16 %v1967_v24  ;;  %v1897_v47 = vadd.f32 %v1896_v22, %v1868_v42  ;;  %v1927_v43 = vpop.f32.mrf.mxu0  ;;  %v3129_v22 = vld [vmem:[#allocation8 + $0x40] sm:$0xf]  ;;  %v3312_v24 = vld [vmem:[#allocation8 + $0x44] sm:$0xf0]  ;;  %v3311_v42 = vld [vmem:[#allocation8 + $0x44] sm:$0xf]  ;;  %2580 = vmatpush.bf16.msrb.mxu2 %v3326_v17 }
 0x2b8   : > { %v1956_v23 = vpop.f32.mrf.mxu1 }
 0x2b9   : > { %v2013_v16 = vpack.c.b16 %v2007_v54, %v2006_v6  ;;  %v1926_v21 = vadd.f32 %v1925_v18, %v1897_v47  ;;  %2371 = vmatpush.bf16.msrb.mxu0 %v3146_v2  ;;  %v3137_v18 = vld [vmem:[#allocation8 + $0x50] sm:$0xf]  ;;  %v3131_v6 = vld [vmem:[#allocation8 + $0x48] sm:$0xf0]  ;;  %v3130_v54 = vor.u32 %v3312_v24, %v3129_v22  ;;  %2401 = vmatpush.bf16.msrb.mxu1 %v3142_v46 }
 0x2ba   : > { %v3134_v47 = vor.u32 %v3311_v42, %v3131_v6  ;;  %v3334_v22 = vld [vmem:[%s4725_s5 + $0x78] sm:$0xff]  ;;  %v3325_v42 = vld [vmem:[%s4725_s5 + $0x30] sm:$0xff] }
 0x2bb   : > { %2196 = vmatmul.bf16.gmra.mxu3 %v2013_v16  ;;  %v1955_v28 = vadd.f32 %v1954_v13, %v1926_v21  ;;  %v3138_v13 = vor.u32 %v3314_v45, %v3137_v18  ;;  %v3121_v21 = vld [vmem:[#allocation8 + $0x30] sm:$0xf]  ;;  %v3333_v6 = vld [vmem:[%s4725_s5 + $0x70] sm:$0xff]  ;;  %2581 = vmatpush.bf16.msrb.mxu2 %v3325_v42 }
 0x2bc   : > { %v1869_v39 = vpop.f32.mrf.mxu2  ;;  %v1898_v15 = vpop.f32.mrf.mxu3  ;;  %2609 = vmatpush.bf16.msrb.mxu3 %v3334_v22 }
 0x2bd   : > { %v1870_v0 = vadd.f32 %v3498_v57, %v1869_v39  ;;  %v1968_v61 = vpack.c.bf16 %v1955_v28, %v1955_v28  ;;  %2372 = vmatpush.bf16.msrb.mxu0 %v3138_v13  ;;  %2402 = vmatpush.bf16.msrb.mxu1 %v3134_v47  ;;  %v3309_v39 = vld [vmem:[#allocation8 + $0x34] sm:$0xf]  ;;  %v3123_v57 = vld [vmem:[#allocation8 + $0x38] sm:$0xf0] }
 0x2be   : > { %v3126_v28 = vor.u32 %v3309_v39, %v3123_v57  ;;  %v3331_v57 = vld [vmem:[%s4725_s5 + $0x60] sm:$0xff] }
 0x2bf   : > { %v1899_v29 = vadd.f32 %v1898_v15, %v1870_v0  ;;  %v1930_v26 = vpop.f32.mrf.mxu0  ;;  %v2008_v48 = vunpack.c.l.b16 %v1968_v61  ;;  %v3113_v0 = vld [vmem:[#allocation8 + $0x20] sm:$0xf] }
 0x2c0   : > { %v1959_v53 = vpop.f32.mrf.mxu1  ;;  %2610 = vmatpush.bf16.msrb.mxu3 %v3333_v6 }
 0x2c1   : > { %v1928_v32 = vadd.f32 %v1927_v43, %v1899_v29  ;;  %2373 = vmatpush.bf16.msrb.mxu0 %v3130_v54  ;;  %v3310_v43 = vld [vmem:[#allocation8 + $0x34] sm:$0xf0]  ;;  %v3307_v29 = vld [vmem:[#allocation8 + $0x24] sm:$0xf]  ;;  %2403 = vmatpush.bf16.msrb.mxu1 %v3126_v28 }
 0x2c2   : > { %v3122_v15 = vor.u32 %v3310_v43, %v3121_v21  ;;  %v3324_v21 = vld [vmem:[%s4725_s5 + $0x28] sm:$0xff] }
 0x2c3   : > { %v1957_v37 = vadd.f32 %v1956_v23, %v1928_v32  ;;  %v3308_v23 = vld [vmem:[#allocation8 + $0x24] sm:$0xf0]  ;;  %v3115_v32 = vld [vmem:[#allocation8 + $0x28] sm:$0xf0]  ;;  %v3332_v43 = vld [vmem:[%s4725_s5 + $0x68] sm:$0xff]  ;;  %2582 = vmatpush.bf16.msrb.mxu2 %v3324_v21 }
 0x2c4   : > { %v1872_v1 = vpop.f32.mrf.mxu2  ;;  %v1901_v50 = vpop.f32.mrf.mxu3  ;;  %v3114_v61 = vor.u32 %v3308_v23, %v3113_v0  ;;  %2611 = vmatpush.bf16.msrb.mxu3 %v3332_v43 }
 0x2c5   : > { %v1969_v63 = vpack.c.bf16 %v1957_v37, %v1957_v37  ;;  %v1873_v38 = vadd.f32 %v3499_v10, %v1872_v1  ;;  %2374 = vmatpush.bf16.msrb.mxu0 %v3122_v15  ;;  %v3118_v37 = vor.u32 %v3307_v29, %v3115_v32  ;;  %v3105_v1 = vld [vmem:[#allocation8 + $0x10] sm:$0xf]  ;;  %v3107_v10 = vld [vmem:[#allocation8 + $0x18] sm:$0xf0] }
 0x2c6   : > { %v3323_v15 = vld [vmem:[%s4725_s5 + $0x20] sm:$0xff] }
 0x2c7   : > { %v2009_v33 = vunpack.c.l.b16 %v1969_v63  ;;  %v1902_v36 = vadd.f32 %v1901_v50, %v1873_v38  ;;  %v1932_v14 = vpop.f32.mrf.mxu0  ;;  %v3306_v50 = vld [vmem:[#allocation8 + $0x14] sm:$0xf0]  ;;  %v3305_v63 = vld [vmem:[#allocation8 + $0x14] sm:$0xf]  ;;  %2404 = vmatpush.bf16.msrb.mxu1 %v3118_v37  ;;  %2583 = vmatpush.bf16.msrb.mxu2 %v3323_v15 }
 0x2c8   : > { %v1961_v58 = vpop.f32.mrf.mxu1  ;;  %v3106_v38 = vor.u32 %v3306_v50, %v3105_v1  ;;  %2612 = vmatpush.bf16.msrb.mxu3 %v3331_v57 }
 0x2c9   : > { %v2014_v11 = vpack.c.b16 %v2009_v33, %v2008_v48  ;;  %v1931_v41 = vadd.f32 %v1930_v26, %v1902_v36  ;;  %2375 = vmatpush.bf16.msrb.mxu0 %v3114_v61  ;;  %v3110_v26 = vor.u32 %v3305_v63, %v3107_v10  ;;  %v3097_v48 = vld [vmem:[#allocation8] sm:$0xf]  ;;  %v3304_v33 = vld [vmem:[#allocation8 + $0x4] sm:$0xf0] }
 0x2cb   : > { %2201 = vmatmul.bf16.gmra.mxu3 %v2014_v11  ;;  %v1960_v59 = vadd.f32 %v1959_v53, %v1931_v41  ;;  %v3303_v53 = vld [vmem:[#allocation8 + $0x4] sm:$0xf]  ;;  %v3099_v11 = vld [vmem:[#allocation8 + $0x8] sm:$0xf0]  ;;  %v3098_v41 = vor.u32 %v3304_v33, %v3097_v48  ;;  %2405 = vmatpush.bf16.msrb.mxu1 %v3110_v26 }
 0x2cc   : > { %v1874_v25 = vpop.f32.mrf.mxu2  ;;  %v1903_v30 = vpop.f32.mrf.mxu3  ;;  %v3330_v26 = vld [vmem:[%s4725_s5 + $0x58] sm:$0xff]  ;;  %v3321_v48 = vld [vmem:[%s4725_s5 + $0x10] sm:$0xff] }
 0x2cd   : > { %v1875_v4 = vadd.f32 %v3500_v44, %v1874_v25  ;;  %v1970_v27 = vpack.c.bf16 %v1960_v59, %v1960_v59  ;;  %2376 = vmatpush.bf16.msrb.mxu0 %v3106_v38  ;;  %v3102_v25 = vor.u32 %v3303_v53, %v3099_v11  ;;  %v3322_v38 = vld [vmem:[%s4725_s5 + $0x18] sm:$0xff]  ;;  %2613 = vmatpush.bf16.msrb.mxu3 %v3330_v26  ;;  %v3329_v33 = vld [vmem:[%s4725_s5 + $0x50] sm:$0xff]  ;;  %v3328_v53 = vld [vmem:[%s4725_s5 + $0x48] sm:$0xff] }
 0x2ce   : > { %2584 = vmatpush.bf16.msrb.mxu2 %v3322_v38  ;;  %v3319_v11 = vld [vmem:[%s4725_s5] sm:$0xff] }
 0x2cf   : > { %v1904_v34 = vadd.f32 %v1903_v30, %v1875_v4  ;;  %v2010_v19 = vunpack.c.l.b16 %v1970_v27  ;;  %2406 = vmatpush.bf16.msrb.mxu1 %v3102_v25  ;;  %v3491_v4 = vld [vmem:[#allocation7 + $0x1] ss:$0 sm:$0xff]  ;;  %v2260_v25 = vld [vmem:[%s403_s10] sm:$0x3] }
 0x2d1   : > { %v1933_v35 = vadd.f32 %v1932_v14, %v1904_v34  ;;  %2377 = vmatpush.bf16.msrb.mxu0 %v3098_v41  ;;  %2614 = vmatpush.bf16.msrb.mxu3 %v3329_v33  ;;  %v3327_v41 = vld [vmem:[%s4725_s5 + $0x40] sm:$0xff] }
 0x2d2   : > { %2585 = vmatpush.bf16.msrb.mxu2 %v3321_v48 }
 0x2d3   : > { %v1962_v60 = vadd.f32 %v1961_v58, %v1933_v35 }
 0x2d4   : > { %v2163_v16 = vpop.f32.mrf.mxu2 }
 0x2d5   : > { %v1971_v52 = vpack.c.bf16 %v1962_v60, %v1962_v60  ;;  %v2164_v59 = vadd.f32 %v3491_v4, %v2163_v16  ;;  %2615 = vmatpush.bf16.msrb.mxu3 %v3328_v53 }
 0x2d7   : > { %v2011_v3 = vunpack.c.l.b16 %v1971_v52 }
 0x2d9   : > { %v2015_v62 = vpack.c.b16 %v2011_v3, %v2010_v19  ;;  %2616 = vmatpush.bf16.msrb.mxu3 %v3327_v41 }
 0x2db   : > { %2206 = vmatmul.bf16.gmra.mxu3 %v2015_v62 }
 0x2dc   : > { %v2165_v36 = vpop.f32.mrf.mxu2 }
 0x2dd   : > { %v2166_v34 = vadd.f32 %v3491_v4, %v2165_v36  ;;  %v3320_v36 = vld [vmem:[%s4725_s5 + $0x8] sm:$0xff] }
 0x2de   : > { %2586 = vmatpush.bf16.msrb.mxu2 %v3320_v36 }
 0x2e2   : > { %2587 = vmatpush.bf16.msrb.mxu2 %v3319_v11 }
 0x2e4   : > { %v2168_v30 = vpop.f32.mrf.mxu2 }
 0x2e5   : > { %v2169_v62 = vadd.f32 %v3491_v4, %v2168_v30  ;;  %v2262_v30 = vperm.slane %v2260_v25, 0 }
 0x2ec   : > { %v2170_v52 = vpop.f32.mrf.mxu2 }
 0x2ed   : > { %v2171_v12 = vadd.f32 %v3491_v4, %v2170_v52 }
 0x2f4   : > { %v2173_v8 = vpop.f32.mrf.mxu2 }
 0x2f5   : > { %v2174_v5 = vadd.f32 %v3491_v4, %v2173_v8 }
 0x2fc   : > { %v2175_v56 = vpop.f32.mrf.mxu2 }
 0x2fd   : > { %v2176_v45 = vadd.f32 %v3491_v4, %v2175_v56 }
 0x304   : > { %v2178_v46 = vpop.f32.mrf.mxu2 }
 0x305   : > { %v2179_v23 = vadd.f32 %v3491_v4, %v2178_v46 }
 0x30c   : > { %v2180_v0 = vpop.f32.mrf.mxu2 }
 0x30d   : > { %v2181_v29 = vadd.f32 %v3491_v4, %v2180_v0 }
 0x32e   : > { %v2192_v44 = vpop.f32.mrf.mxu3 }
 0x32f   : > { %v2193_v14 = vadd.f32 %v2192_v44, %v2164_v59  ;;  %v2263_v59 = vperm.slane %v2260_v25, 1 }
 0x331   : > { %v2212_v27 = vmax.f32 %v2193_v14, 0.0 }
 0x336   : > { %v2194_v35 = vpop.f32.mrf.mxu3 }
 0x337   : > { %v2195_v58 = vadd.f32 %v2194_v35, %v2166_v34 }
 0x339   : > { %v2213_v60 = vmax.f32 %v2195_v58, 0.0 }
 0x33b   : > { %v3378_v19 = vpack.c.bf16 %v2213_v60, %v2212_v27 }
 0x33d   : > { %3379 = vst [vmem:[#allocation2] sm:$0xff] %v3378_v19  }
 0x33e   : > { %v2197_v3 = vpop.f32.mrf.mxu3 }
 0x33f   : > { %v2198_v9 = vadd.f32 %v2197_v3, %v2169_v62 }
 0x341   : > { %v2214_v31 = vmax.f32 %v2198_v9, 0.0 }
 0x344   : > { %v3299_v40 = vld [vmem:[#allocation2] sm:$0xff] }
 0x345   : > { %2378 = vmatmul.bf16.vlgmr.msrb.gmra.mxu0 %v3299_v40  ;;  %2407 = vmatmul.bf16.vlgmr.msrb.gmra.mxu1 %v3299_v40 }
 0x346   : > { %v2199_v20 = vpop.f32.mrf.mxu3 }
 0x347   : > { %v2200_v49 = vadd.f32 %v2199_v20, %v2171_v12 }
 0x349   : > { %v2215_v51 = vmax.f32 %v2200_v49, 0.0 }
 0x34b   : > { %v3383_v55 = vpack.c.bf16 %v2215_v51, %v2214_v31 }
 0x34d   : > { %3401 = vst [vmem:[#allocation2 + $0x8] sm:$0xff] %v3383_v55  }
 0x34e   : > { %v2202_v2 = vpop.f32.mrf.mxu3 }
 0x34f   : > { %v2203_v7 = vadd.f32 %v2202_v2, %v2174_v5 }
 0x351   : > { %v2216_v54 = vmax.f32 %v2203_v7, 0.0 }
 0x354   : > { %v3300_v18 = vld [vmem:[#allocation2 + $0x8] sm:$0xff] }
 0x355   : > { %2383 = vmatmul.bf16.gmra.mxu0 %v3300_v18  ;;  %2412 = vmatmul.bf16.gmra.mxu1 %v3300_v18 }
 0x356   : > { %v2204_v13 = vpop.f32.mrf.mxu3 }
 0x357   : > { %v2205_v24 = vadd.f32 %v2204_v13, %v2176_v45 }
 0x359   : > { %v2217_v47 = vmax.f32 %v2205_v24, 0.0 }
 0x35b   : > { %v3388_v16 = vpack.c.bf16 %v2217_v47, %v2216_v54 }
 0x35d   : > { %3402 = vst [vmem:[#allocation2 + $0x10] sm:$0xff] %v3388_v16  }
 0x35e   : > { %v2207_v39 = vpop.f32.mrf.mxu3 }
 0x35f   : > { %v2208_v32 = vadd.f32 %v2207_v39, %v2179_v23 }
 0x361   : > { %v2218_v1 = vmax.f32 %v2208_v32, 0.0 }
 0x364   : > { %v3301_v28 = vld [vmem:[#allocation2 + $0x10] sm:$0xff] }
 0x365   : > { %2388 = vmatmul.bf16.gmra.mxu0 %v3301_v28  ;;  %2417 = vmatmul.bf16.gmra.mxu1 %v3301_v28 }
 0x366   : > { %v2209_v61 = vpop.f32.mrf.mxu3 }
 0x367   : > { %v2210_v37 = vadd.f32 %v2209_v61, %v2181_v29 }
 0x369   : > { %v2219_v50 = vmax.f32 %v2210_v37, 0.0 }
 0x36b   : > { %v3393_v63 = vpack.c.bf16 %v2219_v50, %v2218_v1 }
 0x36d   : > { %3403 = vst [vmem:[#allocation2 + $0x18] sm:$0xff] %v3393_v63  }
 0x374   : > { %v3302_v10 = vld [vmem:[#allocation2 + $0x18] sm:$0xff] }
 0x375   : > { %2393 = vmatmul.bf16.gmra.mxu0 %v3302_v10  ;;  %2422 = vmatmul.bf16.gmra.mxu1 %v3302_v10 }
 0x3c2   : > { %v2379_v44 = vpop.f32.mrf.mxu0  ;;  %v2408_v4 = vpop.f32.mrf.mxu1 }
 0x3c3   : > { %v2380_v34 = vadd.f32 %v2379_v44, %v2262_v30  ;;  %v2409_v14 = vadd.f32 %v2408_v4, %v2263_v59 }
 0x3c5   : > { %v2428_v52 = vmax.f32 %v2380_v34, 0.0  ;;  %v2429_v19 = vmax.f32 %v2409_v14, 0.0 }
 0x3ca   : > { %v2381_v35 = vpop.f32.mrf.mxu0  ;;  %v2410_v58 = vpop.f32.mrf.mxu1 }
 0x3cb   : > { %v2382_v27 = vadd.f32 %v2381_v35, %v2262_v30  ;;  %v2411_v60 = vadd.f32 %v2410_v58, %v2263_v59 }
 0x3cd   : > { %v2430_v3 = vmax.f32 %v2382_v27, 0.0  ;;  %v2431_v62 = vmax.f32 %v2411_v60, 0.0 }
 0x3cf   : > { %v2444_v8 = vpack.c.bf16 %v2430_v3, %v2428_v52  ;;  %v2445_v40 = vpack.c.bf16 %v2431_v62, %v2429_v19 }
 0x3d1   : > { %2588 = vmatmul.bf16.vlgmr.msrb.gmra.mxu2 %v2444_v8  ;;  %2617 = vmatmul.bf16.vlgmr.msrb.gmra.mxu3 %v2445_v40 }
 0x3d2   : > { %v2384_v12 = vpop.f32.mrf.mxu0  ;;  %v2413_v9 = vpop.f32.mrf.mxu1 }
 0x3d3   : > { %v2385_v20 = vadd.f32 %v2384_v12, %v2262_v30  ;;  %v2414_v49 = vadd.f32 %v2413_v9, %v2263_v59 }
 0x3d5   : > { %v2432_v2 = vmax.f32 %v2385_v20, 0.0  ;;  %v2433_v5 = vmax.f32 %v2414_v49, 0.0 }
 0x3da   : > { %v2386_v31 = vpop.f32.mrf.mxu0  ;;  %v2415_v51 = vpop.f32.mrf.mxu1 }
 0x3db   : > { %v2387_v55 = vadd.f32 %v2386_v31, %v2262_v30  ;;  %v2416_v56 = vadd.f32 %v2415_v51, %v2263_v59 }
 0x3dd   : > { %v2434_v18 = vmax.f32 %v2387_v55, 0.0  ;;  %v2435_v45 = vmax.f32 %v2416_v56, 0.0 }
 0x3df   : > { %v2446_v7 = vpack.c.bf16 %v2434_v18, %v2432_v2  ;;  %v2447_v13 = vpack.c.bf16 %v2435_v45, %v2433_v5 }
 0x3e1   : > { %2593 = vmatmul.bf16.gmra.mxu2 %v2446_v7  ;;  %2622 = vmatmul.bf16.gmra.mxu3 %v2447_v13 }
 0x3e2   : > { %v2389_v17 = vpop.f32.mrf.mxu0  ;;  %v2418_v22 = vpop.f32.mrf.mxu1 }
 0x3e3   : > { %v2390_v24 = vadd.f32 %v2389_v17, %v2262_v30  ;;  %v2419_v46 = vadd.f32 %v2418_v22, %v2263_v59 }
 0x3e5   : > { %v2436_v16 = vmax.f32 %v2390_v24, 0.0  ;;  %v2437_v21 = vmax.f32 %v2419_v46, 0.0 }
 0x3ea   : > { %v2391_v42 = vpop.f32.mrf.mxu0  ;;  %v2420_v6 = vpop.f32.mrf.mxu1 }
 0x3eb   : > { %v2392_v54 = vadd.f32 %v2391_v42, %v2262_v30  ;;  %v2421_v47 = vadd.f32 %v2420_v6, %v2263_v59 }
 0x3ed   : > { %v2438_v43 = vmax.f32 %v2392_v54, 0.0  ;;  %v2439_v39 = vmax.f32 %v2421_v47, 0.0 }
 0x3ef   : > { %v2448_v15 = vpack.c.bf16 %v2438_v43, %v2436_v16  ;;  %v2449_v57 = vpack.c.bf16 %v2439_v39, %v2437_v21 }
 0x3f1   : > { %2598 = vmatmul.bf16.gmra.mxu2 %v2448_v15  ;;  %2627 = vmatmul.bf16.gmra.mxu3 %v2449_v57 }
 0x3f2   : > { %v2394_v0 = vpop.f32.mrf.mxu0  ;;  %v2423_v23 = vpop.f32.mrf.mxu1 }
 0x3f3   : > { %v2395_v28 = vadd.f32 %v2394_v0, %v2262_v30  ;;  %v2424_v29 = vadd.f32 %v2423_v23, %v2263_v59 }
 0x3f5   : > { %v2440_v50 = vmax.f32 %v2395_v28, 0.0  ;;  %v2441_v63 = vmax.f32 %v2424_v29, 0.0 }
 0x3fa   : > { %v2396_v32 = vpop.f32.mrf.mxu0  ;;  %v2425_v61 = vpop.f32.mrf.mxu1 }
 0x3fb   : > { %v2397_v37 = vadd.f32 %v2396_v32, %v2262_v30  ;;  %v2426_v1 = vadd.f32 %v2425_v61, %v2263_v59 }
 0x3fd   : > { %v2442_v10 = vmax.f32 %v2397_v37, 0.0  ;;  %v2443_v38 = vmax.f32 %v2426_v1, 0.0 }
 0x3ff   : > { %v2450_v26 = vpack.c.bf16 %v2442_v10, %v2440_v50  ;;  %v2451_v48 = vpack.c.bf16 %v2443_v38, %v2441_v63 }
 0x401   : > { %2603 = vmatmul.bf16.gmra.mxu2 %v2450_v26  ;;  %2632 = vmatmul.bf16.gmra.mxu3 %v2451_v48 }
 0x454   : > { %v2589_v33 = vpop.f32.mrf.mxu2  ;;  %v2618_v36 = vpop.f32.mrf.mxu3 }
 0x455   : > { %v2619_v53 = vadd.f32 %v2618_v36, %v2589_v33 }
 0x457   : > { %2639 = vst.msk [vmem:[%s4689_s26] sm:$0xff] %vm2638_vm4, %v2619_v53 }
 0x45c   : > { %v2591_v11 = vpop.f32.mrf.mxu2  ;;  %v2620_v41 = vpop.f32.mrf.mxu3 }
 0x45d   : > { %v2621_v25 = vadd.f32 %v2620_v41, %v2591_v11 }
 0x45f   : > { %2640 = vst.msk [vmem:[%s4689_s26 + $0x8] sm:$0xff] %vm2638_vm4, %v2621_v25 }
 0x464   : > { %v2594_v44 = vpop.f32.mrf.mxu2  ;;  %v2623_v4 = vpop.f32.mrf.mxu3 }
 0x465   : > { %v2624_v30 = vadd.f32 %v2623_v4, %v2594_v44 }
 0x467   : > { %2641 = vst.msk [vmem:[%s4689_s26 + $0x10] sm:$0xff] %vm2638_vm4, %v2624_v30 }
 0x46c   : > { %v2596_v59 = vpop.f32.mrf.mxu2  ;;  %v2625_v34 = vpop.f32.mrf.mxu3 }
 0x46d   : > { %v2626_v14 = vadd.f32 %v2625_v34, %v2596_v59 }
 0x46f   : > { %2642 = vst.msk [vmem:[%s4689_s26 + $0x18] sm:$0xff] %vm2638_vm4, %v2626_v14 }
 0x474   : > { %v2599_v35 = vpop.f32.mrf.mxu2  ;;  %v2628_v58 = vpop.f32.mrf.mxu3 }
 0x475   : > { %v2629_v27 = vadd.f32 %v2628_v58, %v2599_v35 }
 0x477   : > { %2643 = vst.msk [vmem:[%s4689_s26 + $0x20] sm:$0xff] %vm2638_vm4, %v2629_v27 }
 0x47c   : > { %v2601_v60 = vpop.f32.mrf.mxu2  ;;  %v2630_v52 = vpop.f32.mrf.mxu3 }
 0x47d   : > { %v2631_v19 = vadd.f32 %v2630_v52, %v2601_v60 }
 0x47f   : > { %2644 = vst.msk [vmem:[%s4689_s26 + $0x28] sm:$0xff] %vm2638_vm4, %v2631_v19 }
 0x484   : > { %v2604_v3 = vpop.f32.mrf.mxu2  ;;  %v2633_v62 = vpop.f32.mrf.mxu3 }
 0x485   : > { %v2634_v8 = vadd.f32 %v2633_v62, %v2604_v3 }
 0x487   : > { %2645 = vst.msk [vmem:[%s4689_s26 + $0x30] sm:$0xff] %vm2638_vm4, %v2634_v8 }
 0x48c   : > { %v2606_v40 = vpop.f32.mrf.mxu2  ;;  %v2635_v12 = vpop.f32.mrf.mxu3 }
 0x48d   : > { %v2636_v9 = vadd.f32 %v2635_v12, %v2606_v40 }
 0x48f   : > { %2646 = vst.msk [vmem:[%s4689_s26 + $0x38] sm:$0xff] %vm2638_vm4, %v2636_v9 }
 0x490 PF: > { %s4796_s9 = smov %s3830_s27  ;;  %p18_p4 = scmp.ge.s32.totalorder %s3821_s24, 4  }
 0x491   : > { %s4797_s27 = smov %s3689_s28  ;;  %s4798_s28 = smov %s3693_s29 }
 0x492   : > { %s4799_s29 = smov %s4796_s9  ;;  %s4800_s30 = smov %s3821_s24 }
 0x493   :  { %20 = sbr.rel (!%p18_p4) target bundleno = 4 (0x4), region = 113 }
 0x498   :  { %2668 = vsyncpa [#allocation4], 1 }
 0x499   :  { %2670 = vsyncpa [#allocation4 + $0x1], 1 }
 0x49a   :  { %2671 = vsyncpa [#allocation6], 1 }
 0x49b   :  { %2672 = vsyncpa [#allocation9], 1 }

</bundles_post_ra>
